<compile_context>
chip_gen: v7x
topology: tpu7x:2x2x1
jax: 0.10.0
libtpu: 0.0.40
codegen_flags: <defaults>
</compile_context>

<pallas_src>
import numpy as np
import jax
import jax.numpy as jnp
from jax import lax
from jax.experimental import pallas as pl
from jax.experimental.pallas import tpu as pltpu

KITTI_NORM = 91875.68
SF_NORM = 91873.4
MiB = 1024 * 1024

# slots in the per-tile partial-sum vector
(S_CNT0, S_ABS0, S_SQR0, S_SQ0, S_LSQ0, S_A1, S_A2, S_A3,
 S_OTL0, S_FEPE, S_FOTL, S_OTL1, S_SFOTL) = range(13)
N_SUMS = 13
N_PLANES = 11 + 6  # f32 image planes moved per pixel (inputs + map outputs)


def _round_up(x, m):
    return -(-x // m) * m


def _vmem_capacity_bytes():
    """Trace-time VMEM size; falls back to 128 MiB (v5e/v6e) if unavailable."""
    try:
        info = pltpu.get_tpu_info()
        for name in ("vmem_capacity_bytes", "vmem_bytes", "vmem_size_bytes"):
            cap = getattr(info, name, None)
            if cap:
                return int(cap)
    except Exception:
        pass
    return 128 * MiB


def _pick_tile_h(h, w, budget_bytes, min_tiles=1):
    """Balanced H tiles (multiple of 8) that fit the double-buffered budget."""
    per_row = 2 * N_PLANES * w * 4            # double-buffered bytes per tile row
    cap = max(8, (budget_bytes // per_row) // 8 * 8)
    h8 = _round_up(h, 8)
    n_tiles = max(min_tiles, -(-h8 // cap))
    tile = _round_up(-(-h // n_tiles), 8)
    n_tiles = -(-h // tile)
    return tile, n_tiles


def _interpolate2d_bilinear_align_corners(x, out_h, out_w):
    """tf.interpolate(..., mode='bilinear', align_corners=True) for NCHW."""
    b, c, h, w = x.shape
    x = x.astype(jnp.float32)
    if (h, w) == (out_h, out_w):
        return x

    def coords(n_in, n_out):
        if n_out <= 1 or n_in <= 1:
            return jnp.zeros((max(n_out, 1),), jnp.float32)
        return jnp.arange(n_out, dtype=jnp.float32) * ((n_in - 1) / (n_out - 1))

    ys = coords(h, out_h)
    xs = coords(w, out_w)
    y0 = jnp.clip(jnp.floor(ys).astype(jnp.int32), 0, max(h - 2, 0))
    x0 = jnp.clip(jnp.floor(xs).astype(jnp.int32), 0, max(w - 2, 0))
    y1 = jnp.minimum(y0 + 1, h - 1)
    x1 = jnp.minimum(x0 + 1, w - 1)
    wy = (ys - y0.astype(jnp.float32))[None, None, :, None]
    wx = (xs - x0.astype(jnp.float32))[None, None, None, :]
    rows = x[:, :, y0, :] * (1.0 - wy) + x[:, :, y1, :] * wy
    return rows[:, :, :, x0] * (1.0 - wx) + rows[:, :, :, x1] * wx


def _make_kernel(height, width, tile_h):
    width_f = float(width)
    f32 = jnp.float32

    def _recip(x):
        # EUP approx reciprocal + one Newton step (~f32 accurate, no VALU divide chain)
        r = pl.reciprocal(x, approx=True)
        return r * (2.0 - x * r)

    def kernel(fx_ref, k_ref, ik_ref,
               gtf_ref, fm_ref, gtd_ref, dm_ref, gtd2_ref, d2m_ref,
               pred_ref, sf_ref,
               sums_ref, odisp_ref, odepth_ref, oflow_ref,
               odispn_ref, odepthn_ref):
        b = pl.program_id(0)
        ti = pl.program_id(1)

        partial = [None] * N_SUMS

        def put(slot, x):                     # sum immediately -> short live ranges
            partial[slot] = jnp.sum(x)

        # validity of rows in the (possibly ragged) last H tile
        row_valid = (lax.broadcasted_iota(jnp.int32, (tile_h, width), 0)
                     + ti * tile_h) < height

        fx054 = fx_ref[b] * 0.54

        # ---- out_disp_l1 = interpolate2d_as(disp_l1_pp) * width; _disp2depth ----
        out_disp = pred_ref[0, 0] * width_f
        pos_f = (out_disp > 0.0).astype(f32)
        # NOTE: shared 1/out_disp reused for log_rms & a1-a3; assumes the network
        # disparity is > 0 inside the GT mask (true for self-mono-sf outputs).
        inv_pred0 = 1.0 / (out_disp + (1.0 - pos_f))     # exact (metric-critical)
        depth_un = fx054 * inv_pred0                     # _disp2depth_kitti_K
        out_depth = jnp.clip(depth_un, 0.001, 80.0)
        odisp_ref[0, 0] = out_disp
        odepth_ref[0, 0] = out_depth

        # ---- eval_module_disp_depth(gt_disp, mask0, out_disp) ----
        gt_d0 = gtd_ref[0, 0]
        m0 = (dm_ref[0, 0] == 1.0) & row_valid
        m0f = m0.astype(f32)
        put(S_CNT0, m0f)
        diff0 = gt_d0 - out_disp
        adiff0 = jnp.abs(diff0)
        epe0 = jnp.where(m0, adiff0, 0.0)
        otl0 = (epe0 > 3.0) & (epe0 > 0.05 * gt_d0) & m0   # divide-free outlier test
        put(S_OTL0, otl0.astype(f32))
        gt0_safe = gt_d0 + (1.0 - m0f)
        inv_gt0 = _recip(gt0_safe)
        put(S_ABS0, jnp.where(m0, adiff0 * inv_gt0, 0.0))
        sq0 = diff0 * diff0
        put(S_SQR0, jnp.where(m0, sq0 * inv_gt0, 0.0))
        put(S_SQ0, jnp.where(m0, sq0, 0.0))
        log_ratio = jnp.log(gt0_safe * inv_pred0)          # log(gt)-log(pred), one log
        put(S_LSQ0, jnp.where(m0, log_ratio * log_ratio, 0.0))
        thr = jnp.maximum(gt_d0 * inv_pred0, out_disp * inv_gt0)
        put(S_A1, (m0 & (thr < 1.25)).astype(f32))
        put(S_A2, (m0 & (thr < 1.25 ** 2)).astype(f32))
        put(S_A3, (m0 & (thr < 1.25 ** 3)).astype(f32))

        # ---- projectSceneFlow2Flow(K, out_sceneflow, out_disp_l_pp) ----
        k00 = k_ref[b, 0]; k01 = k_ref[b, 1]; k02 = k_ref[b, 2]
        k10 = k_ref[b, 3]; k11 = k_ref[b, 4]; k12 = k_ref[b, 5]
        k20 = k_ref[b, 6]; k21 = k_ref[b, 7]; k22 = k_ref[b, 8]
        i00 = ik_ref[b, 0]; i01 = ik_ref[b, 1]; i02 = ik_ref[b, 2]
        i10 = ik_ref[b, 3]; i11 = ik_ref[b, 4]; i12 = ik_ref[b, 5]
        i20 = ik_ref[b, 6]; i21 = ik_ref[b, 7]; i22 = ik_ref[b, 8]
        sf_x = sf_ref[0, 0]
        sf_y = sf_ref[0, 1]
        sf_z = sf_ref[0, 2]
        u = lax.broadcasted_iota(jnp.int32, (tile_h, width), 1).astype(f32)
        v = (lax.broadcasted_iota(jnp.int32, (tile_h, width), 0)
             + ti * tile_h).astype(f32)
        X = (i00 * u + i01 * v + i02) * depth_un + sf_x
        Y = (i10 * u + i11 * v + i12) * depth_un + sf_y
        Z = (i20 * u + i21 * v + i22) * depth_un + sf_z
        inv_pz = _recip(k20 * X + k21 * Y + k22 * Z + 1e-8)
        flow_u = (k00 * X + k01 * Y + k02 * Z) * inv_pz - u
        flow_v = (k10 * X + k11 * Y + k12 * Z) * inv_pz - v
        oflow_ref[0, 0] = flow_u
        oflow_ref[0, 1] = flow_v

        # ---- flow EPE / outlier (squared test: no ||gt_flow|| sqrt) ----
        gt_u = gtf_ref[0, 0]
        gt_v = gtf_ref[0, 1]
        fmask = (fm_ref[0, 0] == 1.0) & row_valid
        du = gt_u - flow_u
        dv = gt_v - flow_v
        epe_sq = du * du + dv * dv
        put(S_FEPE, jnp.where(fmask, jnp.sqrt(epe_sq), 0.0))
        fotl = (epe_sq > 9.0) & (epe_sq > 0.0025 * (gt_u * gt_u + gt_v * gt_v)) & fmask
        put(S_FOTL, fotl.astype(f32))

        # ---- next-frame disparity (depth + sf_z) and its outlier map ----
        depth_next = out_depth + sf_z
        disp_next = fx054 * _recip(depth_next)             # _depth2disp_kitti_K
        odepthn_ref[0, 0] = depth_next
        odispn_ref[0, 0] = disp_next
        gt_d2 = gtd2_ref[0, 0]
        m2 = (d2m_ref[0, 0] == 1.0) & row_valid
        epe1 = jnp.where(m2, jnp.abs(gt_d2 - disp_next), 0.0)
        otl1 = (epe1 > 3.0) & (epe1 > 0.05 * gt_d2) & m2
        put(S_OTL1, otl1.astype(f32))

        sf_otl = (fotl | otl0 | otl1) & fmask & m0 & m2
        put(S_SFOTL, sf_otl.astype(f32))

        # ---- per-tile partial sums as a lane-dense (8,128) block (row 0 only) ----
        lane = lax.broadcasted_iota(jnp.int32, (8, 128), 1)
        row = lax.broadcasted_iota(jnp.int32, (8, 128), 0)
        blk = jnp.zeros((8, 128), f32)
        for j, s in enumerate(partial):
            blk = blk + jnp.where((row == 0) & (lane == j), s, 0.0)
        sums_ref[0, 0] = blk

    return kernel


def eval_sceneflow_kitti_train(disp_l1_pp, flow_f_pp,
                               target_flow, target_flow_mask,
                               target_disp, target_disp_mask,
                               target_disp2_occ, target_disp2_mask_occ,
                               input_k_l1):
    """Numeric forward of Eval_SceneFlow_KITTI_Train.

    Returns (loss_dict, disp0_metrics, output_maps)."""
    f32 = jnp.float32
    B, _, H, W = target_disp.shape

    # glue: interpolate2d_as(..., mode='bilinear', align_corners=True)
    pred_disp = _interpolate2d_bilinear_align_corners(disp_l1_pp, H, W)
    out_sf = _interpolate2d_bilinear_align_corners(flow_f_pp, H, W)

    k = input_k_l1.astype(f32)
    fx = k[:, 0, 0]
    ik = jnp.linalg.inv(k)
    kflat = k.reshape(B, 9)
    ikflat = ik.reshape(B, 9)

    # generation-aware tiling / VMEM budget (64 MiB on v7x, 128 MiB on v5e/v6e)
    cap = _vmem_capacity_bytes()
    tile_budget = max(16 * MiB, min(cap // 2 - 8 * MiB, 64 * MiB))
    min_tiles = 2 if B == 1 else 1            # keep both v7x TensorCores busy
    tile_h, n_tiles = _pick_tile_h(H, W, tile_budget, min_tiles)

    per_step_bytes = N_PLANES * tile_h * W * 4
    vmem_limit = int(min(cap * 3 // 4,
                         max(32 * MiB, 2 * per_step_bytes + 16 * MiB)))

    smem_spec = pl.BlockSpec(memory_space=pltpu.MemorySpace.SMEM)

    def map_spec(c):
        return pl.BlockSpec((1, c, tile_h, W), lambda b, i: (b, 0, i, 0))

    as_f32 = lambda a: a.astype(f32)

    kernel = _make_kernel(H, W, tile_h)
    outs = pl.pallas_call(
        kernel,
        out_shape=(
            jax.ShapeDtypeStruct((B, n_tiles, 8, 128), f32),  # partial sums
            jax.ShapeDtypeStruct((B, 1, H, W), f32),           # out_disp_l_pp
            jax.ShapeDtypeStruct((B, 1, H, W), f32),           # out_depth_l_pp
            jax.ShapeDtypeStruct((B, 2, H, W), f32),           # out_flow_pp
            jax.ShapeDtypeStruct((B, 1, H, W), f32),           # out_disp_l_pp_next
            jax.ShapeDtypeStruct((B, 1, H, W), f32),           # out_depth_l_pp_next
        ),
        grid=(B, n_tiles),
        in_specs=[smem_spec, smem_spec, smem_spec,
                  map_spec(2), map_spec(1), map_spec(1), map_spec(1),
                  map_spec(1), map_spec(1), map_spec(1), map_spec(3)],
        out_specs=(
            pl.BlockSpec((1, 1, 8, 128), lambda b, i: (b, i, 0, 0)),
            map_spec(1), map_spec(1), map_spec(2), map_spec(1), map_spec(1),
        ),
        compiler_params=pltpu.CompilerParams(
            dimension_semantics=("parallel", "parallel"),
            vmem_limit_bytes=vmem_limit),
    )(fx, kflat, ikflat,
      as_f32(target_flow), as_f32(target_flow_mask),
      as_f32(target_disp), as_f32(target_disp_mask),
      as_f32(target_disp2_occ), as_f32(target_disp2_mask_occ),
      pred_disp, out_sf)

    partial, out_disp, out_depth, out_flow, out_disp_n, out_depth_n = outs
    s = jnp.sum(partial, axis=(0, 1, 2))

    count0 = s[S_CNT0]
    loss_dict = {
        "d_abs": s[S_ABS0] / count0,
        "d_sq": s[S_SQR0] / count0,
        "d1": s[S_OTL0] / B / KITTI_NORM,
        "f_epe": s[S_FEPE] / B / KITTI_NORM,
        "f1": s[S_FOTL] / B / KITTI_NORM,
        "d2": s[S_OTL1] / B / KITTI_NORM,
        "sf": s[S_SFOTL] / B / SF_NORM,
    }
    disp0_metrics = {  # full compute_errors of the first eval_module_disp_depth
        "abs_rel": loss_dict["d_abs"],
        "sq_rel": loss_dict["d_sq"],
        "rms": jnp.sqrt(s[S_SQ0] / count0),
        "log_rms": jnp.sqrt(s[S_LSQ0] / count0),
        "a1": s[S_A1] / count0,
        "a2": s[S_A2] / count0,
        "a3": s[S_A3] / count0,
    }
    output_maps = {
        "out_disp_l_pp": out_disp,
        "out_depth_l_pp": out_depth,
        "out_flow_pp": out_flow,
        "out_disp_l_pp_next": out_disp_n,
        "out_depth_l_pp_next": out_depth_n,
    }
    return loss_dict, disp0_metrics, output_maps


# ----------------------------------------------------------------------------
# Pure-JAX reference mirroring the PyTorch ops directly (eager, boolean index).
# ----------------------------------------------------------------------------
def _reference(disp_l1_pp, flow_f_pp, target_flow, target_flow_mask,
               target_disp, target_disp_mask, target_disp2_occ,
               target_disp2_mask_occ, input_k_l1):
    f32 = jnp.float32
    B, _, H, W = target_disp.shape
    k = input_k_l1.astype(f32)
    fx = k[:, 0, 0]

    def disp2depth(disp, kv):
        mask = (disp > 0).astype(f32)
        return kv[:, None, None, None] * 0.54 / (disp + (1.0 - mask))

    def depth2disp(depth, kv):
        return kv[:, None, None, None] * 0.54 / depth

    pred = _interpolate2d_bilinear_align_corners(disp_l1_pp, H, W)
    sf = _interpolate2d_bilinear_align_corners(flow_f_pp, H, W)

    gt_flow = target_flow.astype(f32)
    fmask = (target_flow_mask == 1).astype(f32)
    gt_disp = target_disp.astype(f32)
    m0 = (target_disp_mask == 1).astype(f32)
    gt_disp2 = target_disp2_occ.astype(f32)
    m2 = (target_disp2_mask_occ == 1).astype(f32)
    gt_sf_mask = fmask * m0 * m2

    out_disp = pred * float(W)
    out_depth = jnp.clip(disp2depth(out_disp, fx), 0.001, 80.0)

    epe0 = jnp.abs(gt_disp - out_disp) * m0
    otl0 = (epe0 > 3).astype(f32) * ((epe0 / gt_disp) > 0.05).astype(f32) * m0
    d1 = jnp.mean(jnp.sum(otl0.reshape(B, -1), axis=1)) / KITTI_NORM
    mb = target_disp_mask == 1
    gtv, prv = gt_disp[mb], out_disp[mb]
    thrv = jnp.maximum(gtv / prv, prv / gtv)
    disp0_metrics = {
        "abs_rel": jnp.mean(jnp.abs(gtv - prv) / gtv),
        "sq_rel": jnp.mean((gtv - prv) ** 2 / gtv),
        "rms": jnp.sqrt(jnp.mean((gtv - prv) ** 2)),
        "log_rms": jnp.sqrt(jnp.mean((jnp.log(gtv) - jnp.log(prv)) ** 2)),
        "a1": jnp.mean((thrv < 1.25).astype(f32)),
        "a2": jnp.mean((thrv < 1.25 ** 2).astype(f32)),
        "a3": jnp.mean((thrv < 1.25 ** 3).astype(f32)),
    }

    depth_proj = disp2depth(out_disp, fx)
    u = jnp.broadcast_to(jnp.arange(W, dtype=f32)[None, None, None, :], (B, 1, H, W))
    v = jnp.broadcast_to(jnp.arange(H, dtype=f32)[None, None, :, None], (B, 1, H, W))
    pix = jnp.concatenate([u, v, jnp.ones((B, 1, H, W), f32)], axis=1)
    invk = jnp.linalg.inv(k)
    pts = jnp.einsum("bij,bjhw->bihw", invk, pix) * depth_proj
    pts_t = pts + sf
    proj = jnp.einsum("bij,bjhw->bihw", k, pts_t)
    coord = proj[:, 0:2] / (proj[:, 2:3] + 1e-8)
    out_flow = coord - pix[:, 0:2]

    valid_epe = jnp.linalg.norm(gt_flow - out_flow, axis=1, keepdims=True) * fmask
    f_epe = jnp.mean(jnp.sum(valid_epe.reshape(B, -1), axis=1)) / KITTI_NORM
    mag = jnp.linalg.norm(gt_flow, axis=1, keepdims=True) + 1e-8
    fotl = (valid_epe > 3).astype(f32) * ((valid_epe / mag) > 0.05).astype(f32) * fmask
    f1 = jnp.mean(jnp.sum(fotl.reshape(B, -1), axis=1)) / KITTI_NORM

    out_depth_next = out_depth + sf[:, 2:3]
    out_disp_next = depth2disp(out_depth_next, fx)
    epe1 = jnp.abs(gt_disp2 - out_disp_next) * m2
    otl1 = (epe1 > 3).astype(f32) * ((epe1 / gt_disp2) > 0.05).astype(f32) * m2
    d2 = jnp.mean(jnp.sum(otl1.reshape(B, -1), axis=1)) / KITTI_NORM

    sf_otl = ((fotl > 0) | (otl0 > 0) | (otl1 > 0)).astype(f32) * gt_sf_mask
    sfv = jnp.mean(jnp.sum(sf_otl.reshape(B, -1), axis=1)) / SF_NORM

    loss_dict = {"d_abs": disp0_metrics["abs_rel"], "d_sq": disp0_metrics["sq_rel"],
                 "d1": d1, "f_epe": f_epe, "f1": f1, "d2": d2, "sf": sfv}
    output_maps = {"out_disp_l_pp": out_disp, "out_depth_l_pp": out_depth,
                   "out_flow_pp": out_flow, "out_disp_l_pp_next": out_disp_next,
                   "out_depth_l_pp_next": out_depth_next}
    return loss_dict, disp0_metrics, output_maps


if __name__ == "__main__":
    key = jax.random.PRNGKey(0)
    ks = jax.random.split(key, 8)
    B, H, W = 2, 64, 128
    h, w = H // 2, W // 2

    gt0_raw = jax.random.uniform(ks[0], (B, 1, H, W), jnp.float32, 0.0, 80.0)
    target_disp = jnp.where(gt0_raw > 15.0, gt0_raw, 0.0)
    target_disp_mask = (target_disp > 0).astype(jnp.float32)

    gt2_raw = jax.random.uniform(ks[1], (B, 1, H, W), jnp.float32, 0.0, 80.0)
    target_disp2_occ = jnp.where(gt2_raw > 25.0, gt2_raw, 0.0)
    target_disp2_mask_occ = (target_disp2_occ > 0).astype(jnp.float32)

    target_flow = jax.random.uniform(ks[2], (B, 2, H, W), jnp.float32, -5.0, 5.0)
    target_flow_mask = (jax.random.uniform(ks[3], (B, 1, H, W)) > 0.3).astype(jnp.float32)

    disp_l1_pp = jax.random.uniform(ks[4], (B, 1, h, w), jnp.float32, 0.05, 0.7)
    flow_xy = jax.random.uniform(ks[5], (B, 2, h, w), jnp.float32, -1.0, 1.0)
    flow_z = jax.random.uniform(ks[6], (B, 1, h, w), jnp.float32, 0.05, 0.5)
    flow_f_pp = jnp.concatenate([flow_xy, flow_z], axis=1)

    input_k_l1 = jnp.stack([
        jnp.array([[640.0, 0.0, 64.0], [0.0, 640.0, 32.0], [0.0, 0.0, 1.0]], jnp.float32),
        jnp.array([[600.0, 0.0, 60.0], [0.0, 610.0, 30.0], [0.0, 0.0, 1.0]], jnp.float32),
    ], axis=0)

    loss, extra, maps = eval_sceneflow_kitti_train(
        disp_l1_pp, flow_f_pp, target_flow, target_flow_mask,
        target_disp, target_disp_mask, target_disp2_occ, target_disp2_mask_occ,
        input_k_l1)
    jax.block_until_ready((loss, extra, maps))

    ref_loss, ref_extra, ref_maps = _reference(
        disp_l1_pp, flow_f_pp, target_flow, target_flow_mask,
        target_disp, target_disp_mask, target_disp2_occ, target_disp2_mask_occ,
        input_k_l1)

    for name in loss:
        np.testing.assert_allclose(np.asarray(loss[name]), np.asarray(ref_loss[name]),
                                   rtol=1e-4, atol=1e-4, err_msg=name)
    for name in extra:
        np.testing.assert_allclose(np.asarray(extra[name]), np.asarray(ref_extra[name]),
                                   rtol=1e-4, atol=1e-3, err_msg=name)
    for name in maps:
        np.testing.assert_allclose(np.asarray(maps[name]), np.asarray(ref_maps[name]),
                                   rtol=1e-4, atol=1e-2, err_msg=name)

    print("KERNEL_OK")
</pallas_src>

<mosaic_0001>
module attributes {stable_mosaic.version = 11 : i64} {
  func.func @kernel(%arg0: i32, %arg1: i32, %arg2: memref<2xf32, #tpu.memory_space<smem>>, %arg3: memref<2x9xf32, #tpu.memory_space<smem>>, %arg4: memref<2x9xf32, #tpu.memory_space<smem>>, %arg5: memref<1x2x64x128xf32, #tpu.memory_space<vmem>>, %arg6: memref<1x1x64x128xf32, #tpu.memory_space<vmem>>, %arg7: memref<1x1x64x128xf32, #tpu.memory_space<vmem>>, %arg8: memref<1x1x64x128xf32, #tpu.memory_space<vmem>>, %arg9: memref<1x1x64x128xf32, #tpu.memory_space<vmem>>, %arg10: memref<1x1x64x128xf32, #tpu.memory_space<vmem>>, %arg11: memref<1x1x64x128xf32, #tpu.memory_space<vmem>>, %arg12: memref<1x3x64x128xf32, #tpu.memory_space<vmem>>, %arg13: memref<1x1x8x128xf32, #tpu.memory_space<vmem>>, %arg14: memref<1x1x64x128xf32, #tpu.memory_space<vmem>>, %arg15: memref<1x1x64x128xf32, #tpu.memory_space<vmem>>, %arg16: memref<1x2x64x128xf32, #tpu.memory_space<vmem>>, %arg17: memref<1x1x64x128xf32, #tpu.memory_space<vmem>>, %arg18: memref<1x1x64x128xf32, #tpu.memory_space<vmem>>) attributes {dimension_semantics = [#tpu.dimension_semantics<parallel>, #tpu.dimension_semantics<parallel>], iteration_bounds = array<i64: 2, 1>, scalar_prefetch = 0 : i64, scratch_operands = 0 : i64, tpu.core_type = #tpu.core_type<tc>, window_params = [{transform_indices = @transform_0, window_bounds = array<i64: 2>}, {transform_indices = @transform_1, window_bounds = array<i64: 2, 9>}, {transform_indices = @transform_2, window_bounds = array<i64: 2, 9>}, {transform_indices = @transform_3, window_bounds = array<i64: 1, 2, 64, 128>}, {transform_indices = @transform_4, window_bounds = array<i64: 1, 1, 64, 128>}, {transform_indices = @transform_5, window_bounds = array<i64: 1, 1, 64, 128>}, {transform_indices = @transform_6, window_bounds = array<i64: 1, 1, 64, 128>}, {transform_indices = @transform_7, window_bounds = array<i64: 1, 1, 64, 128>}, {transform_indices = @transform_8, window_bounds = array<i64: 1, 1, 64, 128>}, {transform_indices = @transform_9, window_bounds = array<i64: 1, 1, 64, 128>}, {transform_indices = @transform_10, window_bounds = array<i64: 1, 3, 64, 128>}, {transform_indices = @transform_11, window_bounds = array<i64: 1, 1, 8, 128>}, {transform_indices = @transform_12, window_bounds = array<i64: 1, 1, 64, 128>}, {transform_indices = @transform_13, window_bounds = array<i64: 1, 1, 64, 128>}, {transform_indices = @transform_14, window_bounds = array<i64: 1, 2, 64, 128>}, {transform_indices = @transform_15, window_bounds = array<i64: 1, 1, 64, 128>}, {transform_indices = @transform_16, window_bounds = array<i64: 1, 1, 64, 128>}]} {
    %0 = tpu.iota {dimensions = array<i32: 0>} : vector<64x128xi32>
    %c64_i32 = arith.constant 64 : i32
    %1 = arith.muli %arg1, %c64_i32 : i32
    %2 = vector.broadcast %1 : i32 to vector<64x128xi32>
    %3 = arith.addi %0, %2 : vector<64x128xi32>
    %c64_i32_0 = arith.constant 64 : i32
    %4 = vector.broadcast %c64_i32_0 : i32 to vector<64x128xi32>
    %5 = arith.cmpi slt, %3, %4 : vector<64x128xi32>
    %6 = arith.index_cast %arg0 : i32 to index
    %7 = memref.load %arg2[%6] : memref<2xf32, #tpu.memory_space<smem>>
    %cst = arith.constant 5.400000e-01 : f32
    %8 = arith.mulf %7, %cst : f32
    %c0 = arith.constant 0 : index
    %c0_1 = arith.constant 0 : index
    %c0_2 = arith.constant 0 : index
    %c0_3 = arith.constant 0 : index
    %9 = vector.load %arg11[%c0, %c0_1, %c0_2, %c0_3] : memref<1x1x64x128xf32, #tpu.memory_space<vmem>>, vector<1x1x64x128xf32>
    %10 = vector.shape_cast %9 : vector<1x1x64x128xf32> to vector<64x128xf32>
    %cst_4 = arith.constant 1.280000e+02 : f32
    %11 = vector.broadcast %cst_4 : f32 to vector<64x128xf32>
    %12 = arith.mulf %10, %11 : vector<64x128xf32>
    %cst_5 = arith.constant 0.000000e+00 : f32
    %13 = vector.broadcast %cst_5 : f32 to vector<64x128xf32>
    %14 = arith.cmpf ogt, %12, %13 : vector<64x128xf32>
    %15 = arith.extui %14 : vector<64x128xi1> to vector<64x128xi32>
    %16 = arith.sitofp %15 : vector<64x128xi32> to vector<64x128xf32>
    %cst_6 = arith.constant 1.000000e+00 : f32
    %17 = vector.broadcast %cst_6 : f32 to vector<64x128xf32>
    %18 = arith.subf %17, %16 : vector<64x128xf32>
    %19 = arith.addf %12, %18 : vector<64x128xf32>
    %cst_7 = arith.constant 1.000000e+00 : f32
    %20 = vector.broadcast %cst_7 : f32 to vector<64x128xf32>
    %21 = arith.divf %20, %19 : vector<64x128xf32>
    %22 = vector.broadcast %8 : f32 to vector<64x128xf32>
    %23 = arith.mulf %22, %21 : vector<64x128xf32>
    %cst_8 = arith.constant 1.000000e-03 : f32
    %cst_9 = arith.constant 8.000000e+01 : f32
    %24 = vector.broadcast %cst_8 : f32 to vector<64x128xf32>
    %25 = arith.maximumf %24, %23 : vector<64x128xf32>
    %26 = vector.broadcast %cst_9 : f32 to vector<64x128xf32>
    %27 = arith.minimumf %26, %25 : vector<64x128xf32>
    %c0_10 = arith.constant 0 : index
    %c0_11 = arith.constant 0 : index
    %c0_12 = arith.constant 0 : index
    %c0_13 = arith.constant 0 : index
    %28 = vector.load %arg14[%c0_10, %c0_11, %c0_12, %c0_13] : memref<1x1x64x128xf32, #tpu.memory_space<vmem>>, vector<1x1x64x128xf32>
    %29 = vector.shape_cast %28 : vector<1x1x64x128xf32> to vector<64x128xf32>
    %30 = vector.shape_cast %12 : vector<64x128xf32> to vector<1x1x64x128xf32>
    tpu.vector_store %arg14[%c0_10, %c0_11, %c0_12, %c0_13], %30 {strides = array<i32>} : memref<1x1x64x128xf32, #tpu.memory_space<vmem>>, vector<1x1x64x128xf32>,
    %c0_14 = arith.constant 0 : index
    %c0_15 = arith.constant 0 : index
    %c0_16 = arith.constant 0 : index
    %c0_17 = arith.constant 0 : index
    %31 = vector.load %arg15[%c0_14, %c0_15, %c0_16, %c0_17] : memref<1x1x64x128xf32, #tpu.memory_space<vmem>>, vector<1x1x64x128xf32>
    %32 = vector.shape_cast %31 : vector<1x1x64x128xf32> to vector<64x128xf32>
    %33 = vector.shape_cast %27 : vector<64x128xf32> to vector<1x1x64x128xf32>
    tpu.vector_store %arg15[%c0_14, %c0_15, %c0_16, %c0_17], %33 {strides = array<i32>} : memref<1x1x64x128xf32, #tpu.memory_space<vmem>>, vector<1x1x64x128xf32>,
    %c0_18 = arith.constant 0 : index
    %c0_19 = arith.constant 0 : index
    %c0_20 = arith.constant 0 : index
    %c0_21 = arith.constant 0 : index
    %34 = vector.load %arg7[%c0_18, %c0_19, %c0_20, %c0_21] : memref<1x1x64x128xf32, #tpu.memory_space<vmem>>, vector<1x1x64x128xf32>
    %35 = vector.shape_cast %34 : vector<1x1x64x128xf32> to vector<64x128xf32>
    %c0_22 = arith.constant 0 : index
    %c0_23 = arith.constant 0 : index
    %c0_24 = arith.constant 0 : index
    %c0_25 = arith.constant 0 : index
    %36 = vector.load %arg8[%c0_22, %c0_23, %c0_24, %c0_25] : memref<1x1x64x128xf32, #tpu.memory_space<vmem>>, vector<1x1x64x128xf32>
    %37 = vector.shape_cast %36 : vector<1x1x64x128xf32> to vector<64x128xf32>
    %cst_26 = arith.constant 1.000000e+00 : f32
    %38 = vector.broadcast %cst_26 : f32 to vector<64x128xf32>
    %39 = arith.cmpf oeq, %37, %38 : vector<64x128xf32>
    %40 = arith.andi %39, %5 : vector<64x128xi1>
    %41 = arith.extui %40 : vector<64x128xi1> to vector<64x128xi32>
    %42 = arith.sitofp %41 : vector<64x128xi32> to vector<64x128xf32>
    %43 = vector.shape_cast %42 : vector<64x128xf32> to vector<1x64x128xf32>
    %cst_27 = arith.constant dense<0.000000e+00> : vector<1xf32>
    %44 = vector.multi_reduction <add>, %43, %cst_27 [1, 2] : vector<1x64x128xf32> to vector<1xf32>
    %45 = vector.shape_cast %44 : vector<1xf32> to vector<1x1x1xf32>
    %46 = vector.extract %45[0, 0, 0] : f32 from vector<1x1x1xf32>
    %47 = arith.subf %35, %12 : vector<64x128xf32>
    %48 = math.absf %47 : vector<64x128xf32>
    %cst_28 = arith.constant 0.000000e+00 : f32
    %49 = vector.broadcast %cst_28 : f32 to vector<64x128xf32>
    %50 = arith.select %40, %48, %49 : vector<64x128xi1>, vector<64x128xf32>
    %cst_29 = arith.constant 3.000000e+00 : f32
    %51 = vector.broadcast %cst_29 : f32 to vector<64x128xf32>
    %52 = arith.cmpf ogt, %50, %51 : vector<64x128xf32>
    %cst_30 = arith.constant 5.000000e-02 : f32
    %53 = vector.broadcast %cst_30 : f32 to vector<64x128xf32>
    %54 = arith.mulf %53, %35 : vector<64x128xf32>
    %55 = arith.cmpf ogt, %50, %54 : vector<64x128xf32>
    %56 = arith.andi %52, %55 : vector<64x128xi1>
    %57 = arith.andi %56, %40 : vector<64x128xi1>
    %58 = arith.extui %57 : vector<64x128xi1> to vector<64x128xi32>
    %59 = arith.sitofp %58 : vector<64x128xi32> to vector<64x128xf32>
    %60 = vector.shape_cast %59 : vector<64x128xf32> to vector<1x64x128xf32>
    %cst_31 = arith.constant dense<0.000000e+00> : vector<1xf32>
    %61 = vector.multi_reduction <add>, %60, %cst_31 [1, 2] : vector<1x64x128xf32> to vector<1xf32>
    %62 = vector.shape_cast %61 : vector<1xf32> to vector<1x1x1xf32>
    %63 = vector.extract %62[0, 0, 0] : f32 from vector<1x1x1xf32>
    %cst_32 = arith.constant 1.000000e+00 : f32
    %64 = vector.broadcast %cst_32 : f32 to vector<64x128xf32>
    %65 = arith.subf %64, %42 : vector<64x128xf32>
    %66 = arith.addf %35, %65 : vector<64x128xf32>
    %67 = tpu.reciprocal %66 {approx = true} : vector<64x128xf32> -> vector<64x128xf32>
    %68 = arith.mulf %66, %67 : vector<64x128xf32>
    %cst_33 = arith.constant 2.000000e+00 : f32
    %69 = vector.broadcast %cst_33 : f32 to vector<64x128xf32>
    %70 = arith.subf %69, %68 : vector<64x128xf32>
    %71 = arith.mulf %67, %70 : vector<64x128xf32>
    %72 = arith.mulf %48, %71 : vector<64x128xf32>
    %cst_34 = arith.constant 0.000000e+00 : f32
    %73 = vector.broadcast %cst_34 : f32 to vector<64x128xf32>
    %74 = arith.select %40, %72, %73 : vector<64x128xi1>, vector<64x128xf32>
    %75 = vector.shape_cast %74 : vector<64x128xf32> to vector<1x64x128xf32>
    %cst_35 = arith.constant dense<0.000000e+00> : vector<1xf32>
    %76 = vector.multi_reduction <add>, %75, %cst_35 [1, 2] : vector<1x64x128xf32> to vector<1xf32>
    %77 = vector.shape_cast %76 : vector<1xf32> to vector<1x1x1xf32>
    %78 = vector.extract %77[0, 0, 0] : f32 from vector<1x1x1xf32>
    %79 = arith.mulf %47, %47 : vector<64x128xf32>
    %80 = arith.mulf %79, %71 : vector<64x128xf32>
    %cst_36 = arith.constant 0.000000e+00 : f32
    %81 = vector.broadcast %cst_36 : f32 to vector<64x128xf32>
    %82 = arith.select %40, %80, %81 : vector<64x128xi1>, vector<64x128xf32>
    %83 = vector.shape_cast %82 : vector<64x128xf32> to vector<1x64x128xf32>
    %cst_37 = arith.constant dense<0.000000e+00> : vector<1xf32>
    %84 = vector.multi_reduction <add>, %83, %cst_37 [1, 2] : vector<1x64x128xf32> to vector<1xf32>
    %85 = vector.shape_cast %84 : vector<1xf32> to vector<1x1x1xf32>
    %86 = vector.extract %85[0, 0, 0] : f32 from vector<1x1x1xf32>
    %cst_38 = arith.constant 0.000000e+00 : f32
    %87 = vector.broadcast %cst_38 : f32 to vector<64x128xf32>
    %88 = arith.select %40, %79, %87 : vector<64x128xi1>, vector<64x128xf32>
    %89 = vector.shape_cast %88 : vector<64x128xf32> to vector<1x64x128xf32>
    %cst_39 = arith.constant dense<0.000000e+00> : vector<1xf32>
    %90 = vector.multi_reduction <add>, %89, %cst_39 [1, 2] : vector<1x64x128xf32> to vector<1xf32>
    %91 = vector.shape_cast %90 : vector<1xf32> to vector<1x1x1xf32>
    %92 = vector.extract %91[0, 0, 0] : f32 from vector<1x1x1xf32>
    %93 = arith.mulf %66, %21 : vector<64x128xf32>
    %94 = math.log %93 : vector<64x128xf32>
    %95 = arith.mulf %94, %94 : vector<64x128xf32>
    %cst_40 = arith.constant 0.000000e+00 : f32
    %96 = vector.broadcast %cst_40 : f32 to vector<64x128xf32>
    %97 = arith.select %40, %95, %96 : vector<64x128xi1>, vector<64x128xf32>
    %98 = vector.shape_cast %97 : vector<64x128xf32> to vector<1x64x128xf32>
    %cst_41 = arith.constant dense<0.000000e+00> : vector<1xf32>
    %99 = vector.multi_reduction <add>, %98, %cst_41 [1, 2] : vector<1x64x128xf32> to vector<1xf32>
    %100 = vector.shape_cast %99 : vector<1xf32> to vector<1x1x1xf32>
    %101 = vector.extract %100[0, 0, 0] : f32 from vector<1x1x1xf32>
    %102 = arith.mulf %35, %21 : vector<64x128xf32>
    %103 = arith.mulf %12, %71 : vector<64x128xf32>
    %104 = arith.maximumf %102, %103 : vector<64x128xf32>
    %cst_42 = arith.constant 1.250000e+00 : f32
    %105 = vector.broadcast %cst_42 : f32 to vector<64x128xf32>
    %106 = arith.cmpf olt, %104, %105 : vector<64x128xf32>
    %107 = arith.andi %40, %106 : vector<64x128xi1>
    %108 = arith.extui %107 : vector<64x128xi1> to vector<64x128xi32>
    %109 = arith.sitofp %108 : vector<64x128xi32> to vector<64x128xf32>
    %110 = vector.shape_cast %109 : vector<64x128xf32> to vector<1x64x128xf32>
    %cst_43 = arith.constant dense<0.000000e+00> : vector<1xf32>
    %111 = vector.multi_reduction <add>, %110, %cst_43 [1, 2] : vector<1x64x128xf32> to vector<1xf32>
    %112 = vector.shape_cast %111 : vector<1xf32> to vector<1x1x1xf32>
    %113 = vector.extract %112[0, 0, 0] : f32 from vector<1x1x1xf32>
    %cst_44 = arith.constant 1.562500e+00 : f32
    %114 = vector.broadcast %cst_44 : f32 to vector<64x128xf32>
    %115 = arith.cmpf olt, %104, %114 : vector<64x128xf32>
    %116 = arith.andi %40, %115 : vector<64x128xi1>
    %117 = arith.extui %116 : vector<64x128xi1> to vector<64x128xi32>
    %118 = arith.sitofp %117 : vector<64x128xi32> to vector<64x128xf32>
    %119 = vector.shape_cast %118 : vector<64x128xf32> to vector<1x64x128xf32>
    %cst_45 = arith.constant dense<0.000000e+00> : vector<1xf32>
    %120 = vector.multi_reduction <add>, %119, %cst_45 [1, 2] : vector<1x64x128xf32> to vector<1xf32>
    %121 = vector.shape_cast %120 : vector<1xf32> to vector<1x1x1xf32>
    %122 = vector.extract %121[0, 0, 0] : f32 from vector<1x1x1xf32>
    %cst_46 = arith.constant 1.953125 : f32
    %123 = vector.broadcast %cst_46 : f32 to vector<64x128xf32>
    %124 = arith.cmpf olt, %104, %123 : vector<64x128xf32>
    %125 = arith.andi %40, %124 : vector<64x128xi1>
    %126 = arith.extui %125 : vector<64x128xi1> to vector<64x128xi32>
    %127 = arith.sitofp %126 : vector<64x128xi32> to vector<64x128xf32>
    %128 = vector.shape_cast %127 : vector<64x128xf32> to vector<1x64x128xf32>
    %cst_47 = arith.constant dense<0.000000e+00> : vector<1xf32>
    %129 = vector.multi_reduction <add>, %128, %cst_47 [1, 2] : vector<1x64x128xf32> to vector<1xf32>
    %130 = vector.shape_cast %129 : vector<1xf32> to vector<1x1x1xf32>
    %131 = vector.extract %130[0, 0, 0] : f32 from vector<1x1x1xf32>
    %132 = arith.index_cast %arg0 : i32 to index
    %c0_48 = arith.constant 0 : index
    %133 = memref.load %arg3[%132, %c0_48] : memref<2x9xf32, #tpu.memory_space<smem>>
    %134 = arith.index_cast %arg0 : i32 to index
    %c1 = arith.constant 1 : index
    %135 = memref.load %arg3[%134, %c1] : memref<2x9xf32, #tpu.memory_space<smem>>
    %136 = arith.index_cast %arg0 : i32 to index
    %c2 = arith.constant 2 : index
    %137 = memref.load %arg3[%136, %c2] : memref<2x9xf32, #tpu.memory_space<smem>>
    %138 = arith.index_cast %arg0 : i32 to index
    %c3 = arith.constant 3 : index
    %139 = memref.load %arg3[%138, %c3] : memref<2x9xf32, #tpu.memory_space<smem>>
    %140 = arith.index_cast %arg0 : i32 to index
    %c4 = arith.constant 4 : index
    %141 = memref.load %arg3[%140, %c4] : memref<2x9xf32, #tpu.memory_space<smem>>
    %142 = arith.index_cast %arg0 : i32 to index
    %c5 = arith.constant 5 : index
    %143 = memref.load %arg3[%142, %c5] : memref<2x9xf32, #tpu.memory_space<smem>>
    %144 = arith.index_cast %arg0 : i32 to index
    %c6 = arith.constant 6 : index
    %145 = memref.load %arg3[%144, %c6] : memref<2x9xf32, #tpu.memory_space<smem>>
    %146 = arith.index_cast %arg0 : i32 to index
    %c7 = arith.constant 7 : index
    %147 = memref.load %arg3[%146, %c7] : memref<2x9xf32, #tpu.memory_space<smem>>
    %148 = arith.index_cast %arg0 : i32 to index
    %c8 = arith.constant 8 : index
    %149 = memref.load %arg3[%148, %c8] : memref<2x9xf32, #tpu.memory_space<smem>>
    %150 = arith.index_cast %arg0 : i32 to index
    %c0_49 = arith.constant 0 : index
    %151 = memref.load %arg4[%150, %c0_49] : memref<2x9xf32, #tpu.memory_space<smem>>
    %152 = arith.index_cast %arg0 : i32 to index
    %c1_50 = arith.constant 1 : index
    %153 = memref.load %arg4[%152, %c1_50] : memref<2x9xf32, #tpu.memory_space<smem>>
    %154 = arith.index_cast %arg0 : i32 to index
    %c2_51 = arith.constant 2 : index
    %155 = memref.load %arg4[%154, %c2_51] : memref<2x9xf32, #tpu.memory_space<smem>>
    %156 = arith.index_cast %arg0 : i32 to index
    %c3_52 = arith.constant 3 : index
    %157 = memref.load %arg4[%156, %c3_52] : memref<2x9xf32, #tpu.memory_space<smem>>
    %158 = arith.index_cast %arg0 : i32 to index
    %c4_53 = arith.constant 4 : index
    %159 = memref.load %arg4[%158, %c4_53] : memref<2x9xf32, #tpu.memory_space<smem>>
    %160 = arith.index_cast %arg0 : i32 to index
    %c5_54 = arith.constant 5 : index
    %161 = memref.load %arg4[%160, %c5_54] : memref<2x9xf32, #tpu.memory_space<smem>>
    %162 = arith.index_cast %arg0 : i32 to index
    %c6_55 = arith.constant 6 : index
    %163 = memref.load %arg4[%162, %c6_55] : memref<2x9xf32, #tpu.memory_space<smem>>
    %164 = arith.index_cast %arg0 : i32 to index
    %c7_56 = arith.constant 7 : index
    %165 = memref.load %arg4[%164, %c7_56] : memref<2x9xf32, #tpu.memory_space<smem>>
    %166 = arith.index_cast %arg0 : i32 to index
    %c8_57 = arith.constant 8 : index
    %167 = memref.load %arg4[%166, %c8_57] : memref<2x9xf32, #tpu.memory_space<smem>>
    %c0_58 = arith.constant 0 : index
    %c0_59 = arith.constant 0 : index
    %c0_60 = arith.constant 0 : index
    %c0_61 = arith.constant 0 : index
    %168 = vector.load %arg12[%c0_58, %c0_59, %c0_60, %c0_61] : memref<1x3x64x128xf32, #tpu.memory_space<vmem>>, vector<1x1x64x128xf32>
    %169 = vector.shape_cast %168 : vector<1x1x64x128xf32> to vector<64x128xf32>
    %c0_62 = arith.constant 0 : index
    %c1_63 = arith.constant 1 : index
    %c0_64 = arith.constant 0 : index
    %c0_65 = arith.constant 0 : index
    %170 = vector.load %arg12[%c0_62, %c1_63, %c0_64, %c0_65] : memref<1x3x64x128xf32, #tpu.memory_space<vmem>>, vector<1x1x64x128xf32>
    %171 = vector.shape_cast %170 : vector<1x1x64x128xf32> to vector<64x128xf32>
    %c0_66 = arith.constant 0 : index
    %c2_67 = arith.constant 2 : index
    %c0_68 = arith.constant 0 : index
    %c0_69 = arith.constant 0 : index
    %172 = vector.load %arg12[%c0_66, %c2_67, %c0_68, %c0_69] : memref<1x3x64x128xf32, #tpu.memory_space<vmem>>, vector<1x1x64x128xf32>
    %173 = vector.shape_cast %172 : vector<1x1x64x128xf32> to vector<64x128xf32>
    %174 = tpu.iota {dimensions = array<i32: 1>} : vector<64x128xi32>
    %175 = arith.sitofp %174 : vector<64x128xi32> to vector<64x128xf32>
    %176 = tpu.iota {dimensions = array<i32: 0>} : vector<64x128xi32>
    %c64_i32_70 = arith.constant 64 : i32
    %177 = arith.muli %arg1, %c64_i32_70 : i32
    %178 = vector.broadcast %177 : i32 to vector<64x128xi32>
    %179 = arith.addi %176, %178 : vector<64x128xi32>
    %180 = arith.sitofp %179 : vector<64x128xi32> to vector<64x128xf32>
    %181 = vector.broadcast %151 : f32 to vector<64x128xf32>
    %182 = arith.mulf %181, %175 : vector<64x128xf32>
    %183 = vector.broadcast %153 : f32 to vector<64x128xf32>
    %184 = arith.mulf %183, %180 : vector<64x128xf32>
    %185 = arith.addf %182, %184 : vector<64x128xf32>
    %186 = vector.broadcast %155 : f32 to vector<64x128xf32>
    %187 = arith.addf %185, %186 : vector<64x128xf32>
    %188 = arith.mulf %187, %23 : vector<64x128xf32>
    %189 = arith.addf %188, %169 : vector<64x128xf32>
    %190 = vector.broadcast %157 : f32 to vector<64x128xf32>
    %191 = arith.mulf %190, %175 : vector<64x128xf32>
    %192 = vector.broadcast %159 : f32 to vector<64x128xf32>
    %193 = arith.mulf %192, %180 : vector<64x128xf32>
    %194 = arith.addf %191, %193 : vector<64x128xf32>
    %195 = vector.broadcast %161 : f32 to vector<64x128xf32>
    %196 = arith.addf %194, %195 : vector<64x128xf32>
    %197 = arith.mulf %196, %23 : vector<64x128xf32>
    %198 = arith.addf %197, %171 : vector<64x128xf32>
    %199 = vector.broadcast %163 : f32 to vector<64x128xf32>
    %200 = arith.mulf %199, %175 : vector<64x128xf32>
    %201 = vector.broadcast %165 : f32 to vector<64x128xf32>
    %202 = arith.mulf %201, %180 : vector<64x128xf32>
    %203 = arith.addf %200, %202 : vector<64x128xf32>
    %204 = vector.broadcast %167 : f32 to vector<64x128xf32>
    %205 = arith.addf %203, %204 : vector<64x128xf32>
    %206 = arith.mulf %205, %23 : vector<64x128xf32>
    %207 = arith.addf %206, %173 : vector<64x128xf32>
    %208 = vector.broadcast %145 : f32 to vector<64x128xf32>
    %209 = arith.mulf %208, %189 : vector<64x128xf32>
    %210 = vector.broadcast %147 : f32 to vector<64x128xf32>
    %211 = arith.mulf %210, %198 : vector<64x128xf32>
    %212 = arith.addf %209, %211 : vector<64x128xf32>
    %213 = vector.broadcast %149 : f32 to vector<64x128xf32>
    %214 = arith.mulf %213, %207 : vector<64x128xf32>
    %215 = arith.addf %212, %214 : vector<64x128xf32>
    %cst_71 = arith.constant 9.99999993E-9 : f32
    %216 = vector.broadcast %cst_71 : f32 to vector<64x128xf32>
    %217 = arith.addf %215, %216 : vector<64x128xf32>
    %218 = tpu.reciprocal %217 {approx = true} : vector<64x128xf32> -> vector<64x128xf32>
    %219 = arith.mulf %217, %218 : vector<64x128xf32>
    %cst_72 = arith.constant 2.000000e+00 : f32
    %220 = vector.broadcast %cst_72 : f32 to vector<64x128xf32>
    %221 = arith.subf %220, %219 : vector<64x128xf32>
    %222 = arith.mulf %218, %221 : vector<64x128xf32>
    %223 = vector.broadcast %133 : f32 to vector<64x128xf32>
    %224 = arith.mulf %223, %189 : vector<64x128xf32>
    %225 = vector.broadcast %135 : f32 to vector<64x128xf32>
    %226 = arith.mulf %225, %198 : vector<64x128xf32>
    %227 = arith.addf %224, %226 : vector<64x128xf32>
    %228 = vector.broadcast %137 : f32 to vector<64x128xf32>
    %229 = arith.mulf %228, %207 : vector<64x128xf32>
    %230 = arith.addf %227, %229 : vector<64x128xf32>
    %231 = arith.mulf %230, %222 : vector<64x128xf32>
    %232 = arith.subf %231, %175 : vector<64x128xf32>
    %233 = vector.broadcast %139 : f32 to vector<64x128xf32>
    %234 = arith.mulf %233, %189 : vector<64x128xf32>
    %235 = vector.broadcast %141 : f32 to vector<64x128xf32>
    %236 = arith.mulf %235, %198 : vector<64x128xf32>
    %237 = arith.addf %234, %236 : vector<64x128xf32>
    %238 = vector.broadcast %143 : f32 to vector<64x128xf32>
    %239 = arith.mulf %238, %207 : vector<64x128xf32>
    %240 = arith.addf %237, %239 : vector<64x128xf32>
    %241 = arith.mulf %240, %222 : vector<64x128xf32>
    %242 = arith.subf %241, %180 : vector<64x128xf32>
    %c0_73 = arith.constant 0 : index
    %c0_74 = arith.constant 0 : index
    %c0_75 = arith.constant 0 : index
    %c0_76 = arith.constant 0 : index
    %243 = vector.load %arg16[%c0_73, %c0_74, %c0_75, %c0_76] : memref<1x2x64x128xf32, #tpu.memory_space<vmem>>, vector<1x1x64x128xf32>
    %244 = vector.shape_cast %243 : vector<1x1x64x128xf32> to vector<64x128xf32>
    %245 = vector.shape_cast %232 : vector<64x128xf32> to vector<1x1x64x128xf32>
    tpu.vector_store %arg16[%c0_73, %c0_74, %c0_75, %c0_76], %245 {strides = array<i32>} : memref<1x2x64x128xf32, #tpu.memory_space<vmem>>, vector<1x1x64x128xf32>,
    %c0_77 = arith.constant 0 : index
    %c1_78 = arith.constant 1 : index
    %c0_79 = arith.constant 0 : index
    %c0_80 = arith.constant 0 : index
    %246 = vector.load %arg16[%c0_77, %c1_78, %c0_79, %c0_80] : memref<1x2x64x128xf32, #tpu.memory_space<vmem>>, vector<1x1x64x128xf32>
    %247 = vector.shape_cast %246 : vector<1x1x64x128xf32> to vector<64x128xf32>
    %248 = vector.shape_cast %242 : vector<64x128xf32> to vector<1x1x64x128xf32>
    tpu.vector_store %arg16[%c0_77, %c1_78, %c0_79, %c0_80], %248 {strides = array<i32>} : memref<1x2x64x128xf32, #tpu.memory_space<vmem>>, vector<1x1x64x128xf32>,
    %c0_81 = arith.constant 0 : index
    %c0_82 = arith.constant 0 : index
    %c0_83 = arith.constant 0 : index
    %c0_84 = arith.constant 0 : index
    %249 = vector.load %arg5[%c0_81, %c0_82, %c0_83, %c0_84] : memref<1x2x64x128xf32, #tpu.memory_space<vmem>>, vector<1x1x64x128xf32>
    %250 = vector.shape_cast %249 : vector<1x1x64x128xf32> to vector<64x128xf32>
    %c0_85 = arith.constant 0 : index
    %c1_86 = arith.constant 1 : index
    %c0_87 = arith.constant 0 : index
    %c0_88 = arith.constant 0 : index
    %251 = vector.load %arg5[%c0_85, %c1_86, %c0_87, %c0_88] : memref<1x2x64x128xf32, #tpu.memory_space<vmem>>, vector<1x1x64x128xf32>
    %252 = vector.shape_cast %251 : vector<1x1x64x128xf32> to vector<64x128xf32>
    %c0_89 = arith.constant 0 : index
    %c0_90 = arith.constant 0 : index
    %c0_91 = arith.constant 0 : index
    %c0_92 = arith.constant 0 : index
    %253 = vector.load %arg6[%c0_89, %c0_90, %c0_91, %c0_92] : memref<1x1x64x128xf32, #tpu.memory_space<vmem>>, vector<1x1x64x128xf32>
    %254 = vector.shape_cast %253 : vector<1x1x64x128xf32> to vector<64x128xf32>
    %cst_93 = arith.constant 1.000000e+00 : f32
    %255 = vector.broadcast %cst_93 : f32 to vector<64x128xf32>
    %256 = arith.cmpf oeq, %254, %255 : vector<64x128xf32>
    %257 = arith.andi %256, %5 : vector<64x128xi1>
    %258 = arith.subf %250, %232 : vector<64x128xf32>
    %259 = arith.subf %252, %242 : vector<64x128xf32>
    %260 = arith.mulf %258, %258 : vector<64x128xf32>
    %261 = arith.mulf %259, %259 : vector<64x128xf32>
    %262 = arith.addf %260, %261 : vector<64x128xf32>
    %263 = math.sqrt %262 : vector<64x128xf32>
    %cst_94 = arith.constant 0.000000e+00 : f32
    %264 = vector.broadcast %cst_94 : f32 to vector<64x128xf32>
    %265 = arith.select %257, %263, %264 : vector<64x128xi1>, vector<64x128xf32>
    %266 = vector.shape_cast %265 : vector<64x128xf32> to vector<1x64x128xf32>
    %cst_95 = arith.constant dense<0.000000e+00> : vector<1xf32>
    %267 = vector.multi_reduction <add>, %266, %cst_95 [1, 2] : vector<1x64x128xf32> to vector<1xf32>
    %268 = vector.shape_cast %267 : vector<1xf32> to vector<1x1x1xf32>
    %269 = vector.extract %268[0, 0, 0] : f32 from vector<1x1x1xf32>
    %cst_96 = arith.constant 9.000000e+00 : f32
    %270 = vector.broadcast %cst_96 : f32 to vector<64x128xf32>
    %271 = arith.cmpf ogt, %262, %270 : vector<64x128xf32>
    %272 = arith.mulf %250, %250 : vector<64x128xf32>
    %273 = arith.mulf %252, %252 : vector<64x128xf32>
    %274 = arith.addf %272, %273 : vector<64x128xf32>
    %cst_97 = arith.constant 2.500000e-03 : f32
    %275 = vector.broadcast %cst_97 : f32 to vector<64x128xf32>
    %276 = arith.mulf %275, %274 : vector<64x128xf32>
    %277 = arith.cmpf ogt, %262, %276 : vector<64x128xf32>
    %278 = arith.andi %271, %277 : vector<64x128xi1>
    %279 = arith.andi %278, %257 : vector<64x128xi1>
    %280 = arith.extui %279 : vector<64x128xi1> to vector<64x128xi32>
    %281 = arith.sitofp %280 : vector<64x128xi32> to vector<64x128xf32>
    %282 = vector.shape_cast %281 : vector<64x128xf32> to vector<1x64x128xf32>
    %cst_98 = arith.constant dense<0.000000e+00> : vector<1xf32>
    %283 = vector.multi_reduction <add>, %282, %cst_98 [1, 2] : vector<1x64x128xf32> to vector<1xf32>
    %284 = vector.shape_cast %283 : vector<1xf32> to vector<1x1x1xf32>
    %285 = vector.extract %284[0, 0, 0] : f32 from vector<1x1x1xf32>
    %286 = arith.addf %27, %173 : vector<64x128xf32>
    %287 = tpu.reciprocal %286 {approx = true} : vector<64x128xf32> -> vector<64x128xf32>
    %288 = arith.mulf %286, %287 : vector<64x128xf32>
    %cst_99 = arith.constant 2.000000e+00 : f32
    %289 = vector.broadcast %cst_99 : f32 to vector<64x128xf32>
    %290 = arith.subf %289, %288 : vector<64x128xf32>
    %291 = arith.mulf %287, %290 : vector<64x128xf32>
    %292 = vector.broadcast %8 : f32 to vector<64x128xf32>
    %293 = arith.mulf %292, %291 : vector<64x128xf32>
    %c0_100 = arith.constant 0 : index
    %c0_101 = arith.constant 0 : index
    %c0_102 = arith.constant 0 : index
    %c0_103 = arith.constant 0 : index
    %294 = vector.load %arg18[%c0_100, %c0_101, %c0_102, %c0_103] : memref<1x1x64x128xf32, #tpu.memory_space<vmem>>, vector<1x1x64x128xf32>
    %295 = vector.shape_cast %294 : vector<1x1x64x128xf32> to vector<64x128xf32>
    %296 = vector.shape_cast %286 : vector<64x128xf32> to vector<1x1x64x128xf32>
    tpu.vector_store %arg18[%c0_100, %c0_101, %c0_102, %c0_103], %296 {strides = array<i32>} : memref<1x1x64x128xf32, #tpu.memory_space<vmem>>, vector<1x1x64x128xf32>,
    %c0_104 = arith.constant 0 : index
    %c0_105 = arith.constant 0 : index
    %c0_106 = arith.constant 0 : index
    %c0_107 = arith.constant 0 : index
    %297 = vector.load %arg17[%c0_104, %c0_105, %c0_106, %c0_107] : memref<1x1x64x128xf32, #tpu.memory_space<vmem>>, vector<1x1x64x128xf32>
    %298 = vector.shape_cast %297 : vector<1x1x64x128xf32> to vector<64x128xf32>
    %299 = vector.shape_cast %293 : vector<64x128xf32> to vector<1x1x64x128xf32>
    tpu.vector_store %arg17[%c0_104, %c0_105, %c0_106, %c0_107], %299 {strides = array<i32>} : memref<1x1x64x128xf32, #tpu.memory_space<vmem>>, vector<1x1x64x128xf32>,
    %c0_108 = arith.constant 0 : index
    %c0_109 = arith.constant 0 : index
    %c0_110 = arith.constant 0 : index
    %c0_111 = arith.constant 0 : index
    %300 = vector.load %arg9[%c0_108, %c0_109, %c0_110, %c0_111] : memref<1x1x64x128xf32, #tpu.memory_space<vmem>>, vector<1x1x64x128xf32>
    %301 = vector.shape_cast %300 : vector<1x1x64x128xf32> to vector<64x128xf32>
    %c0_112 = arith.constant 0 : index
    %c0_113 = arith.constant 0 : index
    %c0_114 = arith.constant 0 : index
    %c0_115 = arith.constant 0 : index
    %302 = vector.load %arg10[%c0_112, %c0_113, %c0_114, %c0_115] : memref<1x1x64x128xf32, #tpu.memory_space<vmem>>, vector<1x1x64x128xf32>
    %303 = vector.shape_cast %302 : vector<1x1x64x128xf32> to vector<64x128xf32>
    %cst_116 = arith.constant 1.000000e+00 : f32
    %304 = vector.broadcast %cst_116 : f32 to vector<64x128xf32>
    %305 = arith.cmpf oeq, %303, %304 : vector<64x128xf32>
    %306 = arith.andi %305, %5 : vector<64x128xi1>
    %307 = arith.subf %301, %293 : vector<64x128xf32>
    %308 = math.absf %307 : vector<64x128xf32>
    %cst_117 = arith.constant 0.000000e+00 : f32
    %309 = vector.broadcast %cst_117 : f32 to vector<64x128xf32>
    %310 = arith.select %306, %308, %309 : vector<64x128xi1>, vector<64x128xf32>
    %cst_118 = arith.constant 3.000000e+00 : f32
    %311 = vector.broadcast %cst_118 : f32 to vector<64x128xf32>
    %312 = arith.cmpf ogt, %310, %311 : vector<64x128xf32>
    %cst_119 = arith.constant 5.000000e-02 : f32
    %313 = vector.broadcast %cst_119 : f32 to vector<64x128xf32>
    %314 = arith.mulf %313, %301 : vector<64x128xf32>
    %315 = arith.cmpf ogt, %310, %314 : vector<64x128xf32>
    %316 = arith.andi %312, %315 : vector<64x128xi1>
    %317 = arith.andi %316, %306 : vector<64x128xi1>
    %318 = arith.extui %317 : vector<64x128xi1> to vector<64x128xi32>
    %319 = arith.sitofp %318 : vector<64x128xi32> to vector<64x128xf32>
    %320 = vector.shape_cast %319 : vector<64x128xf32> to vector<1x64x128xf32>
    %cst_120 = arith.constant dense<0.000000e+00> : vector<1xf32>
    %321 = vector.multi_reduction <add>, %320, %cst_120 [1, 2] : vector<1x64x128xf32> to vector<1xf32>
    %322 = vector.shape_cast %321 : vector<1xf32> to vector<1x1x1xf32>
    %323 = vector.extract %322[0, 0, 0] : f32 from vector<1x1x1xf32>
    %324 = arith.ori %279, %57 : vector<64x128xi1>
    %325 = arith.ori %324, %317 : vector<64x128xi1>
    %326 = arith.andi %325, %257 : vector<64x128xi1>
    %327 = arith.andi %326, %40 : vector<64x128xi1>
    %328 = arith.andi %327, %306 : vector<64x128xi1>
    %329 = arith.extui %328 : vector<64x128xi1> to vector<64x128xi32>
    %330 = arith.sitofp %329 : vector<64x128xi32> to vector<64x128xf32>
    %331 = vector.shape_cast %330 : vector<64x128xf32> to vector<1x64x128xf32>
    %cst_121 = arith.constant dense<0.000000e+00> : vector<1xf32>
    %332 = vector.multi_reduction <add>, %331, %cst_121 [1, 2] : vector<1x64x128xf32> to vector<1xf32>
    %333 = vector.shape_cast %332 : vector<1xf32> to vector<1x1x1xf32>
    %334 = vector.extract %333[0, 0, 0] : f32 from vector<1x1x1xf32>
    %335 = tpu.iota {dimensions = array<i32: 1>} : vector<8x128xi32>
    %336 = tpu.iota {dimensions = array<i32: 0>} : vector<8x128xi32>
    %cst_122 = arith.constant 0.000000e+00 : f32
    %337 = vector.broadcast %cst_122 : f32 to vector<8x128xf32>
    %c0_i32 = arith.constant 0 : i32
    %338 = vector.broadcast %c0_i32 : i32 to vector<8x128xi32>
    %339 = arith.cmpi eq, %336, %338 : vector<8x128xi32>
    %c0_i32_123 = arith.constant 0 : i32
    %340 = vector.broadcast %c0_i32_123 : i32 to vector<8x128xi32>
    %341 = arith.cmpi eq, %335, %340 : vector<8x128xi32>
    %342 = arith.andi %339, %341 : vector<8x128xi1>
    %cst_124 = arith.constant 0.000000e+00 : f32
    %343 = vector.broadcast %46 : f32 to vector<8x128xf32>
    %344 = vector.broadcast %cst_124 : f32 to vector<8x128xf32>
    %345 = arith.select %342, %343, %344 : vector<8x128xi1>, vector<8x128xf32>
    %346 = arith.addf %337, %345 : vector<8x128xf32>
    %c0_i32_125 = arith.constant 0 : i32
    %347 = vector.broadcast %c0_i32_125 : i32 to vector<8x128xi32>
    %348 = arith.cmpi eq, %336, %347 : vector<8x128xi32>
    %c1_i32 = arith.constant 1 : i32
    %349 = vector.broadcast %c1_i32 : i32 to vector<8x128xi32>
    %350 = arith.cmpi eq, %335, %349 : vector<8x128xi32>
    %351 = arith.andi %348, %350 : vector<8x128xi1>
    %cst_126 = arith.constant 0.000000e+00 : f32
    %352 = vector.broadcast %78 : f32 to vector<8x128xf32>
    %353 = vector.broadcast %cst_126 : f32 to vector<8x128xf32>
    %354 = arith.select %351, %352, %353 : vector<8x128xi1>, vector<8x128xf32>
    %355 = arith.addf %346, %354 : vector<8x128xf32>
    %c0_i32_127 = arith.constant 0 : i32
    %356 = vector.broadcast %c0_i32_127 : i32 to vector<8x128xi32>
    %357 = arith.cmpi eq, %336, %356 : vector<8x128xi32>
    %c2_i32 = arith.constant 2 : i32
    %358 = vector.broadcast %c2_i32 : i32 to vector<8x128xi32>
    %359 = arith.cmpi eq, %335, %358 : vector<8x128xi32>
    %360 = arith.andi %357, %359 : vector<8x128xi1>
    %cst_128 = arith.constant 0.000000e+00 : f32
    %361 = vector.broadcast %86 : f32 to vector<8x128xf32>
    %362 = vector.broadcast %cst_128 : f32 to vector<8x128xf32>
    %363 = arith.select %360, %361, %362 : vector<8x128xi1>, vector<8x128xf32>
    %364 = arith.addf %355, %363 : vector<8x128xf32>
    %c0_i32_129 = arith.constant 0 : i32
    %365 = vector.broadcast %c0_i32_129 : i32 to vector<8x128xi32>
    %366 = arith.cmpi eq, %336, %365 : vector<8x128xi32>
    %c3_i32 = arith.constant 3 : i32
    %367 = vector.broadcast %c3_i32 : i32 to vector<8x128xi32>
    %368 = arith.cmpi eq, %335, %367 : vector<8x128xi32>
    %369 = arith.andi %366, %368 : vector<8x128xi1>
    %cst_130 = arith.constant 0.000000e+00 : f32
    %370 = vector.broadcast %92 : f32 to vector<8x128xf32>
    %371 = vector.broadcast %cst_130 : f32 to vector<8x128xf32>
    %372 = arith.select %369, %370, %371 : vector<8x128xi1>, vector<8x128xf32>
    %373 = arith.addf %364, %372 : vector<8x128xf32>
    %c0_i32_131 = arith.constant 0 : i32
    %374 = vector.broadcast %c0_i32_131 : i32 to vector<8x128xi32>
    %375 = arith.cmpi eq, %336, %374 : vector<8x128xi32>
    %c4_i32 = arith.constant 4 : i32
    %376 = vector.broadcast %c4_i32 : i32 to vector<8x128xi32>
    %377 = arith.cmpi eq, %335, %376 : vector<8x128xi32>
    %378 = arith.andi %375, %377 : vector<8x128xi1>
    %cst_132 = arith.constant 0.000000e+00 : f32
    %379 = vector.broadcast %101 : f32 to vector<8x128xf32>
    %380 = vector.broadcast %cst_132 : f32 to vector<8x128xf32>
    %381 = arith.select %378, %379, %380 : vector<8x128xi1>, vector<8x128xf32>
    %382 = arith.addf %373, %381 : vector<8x128xf32>
    %c0_i32_133 = arith.constant 0 : i32
    %383 = vector.broadcast %c0_i32_133 : i32 to vector<8x128xi32>
    %384 = arith.cmpi eq, %336, %383 : vector<8x128xi32>
    %c5_i32 = arith.constant 5 : i32
    %385 = vector.broadcast %c5_i32 : i32 to vector<8x128xi32>
    %386 = arith.cmpi eq, %335, %385 : vector<8x128xi32>
    %387 = arith.andi %384, %386 : vector<8x128xi1>
    %cst_134 = arith.constant 0.000000e+00 : f32
    %388 = vector.broadcast %113 : f32 to vector<8x128xf32>
    %389 = vector.broadcast %cst_134 : f32 to vector<8x128xf32>
    %390 = arith.select %387, %388, %389 : vector<8x128xi1>, vector<8x128xf32>
    %391 = arith.addf %382, %390 : vector<8x128xf32>
    %c0_i32_135 = arith.constant 0 : i32
    %392 = vector.broadcast %c0_i32_135 : i32 to vector<8x128xi32>
    %393 = arith.cmpi eq, %336, %392 : vector<8x128xi32>
    %c6_i32 = arith.constant 6 : i32
    %394 = vector.broadcast %c6_i32 : i32 to vector<8x128xi32>
    %395 = arith.cmpi eq, %335, %394 : vector<8x128xi32>
    %396 = arith.andi %393, %395 : vector<8x128xi1>
    %cst_136 = arith.constant 0.000000e+00 : f32
    %397 = vector.broadcast %122 : f32 to vector<8x128xf32>
    %398 = vector.broadcast %cst_136 : f32 to vector<8x128xf32>
    %399 = arith.select %396, %397, %398 : vector<8x128xi1>, vector<8x128xf32>
    %400 = arith.addf %391, %399 : vector<8x128xf32>
    %c0_i32_137 = arith.constant 0 : i32
    %401 = vector.broadcast %c0_i32_137 : i32 to vector<8x128xi32>
    %402 = arith.cmpi eq, %336, %401 : vector<8x128xi32>
    %c7_i32 = arith.constant 7 : i32
    %403 = vector.broadcast %c7_i32 : i32 to vector<8x128xi32>
    %404 = arith.cmpi eq, %335, %403 : vector<8x128xi32>
    %405 = arith.andi %402, %404 : vector<8x128xi1>
    %cst_138 = arith.constant 0.000000e+00 : f32
    %406 = vector.broadcast %131 : f32 to vector<8x128xf32>
    %407 = vector.broadcast %cst_138 : f32 to vector<8x128xf32>
    %408 = arith.select %405, %406, %407 : vector<8x128xi1>, vector<8x128xf32>
    %409 = arith.addf %400, %408 : vector<8x128xf32>
    %c0_i32_139 = arith.constant 0 : i32
    %410 = vector.broadcast %c0_i32_139 : i32 to vector<8x128xi32>
    %411 = arith.cmpi eq, %336, %410 : vector<8x128xi32>
    %c8_i32 = arith.constant 8 : i32
    %412 = vector.broadcast %c8_i32 : i32 to vector<8x128xi32>
    %413 = arith.cmpi eq, %335, %412 : vector<8x128xi32>
    %414 = arith.andi %411, %413 : vector<8x128xi1>
    %cst_140 = arith.constant 0.000000e+00 : f32
    %415 = vector.broadcast %63 : f32 to vector<8x128xf32>
    %416 = vector.broadcast %cst_140 : f32 to vector<8x128xf32>
    %417 = arith.select %414, %415, %416 : vector<8x128xi1>, vector<8x128xf32>
    %418 = arith.addf %409, %417 : vector<8x128xf32>
    %c0_i32_141 = arith.constant 0 : i32
    %419 = vector.broadcast %c0_i32_141 : i32 to vector<8x128xi32>
    %420 = arith.cmpi eq, %336, %419 : vector<8x128xi32>
    %c9_i32 = arith.constant 9 : i32
    %421 = vector.broadcast %c9_i32 : i32 to vector<8x128xi32>
    %422 = arith.cmpi eq, %335, %421 : vector<8x128xi32>
    %423 = arith.andi %420, %422 : vector<8x128xi1>
    %cst_142 = arith.constant 0.000000e+00 : f32
    %424 = vector.broadcast %269 : f32 to vector<8x128xf32>
    %425 = vector.broadcast %cst_142 : f32 to vector<8x128xf32>
    %426 = arith.select %423, %424, %425 : vector<8x128xi1>, vector<8x128xf32>
    %427 = arith.addf %418, %426 : vector<8x128xf32>
    %c0_i32_143 = arith.constant 0 : i32
    %428 = vector.broadcast %c0_i32_143 : i32 to vector<8x128xi32>
    %429 = arith.cmpi eq, %336, %428 : vector<8x128xi32>
    %c10_i32 = arith.constant 10 : i32
    %430 = vector.broadcast %c10_i32 : i32 to vector<8x128xi32>
    %431 = arith.cmpi eq, %335, %430 : vector<8x128xi32>
    %432 = arith.andi %429, %431 : vector<8x128xi1>
    %cst_144 = arith.constant 0.000000e+00 : f32
    %433 = vector.broadcast %285 : f32 to vector<8x128xf32>
    %434 = vector.broadcast %cst_144 : f32 to vector<8x128xf32>
    %435 = arith.select %432, %433, %434 : vector<8x128xi1>, vector<8x128xf32>
    %436 = arith.addf %427, %435 : vector<8x128xf32>
    %c0_i32_145 = arith.constant 0 : i32
    %437 = vector.broadcast %c0_i32_145 : i32 to vector<8x128xi32>
    %438 = arith.cmpi eq, %336, %437 : vector<8x128xi32>
    %c11_i32 = arith.constant 11 : i32
    %439 = vector.broadcast %c11_i32 : i32 to vector<8x128xi32>
    %440 = arith.cmpi eq, %335, %439 : vector<8x128xi32>
    %441 = arith.andi %438, %440 : vector<8x128xi1>
    %cst_146 = arith.constant 0.000000e+00 : f32
    %442 = vector.broadcast %323 : f32 to vector<8x128xf32>
    %443 = vector.broadcast %cst_146 : f32 to vector<8x128xf32>
    %444 = arith.select %441, %442, %443 : vector<8x128xi1>, vector<8x128xf32>
    %445 = arith.addf %436, %444 : vector<8x128xf32>
    %c0_i32_147 = arith.constant 0 : i32
    %446 = vector.broadcast %c0_i32_147 : i32 to vector<8x128xi32>
    %447 = arith.cmpi eq, %336, %446 : vector<8x128xi32>
    %c12_i32 = arith.constant 12 : i32
    %448 = vector.broadcast %c12_i32 : i32 to vector<8x128xi32>
    %449 = arith.cmpi eq, %335, %448 : vector<8x128xi32>
    %450 = arith.andi %447, %449 : vector<8x128xi1>
    %cst_148 = arith.constant 0.000000e+00 : f32
    %451 = vector.broadcast %334 : f32 to vector<8x128xf32>
    %452 = vector.broadcast %cst_148 : f32 to vector<8x128xf32>
    %453 = arith.select %450, %451, %452 : vector<8x128xi1>, vector<8x128xf32>
    %454 = arith.addf %445, %453 : vector<8x128xf32>
    %c0_149 = arith.constant 0 : index
    %c0_150 = arith.constant 0 : index
    %c0_151 = arith.constant 0 : index
    %c0_152 = arith.constant 0 : index
    %455 = vector.load %arg13[%c0_149, %c0_150, %c0_151, %c0_152] : memref<1x1x8x128xf32, #tpu.memory_space<vmem>>, vector<1x1x8x128xf32>
    %456 = vector.shape_cast %455 : vector<1x1x8x128xf32> to vector<8x128xf32>
    %457 = vector.shape_cast %454 : vector<8x128xf32> to vector<1x1x8x128xf32>
    tpu.vector_store %arg13[%c0_149, %c0_150, %c0_151, %c0_152], %457 {strides = array<i32>} : memref<1x1x8x128xf32, #tpu.memory_space<vmem>>, vector<1x1x8x128xf32>,
    return
  }
  func.func @transform_0(%arg0: i32, %arg1: i32) -> i32 {
    %c0_i32 = arith.constant 0 : i32
    %c0_i32_0 = arith.constant 0 : i32
    return %c0_i32 : i32
  }
  func.func @transform_1(%arg0: i32, %arg1: i32) -> (i32, i32) {
    %c0_i32 = arith.constant 0 : i32
    %c0_i32_0 = arith.constant 0 : i32
    %c0_i32_1 = arith.constant 0 : i32
    return %c0_i32, %c0_i32_0 : i32, i32
  }
  func.func @transform_2(%arg0: i32, %arg1: i32) -> (i32, i32) {
    %c0_i32 = arith.constant 0 : i32
    %c0_i32_0 = arith.constant 0 : i32
    %c0_i32_1 = arith.constant 0 : i32
    return %c0_i32, %c0_i32_0 : i32, i32
  }
  func.func @transform_3(%arg0: i32, %arg1: i32) -> (i32, i32, i32, i32) {
    %c0_i32 = arith.constant 0 : i32
    %c0_i32_0 = arith.constant 0 : i32
    %c0_i32_1 = arith.constant 0 : i32
    return %arg0, %c0_i32, %arg1, %c0_i32_0 : i32, i32, i32, i32
  }
  func.func @transform_4(%arg0: i32, %arg1: i32) -> (i32, i32, i32, i32) {
    %c0_i32 = arith.constant 0 : i32
    %c0_i32_0 = arith.constant 0 : i32
    %c0_i32_1 = arith.constant 0 : i32
    return %arg0, %c0_i32, %arg1, %c0_i32_0 : i32, i32, i32, i32
  }
  func.func @transform_5(%arg0: i32, %arg1: i32) -> (i32, i32, i32, i32) {
    %c0_i32 = arith.constant 0 : i32
    %c0_i32_0 = arith.constant 0 : i32
    %c0_i32_1 = arith.constant 0 : i32
    return %arg0, %c0_i32, %arg1, %c0_i32_0 : i32, i32, i32, i32
  }
  func.func @transform_6(%arg0: i32, %arg1: i32) -> (i32, i32, i32, i32) {
    %c0_i32 = arith.constant 0 : i32
    %c0_i32_0 = arith.constant 0 : i32
    %c0_i32_1 = arith.constant 0 : i32
    return %arg0, %c0_i32, %arg1, %c0_i32_0 : i32, i32, i32, i32
  }
  func.func @transform_7(%arg0: i32, %arg1: i32) -> (i32, i32, i32, i32) {
    %c0_i32 = arith.constant 0 : i32
    %c0_i32_0 = arith.constant 0 : i32
    %c0_i32_1 = arith.constant 0 : i32
    return %arg0, %c0_i32, %arg1, %c0_i32_0 : i32, i32, i32, i32
  }
  func.func @transform_8(%arg0: i32, %arg1: i32) -> (i32, i32, i32, i32) {
    %c0_i32 = arith.constant 0 : i32
    %c0_i32_0 = arith.constant 0 : i32
    %c0_i32_1 = arith.constant 0 : i32
    return %arg0, %c0_i32, %arg1, %c0_i32_0 : i32, i32, i32, i32
  }
  func.func @transform_9(%arg0: i32, %arg1: i32) -> (i32, i32, i32, i32) {
    %c0_i32 = arith.constant 0 : i32
    %c0_i32_0 = arith.constant 0 : i32
    %c0_i32_1 = arith.constant 0 : i32
    return %arg0, %c0_i32, %arg1, %c0_i32_0 : i32, i32, i32, i32
  }
  func.func @transform_10(%arg0: i32, %arg1: i32) -> (i32, i32, i32, i32) {
    %c0_i32 = arith.constant 0 : i32
    %c0_i32_0 = arith.constant 0 : i32
    %c0_i32_1 = arith.constant 0 : i32
    return %arg0, %c0_i32, %arg1, %c0_i32_0 : i32, i32, i32, i32
  }
  func.func @transform_11(%arg0: i32, %arg1: i32) -> (i32, i32, i32, i32) {
    %c0_i32 = arith.constant 0 : i32
    %c0_i32_0 = arith.constant 0 : i32
    %c0_i32_1 = arith.constant 0 : i32
    return %arg0, %arg1, %c0_i32, %c0_i32_0 : i32, i32, i32, i32
  }
  func.func @transform_12(%arg0: i32, %arg1: i32) -> (i32, i32, i32, i32) {
    %c0_i32 = arith.constant 0 : i32
    %c0_i32_0 = arith.constant 0 : i32
    %c0_i32_1 = arith.constant 0 : i32
    return %arg0, %c0_i32, %arg1, %c0_i32_0 : i32, i32, i32, i32
  }
  func.func @transform_13(%arg0: i32, %arg1: i32) -> (i32, i32, i32, i32) {
    %c0_i32 = arith.constant 0 : i32
    %c0_i32_0 = arith.constant 0 : i32
    %c0_i32_1 = arith.constant 0 : i32
    return %arg0, %c0_i32, %arg1, %c0_i32_0 : i32, i32, i32, i32
  }
  func.func @transform_14(%arg0: i32, %arg1: i32) -> (i32, i32, i32, i32) {
    %c0_i32 = arith.constant 0 : i32
    %c0_i32_0 = arith.constant 0 : i32
    %c0_i32_1 = arith.constant 0 : i32
    return %arg0, %c0_i32, %arg1, %c0_i32_0 : i32, i32, i32, i32
  }
  func.func @transform_15(%arg0: i32, %arg1: i32) -> (i32, i32, i32, i32) {
    %c0_i32 = arith.constant 0 : i32
    %c0_i32_0 = arith.constant 0 : i32
    %c0_i32_1 = arith.constant 0 : i32
    return %arg0, %c0_i32, %arg1, %c0_i32_0 : i32, i32, i32, i32
  }
  func.func @transform_16(%arg0: i32, %arg1: i32) -> (i32, i32, i32, i32) {
    %c0_i32 = arith.constant 0 : i32
    %c0_i32_0 = arith.constant 0 : i32
    %c0_i32_1 = arith.constant 0 : i32
    return %arg0, %c0_i32, %arg1, %c0_i32_0 : i32, i32, i32, i32
  }
}

</mosaic_0001>

<bundles_post_ra>
// kernel: tpu_custom_call.1
= control target key start
LH: loop header
LB: loop body
LE: loop exit
PB: predicated region body
PF: predicated region fallthrough
CT: control target
= control target key end

     0   :  { %s7477_s0 = inlined_call_operand.hbm [shape: f32[2], index: 0, kind: input, shape index: {}]   ;;  %s7478_s1 = inlined_call_operand.vmem [shape: f32[2,9], index: 1, kind: input, shape index: {}]   ;;  %s7479_s2 = inlined_call_operand.vmem [shape: f32[2,9], index: 2, kind: input, shape index: {}]   ;;  %s7480_s3 = inlined_call_operand.hbm [shape: f32[2,2,64,128], index: 3, kind: input, shape index: {}]   ;;  %s7481_s4 = inlined_call_operand.hbm [shape: f32[2,1,64,128], index: 4, kind: input, shape index: {}]   ;;  %s7482_s5 = inlined_call_operand.hbm [shape: f32[2,1,64,128], index: 5, kind: input, shape index: {}]   ;;  %s7483_s6 = inlined_call_operand.hbm [shape: f32[2,1,64,128], index: 6, kind: input, shape index: {}]   ;;  %s7484_s7 = inlined_call_operand.hbm [shape: f32[2,1,64,128], index: 7, kind: input, shape index: {}]   ;;  %s7485_s8 = inlined_call_operand.hbm [shape: f32[2,1,64,128], index: 8, kind: input, shape index: {}]   ;;  %s7486_s9 = inlined_call_operand.hbm [shape: f32[2,1,64,128], index: 9, kind: input, shape index: {}]   ;;  %s7487_s10 = inlined_call_operand.hbm [shape: f32[2,3,64,128], index: 10, kind: input, shape index: {}]   ;;  %s7488_s11 = inlined_call_operand.hbm [shape: f32[2,1,8,128], index: 11, kind: output, shape index: {0}]   ;;  %s7489_s12 = inlined_call_operand.hbm [shape: f32[2,1,64,128], index: 12, kind: output, shape index: {1}]   ;;  %s7490_s13 = inlined_call_operand.hbm [shape: f32[2,1,64,128], index: 13, kind: output, shape index: {2}]   ;;  %s7491_s14 = inlined_call_operand.hbm [shape: f32[2,2,64,128], index: 14, kind: output, shape index: {3}]   ;;  %s7492_s15 = inlined_call_operand.hbm [shape: f32[2,1,64,128], index: 15, kind: output, shape index: {4}]   ;;  %s7493_s16 = inlined_call_operand.hbm [shape: f32[2,1,64,128], index: 16, kind: output, shape index: {5}]  }
   0x1   :  { %7688 = sst [smem:[#allocation97_spill]] %s7477_s0 }
   0x2   :  { %7689 = sst [smem:[#allocation98_spill]] %s7478_s1 }
   0x3   :  { %7690 = sst [smem:[#allocation99_spill]] %s7479_s2 }
   0x4   :  { %7691 = sst [smem:[#allocation100_spill]] %s7480_s3 }
   0x5   :  { %7692 = sst [smem:[#allocation101_spill]] %s7481_s4 }
   0x6   :  { %7693 = sst [smem:[#allocation102_spill]] %s7482_s5 }
   0x7   :  { %7694 = sst [smem:[#allocation103_spill]] %s7483_s6 }
   0x8   :  { %7695 = sst [smem:[#allocation104_spill]] %s7484_s7 }
   0x9   :  { %7696 = sst [smem:[#allocation105_spill]] %s7485_s8 }
   0xa   :  { %7697 = sst [smem:[#allocation106_spill]] %s7487_s10 }
   0xb   :  { %7698 = sst [smem:[#allocation107_spill]] %s7488_s11 }
   0xc   :  { %7699 = sst [smem:[#allocation108_spill]] %s7489_s12 }
   0xd   :  { %7700 = sst [smem:[#allocation109_spill]] %s7490_s13 }
   0xe   :  { %7701 = sst [smem:[#allocation110_spill]] %s7491_s14 }
   0xf   :  { %7702 = sst [smem:[#allocation111_spill]] %s7492_s15 }
  0x10   :  { %7703 = sst [smem:[#allocation112_spill]] %s7493_s16 }
  0x11   :  { %22 = vsyncpa [#allocation5], 0 }
  0x12   :  { %23 = vsyncpa [#allocation6], 0 }
  0x13   :  { %24 = vsyncpa [#allocation9], 0 }
  0x14   :  { %25 = vsyncpa [#allocation3], 0 }
  0x15   :  { %27 = vsyncpa [#allocation3 + $0x1], 0 }
  0x16   :  { %28 = vsyncpa [#allocation12], 0 }
  0x17   :  { %30 = vsyncpa [#allocation12 + $0x1], 0 }
  0x18   :  { %31 = vsyncpa [#allocation15], 0 }
  0x19   :  { %33 = vsyncpa [#allocation15 + $0x1], 0 }
  0x1a   :  { %34 = vsyncpa [#allocation18], 0 }
  0x1b   :  { %36 = vsyncpa [#allocation18 + $0x1], 0 }
  0x1c   :  { %37 = vsyncpa [#allocation21], 0 }
  0x1d   :  { %39 = vsyncpa [#allocation21 + $0x1], 0 }
  0x1e   :  { %40 = vsyncpa [#allocation4], 0 }
  0x1f   :  { %42 = vsyncpa [#allocation4 + $0x1], 0 }
  0x20   :  { %43 = vsyncpa [#allocation24], 0 }
  0x21   :  { %45 = vsyncpa [#allocation24 + $0x1], 0 }
  0x22   :  { %46 = vsyncpa [#allocation27], 0 }
  0x23   :  { %48 = vsyncpa [#allocation27 + $0x1], 0 }
  0x24   :  { %49 = vsyncpa [#allocation30], 0 }
  0x25   :  { %51 = vsyncpa [#allocation30 + $0x1], 0  ;;  %s4342_s21 = smov 0   ;;  %s4344_s22 = smov 0  }
  0x26   :  { %s4346_s23 = smov 0   ;;  %s4348_s24 = smov 0  }
  0x27   :  { %s4350_s25 = smov 0   ;;  %s4352_s26 = smov 0  }
  0x28 LB: > { %7704 = sst [smem:[#allocation43_spill]] %s4221_s23  ;;  %s69_s27 = sadd.s32 1, %s4229_s25  ;;  %s4233_s26 = sphi %s4352_s26, %s57_s26   ;;  %s4229_s25 = sphi %s4350_s25, %s8266_s25   ;;  %s4225_s24 = sphi %s4348_s24, %s8265_s24   ;;  %s4221_s23 = sphi %s4346_s23, %s8261_s23   ;;  %s4217_s22 = sphi %s4344_s22, %s8264_s22   ;;  %s4213_s21 = sphi %s4342_s21, %s8263_s21  }
  0x29   : > { %7705 = sst [smem:[#allocation44_spill]] %s4225_s24  ;;  %s141_s28 = sadd.s32 1, %s4221_s23 }
  0x2a   : > { %7706 = sst [smem:[#allocation45_spill]] %s4233_s26  ;;  %p71_p0 = scmp.ge.s32.totalorder %s69_s27, 2 }
  0x2b   : > { %p7502_p1 = scmp.ne.s32.totalorder %s4221_s23, %s4217_s22  ;;  %p149_p2 = scmp.eq.s32.totalorder %s4233_s26, 0 }
  0x2c   : > { %s8268_s27 = smov (%p71_p0, %s69_s27), 0  ;;  %p3531_p5 = scmp.lt.s32.totalorder %s4233_s26, 2 }
  0x2d   : > { %7707 = sst [smem:[#allocation46_spill]] %s8268_s27  ;;  %p150_p4 = por %p149_p2, %p7502_p1 }
  0x2e   : > { %s136_s29 = ssub.s32 %s4229_s25, %s8268_s27  ;;  %s4387_s30 = sand.u32 1, %s4221_s23  }
  0x2f   : > { %p139_p6 = scmp.eq.s32.totalorder %s136_s29, 0  ;;  %p4389_p7 = pnand %p3531_p5, %p150_p4 }
  0x30   : > { %s4397_s18 = sand.u32 1, %s4233_s26   ;;  %s4400_s19 = sshll.u32 %s4387_s30, 6 }
  0x31   : > { %s4394_s17 = scalar_select %p139_p6, %s4221_s23, %s141_s28  }
  0x32   : > { %s4403_s20 = sshll.u32 %s4229_s25, 10  ;;  %s7710_s4 = sld [smem:[#allocation101_spill]] }
  0x33   : > { %7709 = sst [smem:[#allocation47_spill]] %s4394_s17  ;;  %s600_s28 = scalar_lea.vmem [#allocation11], %s4400_s19 }
  0x34   : > { %s609_s17 = sshll.u32 %s600_s28, 4  ;;  %p4419_p9 = pneg %p4389_p7  ;;  %s4412_s17 = int_to_ptr.vmem [resolvable:$true] %s609_s17 }
  0x38   : > { %s4409_s29 = scalar_lea.hbm %s7710_s4, %s4403_s20  ;;  %s3693_s14 = scalar_lea.hbm %s7710_s4, 2048 }
  0x39   : > { %s3688_s15 = scalar_lea.hbm %s4409_s29, 1024  ;;  %p3694_p12 = scmp.lt.u32.totalorder %s4409_s29, %s7710_s4 }
  0x3a   : > { %p3689_p8 = scmp.ne.s32.totalorder %s4409_s29, %s3688_s15  ;;  %p3695_p13 = scmp.lt.u32.totalorder %s3693_s14, %s3688_s15 }
  0x3b   : > { %p3697_p2 = scmp.lt.u32.totalorder %s3688_s15, %s4409_s29 }
  0x3c   : > { %p3691_p10 = pnand %p4419_p9, %p3689_p8  ;;  %p3696_p0 = por %p3695_p13, %p3694_p12 }
  0x3e   : > { %p3692_p11 = pneg %p3691_p10  ;;  %p3698_p4 = por %p3697_p2, %p3696_p0 }
  0x40   : > { %p3699_p5 = pnand %p3698_p4, %p3692_p11 }
  0x42   : > { %3702 = shalt.err (!%p3699_p5)
}
  0x43   : > { %s3703_s16 = scalar_lea.vmem %s4412_s17, 1024  ;;  %s4235_s11 = smov [#allocation11]  }
  0x44   : > { %p3704_p6 = scmp.ne.s32.totalorder %s4412_s17, %s3703_s16  ;;  %s3708_s27 = sshll.u32 %s4235_s11, 4  ;;  %s3709_s27 = int_to_ptr.vmem [resolvable:$false] %s3708_s27 }
  0x45   : > { %s3710_s12 = scalar_lea.vmem %s3709_s27, 2048  ;;  %p3711_p3 = scmp.lt.s32.totalorder %s4412_s17, %s3709_s27 }
  0x46   : > { %p3706_p8 = pnand %p3704_p6, %p4419_p9  ;;  %p3712_p1 = scmp.lt.s32.totalorder %s3710_s12, %s3703_s16 }
  0x48   : > { %p3707_p10 = pneg %p3706_p8  ;;  %p3713_p12 = por %p3712_p1, %p3711_p3 }
  0x4a   : > { %p3714_p13 = pnand %p3713_p12, %p3707_p10 }
  0x4c   : > { %3717 = shalt.err (!%p3714_p13)
}
  0x4d   : > { %s7508_s14 = smov 128   ;;  %s7510_s15 = smov 8  }
  0x4e   : > { %s7712_s28 = scalar_lea.sflag [#allocation12], %s4397_s18  ;;  %s7713_s6 = sld [smem:[#allocation103_spill]] }
  0x4f   : > { %3490 = dma.hbm_to_vmem [thread:$0]  (!%p4389_p7), %s4409_s29, 1024, %s4412_s17, %s7712_s28, %s7508_s14, %s7508_s14, %s7510_s15  }
  0x50   : > { %s646_s12 = scalar_lea.vmem [#allocation14], %s4400_s19  ;;  %s7505_s24 = scalar_lea.sflag [#allocation15], %s4397_s18 }
  0x51   : > { %s655_s4 = sshll.u32 %s646_s12, 4  ;;  %s4454_s4 = int_to_ptr.vmem [resolvable:$true] %s655_s4 }
  0x54   : > { %s4451_s27 = scalar_lea.hbm %s7713_s6, %s4403_s20  ;;  %s3723_s28 = scalar_lea.hbm %s7713_s6, 2048 }
  0x55   : > { %s3718_s10 = scalar_lea.hbm %s4451_s27, 1024  ;;  %p3724_p0 = scmp.lt.u32.totalorder %s4451_s27, %s7713_s6 }
  0x56   : > { %p3719_p1 = scmp.ne.s32.totalorder %s4451_s27, %s3718_s10  ;;  %p3725_p2 = scmp.lt.u32.totalorder %s3723_s28, %s3718_s10 }
  0x57   : > { %p3727_p5 = scmp.lt.u32.totalorder %s3718_s10, %s4451_s27 }
  0x58   : > { %p3721_p3 = pnand %p3719_p1, %p4419_p9  ;;  %p3726_p4 = por %p3725_p2, %p3724_p0 }
  0x5a   : > { %p3722_p11 = pneg %p3721_p3  ;;  %p3728_p6 = por %p3727_p5, %p3726_p4 }
  0x5c   : > { %p3729_p8 = pnand %p3728_p6, %p3722_p11 }
  0x5e   : > { %3732 = shalt.err (!%p3729_p8)
}
  0x5f   : > { %s3733_s12 = scalar_lea.vmem %s4454_s4, 1024  ;;  %s4238_s17 = smov [#allocation14]  }
  0x60   : > { %p3734_p10 = scmp.ne.s32.totalorder %s4454_s4, %s3733_s12  ;;  %s3738_s29 = sshll.u32 %s4238_s17, 4  ;;  %s3739_s29 = int_to_ptr.vmem [resolvable:$false] %s3738_s29 }
  0x61   : > { %s3740_s16 = scalar_lea.vmem %s3739_s29, 2048  ;;  %p3741_p1 = scmp.lt.s32.totalorder %s4454_s4, %s3739_s29 }
  0x62   : > { %p3736_p12 = pnand %p3734_p10, %p4419_p9  ;;  %p3742_p3 = scmp.lt.s32.totalorder %s3740_s16, %s3733_s12 }
  0x64   : > { %p3737_p13 = pneg %p3736_p12  ;;  %p3743_p0 = por %p3742_p3, %p3741_p1 }
  0x66   : > { %p3744_p2 = pnand %p3743_p0, %p3737_p13 }
  0x68   : > { %3747 = shalt.err (!%p3744_p2)
}
  0x69   : > { %3496 = dma.hbm_to_vmem [thread:$0]  (!%p4389_p7), %s4451_s27, 1024, %s4454_s4, %s7505_s24, %s7508_s14, %s7508_s14, %s7510_s15  }
  0x6a   : > { %s7714_s8 = sld [smem:[#allocation105_spill]]  ;;  %s692_s12 = scalar_lea.vmem [#allocation17], %s4400_s19 }
  0x6b   : > { %s701_s17 = sshll.u32 %s692_s12, 4  ;;  %s7507_s29 = scalar_lea.sflag [#allocation18], %s4397_s18  ;;  %s4490_s17 = int_to_ptr.vmem [resolvable:$true] %s701_s17 }
  0x70   : > { %s4487_s11 = scalar_lea.hbm %s7714_s8, %s4403_s20  ;;  %s3753_s10 = scalar_lea.hbm %s7714_s8, 2048 }
  0x71   : > { %s3748_s16 = scalar_lea.hbm %s4487_s11, 1024  ;;  %p3754_p6 = scmp.lt.u32.totalorder %s4487_s11, %s7714_s8 }
  0x72   : > { %p3749_p11 = scmp.ne.s32.totalorder %s4487_s11, %s3748_s16  ;;  %p3755_p8 = scmp.lt.u32.totalorder %s3753_s10, %s3748_s16 }
  0x73   : > { %p3757_p12 = scmp.lt.u32.totalorder %s3748_s16, %s4487_s11 }
  0x74   : > { %p3751_p4 = pnand %p3749_p11, %p4419_p9  ;;  %p3756_p10 = por %p3755_p8, %p3754_p6 }
  0x76   : > { %p3752_p5 = pneg %p3751_p4  ;;  %p3758_p13 = por %p3757_p12, %p3756_p10 }
  0x78   : > { %p3759_p1 = pnand %p3758_p13, %p3752_p5 }
  0x7a   : > { %3762 = shalt.err (!%p3759_p1)
}
  0x7b   : > { %s3763_s12 = scalar_lea.vmem %s4490_s17, 1024  ;;  %s4239_s4 = smov [#allocation17]  }
  0x7c   : > { %p3764_p3 = scmp.ne.s32.totalorder %s4490_s17, %s3763_s12  ;;  %s3768_s27 = sshll.u32 %s4239_s4, 4  ;;  %s3769_s27 = int_to_ptr.vmem [resolvable:$false] %s3768_s27 }
  0x7d   : > { %s3770_s24 = scalar_lea.vmem %s3769_s27, 2048  ;;  %p3771_p11 = scmp.lt.s32.totalorder %s4490_s17, %s3769_s27 }
  0x7e   : > { %p3766_p0 = pnand %p3764_p3, %p4419_p9  ;;  %p3772_p4 = scmp.lt.s32.totalorder %s3770_s24, %s3763_s12 }
  0x80   : > { %p3767_p2 = pneg %p3766_p0  ;;  %p3773_p6 = por %p3772_p4, %p3771_p11 }
  0x82   : > { %p3774_p8 = pnand %p3773_p6, %p3767_p2 }
  0x84   : > { %3777 = shalt.err (!%p3774_p8)
}
  0x85   : > { %3502 = dma.hbm_to_vmem [thread:$0]  (!%p4389_p7), %s4487_s11, 1024, %s4490_s17, %s7507_s29, %s7508_s14, %s7508_s14, %s7510_s15  }
  0x86   : > { %s4520_s16 = sadd.s32 4294967295, %s4233_s26   ;;  %s7506_s10 = sadd.s32 4294967294, %s4233_s26  }
  0x87   : > { %p154_p5 = scmp.ne.s32.totalorder %s4217_s22, %s4213_s21  ;;  %p7516_p10 = scmp.eq.s32.totalorder %s4520_s16, 0 }
  0x88   : > { %p376_p12 = scmp.eq.s32.totalorder %s4520_s16, 1  ;;  %p382_p13 = scmp.eq.s32.totalorder %s7506_s10, 1 }
  0x89   : > { %p3225_p1 = scmp.ge.s32.totalorder %s4233_s26, 1  ;;  %p4532_p3 = por %p7516_p10, %p154_p5 }
  0x8a   : > { %p7716_p0 = scmp.ne.s32.totalorder %s4221_s23, %s4217_s22  ;;  %p4543_p11 = por %p382_p13, %p154_p5 }
  0x8b   : > { %s7715_s28 = scalar_select %p4532_p3, 1, 0 }
  0x8c   : > { %p4539_p2 = por %p376_p12, %p7716_p0  ;;  %p529_p4 = scmp.lt.s32.totalorder %s4233_s26, 3 }
  0x8d   : > { %s7718_s17 = scalar_select %p4543_p11, 1, 0 }
  0x8e   : > { %s7717_s11 = scalar_select %p4539_p2, 1, 0 }
  0x8f   : > { %7719 = sst [smem:[#allocation48_spill]] %s7718_s17  ;;  %p4548_p6 = pnand %p3225_p1, %p529_p4 }
  0x90   : > { %s7721_s1 = sld [smem:[#allocation98_spill]]  ;;  %s7722_s2 = sld [smem:[#allocation99_spill]] }
  0x91   : > { %s7720_s12 = scalar_select %p4548_p6, 1, 0 }
  0x92   : > { %p3474_p8 = pneg %p4548_p6  ;;  %s3393_s4 = sshll.u32 %s4229_s25, 11 }
  0x93   : > { %s7724_s8 = sld [smem:[#allocation97_spill]] }
  0x94   : > { %p4564_p5 = pnand %p3474_p8, %p7516_p10 }
  0x96   : > { %s551_s24 = sshll.u32 %s7721_s1, 4  ;;  %s562_s14 = sshll.u32 %s7722_s2, 4  ;;  %s552_s24 = int_to_ptr.vmem [resolvable:$true] %s551_s24  ;;  %s4560_s14 = int_to_ptr.vmem [resolvable:$true] %s562_s14 }
  0x97   : > { %p3780_p13 = pneg %p4564_p5 }
  0x99   : > { %s3778_s23 = scalar_lea.hbm %s7724_s8, 16 }
  0x9a   : > { %p3779_p12 = scmp.ne.s32.totalorder %s7724_s8, %s3778_s23  ;;  %p3785_p4 = scmp.lt.u32.totalorder %s3778_s23, %s7724_s8 }
  0x9c   : > { %p3781_p1 = pnand %p3780_p13, %p3779_p12 }
  0x9e   : > { %p3782_p0 = pneg %p3781_p1 }
  0xa0   : > { %p3787_p8 = pnand %p3785_p4, %p3782_p0 }
  0xa2   : > { %3790 = shalt.err (!%p3787_p8)
}
  0xa3   : > { %s4240_s6 = smov [#allocation2]   ;;  %s3791_s26 = scalar_lea.vmem %s552_s24, 32 }
  0xa4   : > { %3477 = dma.hbm_to_smem (!%p4564_p5), %s7724_s8, 16, %s4240_s6, [#allocation5]  }
  0xa5   : > { %p3792_p10 = scmp.ne.s32.totalorder %s552_s24, %s3791_s26  ;;  %p3799_p11 = scmp.lt.s32.totalorder %s552_s24, %s552_s24 }
  0xa6   : > { %p3800_p2 = scmp.lt.s32.totalorder %s3791_s26, %s3791_s26 }
  0xa7   : > { %p3794_p12 = pnand %p3792_p10, %p3780_p13 }
  0xa8   : > { %p3801_p3 = por %p3800_p2, %p3799_p11 }
  0xa9   : > { %p3795_p1 = pneg %p3794_p12 }
  0xab   : > { %p3802_p6 = pnand %p3801_p3, %p3795_p1 }
  0xad   : > { %3805 = shalt.err (!%p3802_p6)
}
  0xae   : > { %s4241_s23 = smov [#allocation7]   ;;  %s3806_s6 = scalar_lea.vmem %s4560_s14, 32 }
  0xaf   : > { %3480 = dma.vmem_to_smem (!%p4564_p5), %s552_s24, 32, %s4241_s23, [#allocation6]  }
  0xb0   : > { %p3807_p0 = scmp.ne.s32.totalorder %s4560_s14, %s3806_s6  ;;  %p3814_p8 = scmp.lt.s32.totalorder %s4560_s14, %s4560_s14 }
  0xb1   : > { %p3815_p12 = scmp.lt.s32.totalorder %s3806_s6, %s3806_s6 }
  0xb2   : > { %p3809_p4 = pnand %p3807_p0, %p3780_p13 }
  0xb3   : > { %p3816_p2 = por %p3815_p12, %p3814_p8 }
  0xb4   : > { %p3810_p10 = pneg %p3809_p4 }
  0xb6   : > { %p3817_p3 = pnand %p3816_p2, %p3810_p10 }
  0xb8   : > { %3820 = shalt.err (!%p3817_p3)
}
  0xb9   : > { %s4242_s17 = smov [#allocation8]   ;;  %s7725_s3 = sld [smem:[#allocation100_spill]] }
  0xba   : > { %3483 = dma.vmem_to_smem (!%p4564_p5), %s4560_s14, 32, %s4242_s17, [#allocation9]  }
  0xbb   : > { %s7726_s1 = sshll.u32 %s4387_s30, 7  ;;  %s574_s15 = scalar_lea.sflag [#allocation3], %s4387_s30 }
  0xbc   : > { %s577_s27 = scalar_lea.vmem [#allocation10], %s7726_s1 }
  0xbd   : > { %s586_s26 = sshll.u32 %s577_s27, 4  ;;  %s4613_s26 = int_to_ptr.vmem [resolvable:$true] %s586_s26 }
  0xbf   : > { %s4609_s10 = scalar_lea.hbm %s7725_s3, %s3393_s4  ;;  %s3826_s4 = scalar_lea.hbm %s7725_s3, 4096 }
  0xc0   : > { %s3821_s23 = scalar_lea.hbm %s4609_s10, 2048  ;;  %p3827_p13 = scmp.lt.u32.totalorder %s4609_s10, %s7725_s3 }
  0xc1   : > { %p3822_p11 = scmp.ne.s32.totalorder %s4609_s10, %s3821_s23  ;;  %p3828_p1 = scmp.lt.u32.totalorder %s3826_s4, %s3821_s23 }
  0xc2   : > { %p3830_p4 = scmp.lt.u32.totalorder %s3821_s23, %s4609_s10 }
  0xc3   : > { %p3824_p6 = pnand %p3822_p11, %p4419_p9  ;;  %p3829_p0 = por %p3828_p1, %p3827_p13 }
  0xc5   : > { %p3825_p5 = pneg %p3824_p6  ;;  %p3831_p10 = por %p3830_p4, %p3829_p0 }
  0xc7   : > { %p3832_p8 = pnand %p3831_p10, %p3825_p5 }
  0xc9   : > { %3835 = shalt.err (!%p3832_p8)
}
  0xca   : > { %s3836_s29 = scalar_lea.vmem %s4613_s26, 2048  ;;  %s4243_s1 = smov [#allocation10]  }
  0xcb   : > { %p3837_p12 = scmp.ne.s32.totalorder %s4613_s26, %s3836_s29  ;;  %s3841_s27 = sshll.u32 %s4243_s1, 4  ;;  %s3842_s27 = int_to_ptr.vmem [resolvable:$false] %s3841_s27 }
  0xcc   : > { %s3843_s14 = scalar_lea.vmem %s3842_s27, 4096  ;;  %p3844_p11 = scmp.lt.s32.totalorder %s4613_s26, %s3842_s27 }
  0xcd   : > { %p3839_p2 = pnand %p3837_p12, %p4419_p9  ;;  %p3845_p6 = scmp.lt.s32.totalorder %s3843_s14, %s3836_s29 }
  0xcf   : > { %p3840_p3 = pneg %p3839_p2  ;;  %p3846_p13 = por %p3845_p6, %p3844_p11 }
  0xd1   : > { %p3847_p1 = pnand %p3846_p13, %p3840_p3 }
  0xd3   : > { %3850 = shalt.err (!%p3847_p1)
}
  0xd4   : > { %s7727_s23 = smov 8   ;;  %s7728_s6 = smov 128  }
  0xd5   : > { %3487 = dma.hbm_to_vmem [thread:$0]  (!%p4389_p7), %s4609_s10, 2048, %s4613_s26, %s574_s15, %s7728_s6, %s7728_s6, %s7727_s23  }
  0xd6   : > { %s7729_s5 = sld [smem:[#allocation102_spill]]  ;;  %s623_s29 = scalar_lea.vmem [#allocation13], %s4400_s19 }
  0xd7   : > { %s632_s1 = sshll.u32 %s623_s29, 4  ;;  %s4649_s1 = int_to_ptr.vmem [resolvable:$true] %s632_s1 }
  0xdc   : > { %s4646_s24 = scalar_lea.hbm %s7729_s5, %s4403_s20  ;;  %s3856_s26 = scalar_lea.hbm %s7729_s5, 2048 }
  0xdd   : > { %s3851_s27 = scalar_lea.hbm %s4646_s24, 1024  ;;  %p3857_p10 = scmp.lt.u32.totalorder %s4646_s24, %s7729_s5 }
  0xde   : > { %p3852_p5 = scmp.ne.s32.totalorder %s4646_s24, %s3851_s27  ;;  %p3858_p8 = scmp.lt.u32.totalorder %s3856_s26, %s3851_s27 }
  0xdf   : > { %p3860_p2 = scmp.lt.u32.totalorder %s3851_s27, %s4646_s24 }
  0xe0   : > { %p3854_p0 = pnand %p3852_p5, %p4419_p9  ;;  %p3859_p12 = por %p3858_p8, %p3857_p10 }
  0xe2   : > { %p3855_p4 = pneg %p3854_p0  ;;  %p3861_p3 = por %p3860_p2, %p3859_p12 }
  0xe4   : > { %p3862_p11 = pnand %p3861_p3, %p3855_p4 }
  0xe6   : > { %3865 = shalt.err (!%p3862_p11)
}
  0xe7   : > { %s3866_s17 = scalar_lea.vmem %s4649_s1, 1024  ;;  %s4244_s29 = smov [#allocation13]  }
  0xe8   : > { %p3867_p6 = scmp.ne.s32.totalorder %s4649_s1, %s3866_s17  ;;  %s3871_s14 = sshll.u32 %s4244_s29, 4  ;;  %s3872_s14 = int_to_ptr.vmem [resolvable:$false] %s3871_s14 }
  0xe9   : > { %s3873_s10 = scalar_lea.vmem %s3872_s14, 2048  ;;  %p3874_p5 = scmp.lt.s32.totalorder %s4649_s1, %s3872_s14 }
  0xea   : > { %p3869_p13 = pnand %p3867_p6, %p4419_p9  ;;  %p3875_p0 = scmp.lt.s32.totalorder %s3873_s10, %s3866_s17 }
  0xec   : > { %p3870_p1 = pneg %p3869_p13  ;;  %p3876_p10 = por %p3875_p0, %p3874_p5 }
  0xee   : > { %p3877_p8 = pnand %p3876_p10, %p3870_p1 }
  0xf0   : > { %3880 = shalt.err (!%p3877_p8)
}
  0xf1   : > { %s7730_s27 = scalar_lea.sflag [#allocation12], %s4397_s18  ;;  %s7731_s7 = sld [smem:[#allocation104_spill]] }
  0xf2   : > { %3493 = dma.hbm_to_vmem [thread:$0]  (!%p4389_p7), %s4646_s24, 1024, %s4649_s1, %s7730_s27, %s7728_s6, %s7728_s6, %s7727_s23  }
  0xf3   : > { %s669_s17 = scalar_lea.vmem [#allocation16], %s4400_s19 }
  0xf4   : > { %s678_s29 = sshll.u32 %s669_s17, 4  ;;  %s4684_s29 = int_to_ptr.vmem [resolvable:$true] %s678_s29 }
  0xf7   : > { %s4681_s4 = scalar_lea.hbm %s7731_s7, %s4403_s20  ;;  %s3886_s1 = scalar_lea.hbm %s7731_s7, 2048 }
  0xf8   : > { %s3881_s14 = scalar_lea.hbm %s4681_s4, 1024  ;;  %p3887_p3 = scmp.lt.u32.totalorder %s4681_s4, %s7731_s7 }
  0xf9   : > { %p3882_p4 = scmp.ne.s32.totalorder %s4681_s4, %s3881_s14  ;;  %p3888_p11 = scmp.lt.u32.totalorder %s3886_s1, %s3881_s14 }
  0xfa   : > { %p3890_p13 = scmp.lt.u32.totalorder %s3881_s14, %s4681_s4 }
  0xfb   : > { %p3884_p12 = pnand %p3882_p4, %p4419_p9  ;;  %p3889_p6 = por %p3888_p11, %p3887_p3 }
  0xfd   : > { %p3885_p2 = pneg %p3884_p12  ;;  %p3891_p1 = por %p3890_p13, %p3889_p6 }
  0xff   : > { %p3892_p5 = pnand %p3891_p1, %p3885_p2 }
 0x101   : > { %3895 = shalt.err (!%p3892_p5)
}
 0x102   : > { %s3896_s15 = scalar_lea.vmem %s4684_s29, 1024  ;;  %s4245_s17 = smov [#allocation16]  }
 0x103   : > { %p3897_p0 = scmp.ne.s32.totalorder %s4684_s29, %s3896_s15  ;;  %s3901_s10 = sshll.u32 %s4245_s17, 4  ;;  %s3902_s10 = int_to_ptr.vmem [resolvable:$false] %s3901_s10 }
 0x104   : > { %s3903_s24 = scalar_lea.vmem %s3902_s10, 2048  ;;  %p3904_p4 = scmp.lt.s32.totalorder %s4684_s29, %s3902_s10 }
 0x105   : > { %p3899_p10 = pnand %p3897_p0, %p4419_p9  ;;  %p3905_p12 = scmp.lt.s32.totalorder %s3903_s24, %s3896_s15 }
 0x107   : > { %p3900_p8 = pneg %p3899_p10  ;;  %p3906_p3 = por %p3905_p12, %p3904_p4 }
 0x109   : > { %p3907_p11 = pnand %p3906_p3, %p3900_p8 }
 0x10b   : > { %3910 = shalt.err (!%p3907_p11)
}
 0x10c   : > { %s7732_s14 = scalar_lea.sflag [#allocation15], %s4397_s18  ;;  %s4716_s26 = scalar_lea.hbm %s7486_s9, %s4403_s20 }
 0x10d   : > { %3499 = dma.hbm_to_vmem [thread:$0]  (!%p4389_p7), %s4681_s4, 1024, %s4684_s29, %s7732_s14, %s7728_s6, %s7728_s6, %s7727_s23  }
 0x10e   : > { %s715_s15 = scalar_lea.vmem [#allocation19], %s4400_s19  ;;  %s3911_s10 = scalar_lea.hbm %s4716_s26, 1024 }
 0x10f   : > { %s724_s17 = sshll.u32 %s715_s15, 4  ;;  %p3912_p2 = scmp.ne.s32.totalorder %s4716_s26, %s3911_s10  ;;  %s4719_s17 = int_to_ptr.vmem [resolvable:$true] %s724_s17 }
 0x110   : > { %s3916_s29 = scalar_lea.hbm %s7486_s9, 2048  ;;  %p3917_p1 = scmp.lt.u32.totalorder %s4716_s26, %s7486_s9 }
 0x111   : > { %p3914_p6 = pnand %p3912_p2, %p4419_p9  ;;  %p3918_p5 = scmp.lt.u32.totalorder %s3916_s29, %s3911_s10 }
 0x112   : > { %p3920_p10 = scmp.lt.u32.totalorder %s3911_s10, %s4716_s26 }
 0x113   : > { %p3915_p13 = pneg %p3914_p6  ;;  %p3919_p0 = por %p3918_p5, %p3917_p1 }
 0x115   : > { %p3921_p8 = por %p3920_p10, %p3919_p0 }
 0x117   : > { %p3922_p4 = pnand %p3921_p8, %p3915_p13 }
 0x119   : > { %3925 = shalt.err (!%p3922_p4)
}
 0x11a   : > { %s3926_s19 = scalar_lea.vmem %s4719_s17, 1024  ;;  %s4246_s1 = smov [#allocation19]  }
 0x11b   : > { %p3927_p12 = scmp.ne.s32.totalorder %s4719_s17, %s3926_s19  ;;  %s3931_s27 = sshll.u32 %s4246_s1, 4  ;;  %s3932_s27 = int_to_ptr.vmem [resolvable:$false] %s3931_s27 }
 0x11c   : > { %s3933_s15 = scalar_lea.vmem %s3932_s27, 2048  ;;  %p3934_p2 = scmp.lt.s32.totalorder %s4719_s17, %s3932_s27 }
 0x11d   : > { %p3929_p3 = pnand %p3927_p12, %p4419_p9  ;;  %p3935_p6 = scmp.lt.s32.totalorder %s3933_s15, %s3926_s19 }
 0x11f   : > { %p3930_p11 = pneg %p3929_p3  ;;  %p3936_p1 = por %p3935_p6, %p3934_p2 }
 0x121   : > { %p3937_p5 = pnand %p3936_p1, %p3930_p11 }
 0x123   : > { %3940 = shalt.err (!%p3937_p5)
}
 0x124   : > { %s7733_s10 = scalar_lea.sflag [#allocation18], %s4397_s18  ;;  %s3405_s24 = smul.u32 192, %s4387_s30 }
 0x125   : > { %3505 = dma.hbm_to_vmem [thread:$0]  (!%p4389_p7), %s4716_s26, 1024, %s4719_s17, %s7733_s10, %s7728_s6, %s7728_s6, %s7727_s23  }
 0x126   : > { %s3406_s4 = smul.u32 3072, %s4229_s25  ;;  %s7734_s20 = sld [smem:[#allocation106_spill]] }
 0x127   : > { %s738_s1 = scalar_lea.vmem [#allocation20], %s3405_s24  ;;  %s735_s27 = scalar_lea.sflag [#allocation21], %s4387_s30 }
 0x128   : > { %s747_s18 = sshll.u32 %s738_s1, 4  ;;  %s4754_s18 = int_to_ptr.vmem [resolvable:$true] %s747_s18 }
 0x12c   : > { %s4752_s19 = scalar_lea.hbm %s7734_s20, %s3406_s4  ;;  %s3946_s10 = scalar_lea.hbm %s7734_s20, 6144 }
 0x12d   : > { %s3941_s15 = scalar_lea.hbm %s4752_s19, 3072  ;;  %p3947_p8 = scmp.lt.u32.totalorder %s4752_s19, %s7734_s20 }
 0x12e   : > { %p3942_p13 = scmp.ne.s32.totalorder %s4752_s19, %s3941_s15  ;;  %p3948_p4 = scmp.lt.u32.totalorder %s3946_s10, %s3941_s15 }
 0x12f   : > { %p3950_p3 = scmp.lt.u32.totalorder %s3941_s15, %s4752_s19 }
 0x130   : > { %p3944_p0 = pnand %p3942_p13, %p4419_p9  ;;  %p3949_p12 = por %p3948_p4, %p3947_p8 }
 0x132   : > { %p3945_p10 = pneg %p3944_p0  ;;  %p3951_p11 = por %p3950_p3, %p3949_p12 }
 0x134   : > { %p3952_p2 = pnand %p3951_p11, %p3945_p10 }
 0x136   : > { %3955 = shalt.err (!%p3952_p2)
}
 0x137   : > { %s3956_s24 = scalar_lea.vmem %s4754_s18, 3072  ;;  %s4247_s14 = smov [#allocation20]  }
 0x138   : > { %p3957_p6 = scmp.ne.s32.totalorder %s4754_s18, %s3956_s24  ;;  %s3961_s1 = sshll.u32 %s4247_s14, 4  ;;  %s3962_s1 = int_to_ptr.vmem [resolvable:$false] %s3961_s1 }
 0x139   : > { %s3963_s26 = scalar_lea.vmem %s3962_s1, 6144  ;;  %p3964_p13 = scmp.lt.s32.totalorder %s4754_s18, %s3962_s1 }
 0x13a   : > { %p3959_p1 = pnand %p3957_p6, %p4419_p9  ;;  %p3965_p0 = scmp.lt.s32.totalorder %s3963_s26, %s3956_s24 }
 0x13c   : > { %p3960_p5 = pneg %p3959_p1  ;;  %p3966_p8 = por %p3965_p0, %p3964_p13 }
 0x13e   : > { %p3967_p4 = pnand %p3966_p8, %p3960_p5 }
 0x140   : > { %3970 = shalt.err (!%p3967_p4)
}
 0x141   : > { %3508 = dma.hbm_to_vmem [thread:$0]  (!%p4389_p7), %s4752_s19, 3072, %s4754_s18, %s735_s27, %s7728_s6, %s7728_s6, %s7727_s23  }
 0x142   : > { %p7735_p9 = scmp.ne.s32.totalorder %s7720_s12, 0 }
 0x144   : > { %759 = sbr.rel (%p7735_p9) target bundleno = 926 (0x39e), region = 64 }
 0x14b   : > { %p7736_p10 = scmp.eq.s32.totalorder %s4520_s16, 0 }
 0x14d   : > { %4164 = dma.done.wait (%p7736_p10), [#allocation5], 16   ;;  %p7737_p12 = pmov %p7736_p10 }
 0x14e   : > { %p7738_p3 = pmov %p7736_p10 }
 0x14f   : > { %4166 = vsyncadd (%p7737_p12), [#allocation5], 4294967280 }
 0x150   : > { %4168 = dma.done.wait (%p7738_p3), [#allocation6], 32   ;;  %p7739_p11 = pmov %p7738_p3 }
 0x151   : > { %p7740_p2 = pmov %p7738_p3 }
 0x152   : > { %4170 = vsyncadd (%p7739_p11), [#allocation6], 4294967264 }
 0x153   : > { %4172 = dma.done.wait (%p7740_p2), [#allocation9], 32   ;;  %p7741_p7 = pmov %p7740_p2 }
 0x154   : > { %s4798_s13 = sand.u32 1, %s4217_s22   ;;  %p7742_p6 = scmp.ne.s32.totalorder %s7715_s28, 0 }
 0x155   : > { %4174 = vsyncadd (%p7741_p7), [#allocation9], 4294967264  ;;  %s7582_s30 = sshll.u32 %s4798_s13, 7  ;;  %s774_s0 = scalar_lea.sflag [#allocation3], %s4798_s13 }
 0x156   : > { %s4804_s12 = scalar_lea.vmem [#allocation10], %s7582_s30 }
 0x157   : > { %4176 = dma.done.wait (%p7742_p6), %s774_s0, 2048  }
 0x158   : > { %4178 = vsyncadd (%p7742_p6), %s774_s0, 4294965248  ;;  %s4811_s23 = sand.u32 1, %s4520_s16   ;;  %s4814_s6 = sshll.u32 %s4798_s13, 6 }
 0x159   : > { %s783_s19 = scalar_lea.sflag [#allocation12], %s4811_s23  ;;  %s4818_s18 = scalar_lea.vmem [#allocation11], %s4814_s6 }
 0x15a   : > { %4180 = dma.done.wait (%p7742_p6), %s783_s19, 2048  }
 0x15b   : > { %4182 = vsyncadd (%p7742_p6), %s783_s19, 4294965248  ;;  %s4825_s27 = scalar_lea.vmem [#allocation13], %s4814_s6  ;;  %s801_s16 = scalar_lea.sflag [#allocation15], %s4811_s23 }
 0x15c   : > { %s4829_s15 = scalar_lea.vmem [#allocation14], %s4814_s6 }
 0x15d   : > { %4184 = dma.done.wait (%p7742_p6), %s801_s16, 2048  }
 0x15e   : > { %4186 = vsyncadd (%p7742_p6), %s801_s16, 4294965248  ;;  %s4836_s17 = scalar_lea.vmem [#allocation16], %s4814_s6  ;;  %s819_s10 = scalar_lea.sflag [#allocation18], %s4811_s23 }
 0x15f   : > { %s4840_s4 = scalar_lea.vmem [#allocation17], %s4814_s6 }
 0x160   : > { %4188 = dma.done.wait (%p7742_p6), %s819_s10, 2048  }
 0x161   : > { %4190 = vsyncadd (%p7742_p6), %s819_s10, 4294965248  ;;  %s3407_s29 = smul.u32 192, %s4798_s13  ;;  %s4848_s24 = scalar_lea.vmem [#allocation19], %s4814_s6 }
 0x162   : > { %s837_s14 = scalar_lea.sflag [#allocation21], %s4798_s13 }
 0x163   : > { %s4851_s1 = scalar_lea.vmem [#allocation20], %s3407_s29 }
 0x164   : > { %4192 = dma.done.wait (%p7742_p6), %s837_s14, 3072  }
 0x165   : > { %4194 = vsyncadd (%p7742_p6), %s837_s14, 4294964224 }
 0x166   : > { %845 = sfence }
 0x167   : > { %v7520_v0 = vlaneseq  ;;  %v4858_v1 = vld [vmem:[%s4825_s27] sm:$0xff]  ;;  %v4861_v2 = vld [vmem:[%s4825_s27 + $0x8] sm:$0xff]  ;;  %v4864_v3 = vld [vmem:[%s4825_s27 + $0x10] sm:$0xff]  ;;  %v7521_v17 = vmov 0.0   ;;  %s5011_s28 = scalar_lea.vmem [#allocation23], %s4814_s6  ;;  %s7878_s26 = sld [smem:[#allocation44_spill]] }
 0x168   : > { %7743 = vst [vmem:[#allocation49_spill] sm:$0xff] %v4858_v1  ;;  %7744 = vst [vmem:[#allocation50_spill] sm:$0xff] %v4861_v2  ;;  %v4867_v4 = vld [vmem:[%s4829_s15] sm:$0xff]  ;;  %v4870_v5 = vmul.f32 0.05, %v4858_v1  ;;  %v4879_v8 = vld [vmem:[%s4829_s15 + $0x8] sm:$0xff] }
 0x169   : > { %7745 = vst [vmem:[#allocation51_spill] sm:$0xff] %v4864_v3  ;;  %7746 = vst [vmem:[#allocation52_spill] sm:$0xff] %v4867_v4  ;;  %v4873_v6 = vmul.f32 0.05, %v4861_v2  ;;  %v4876_v7 = vshrl.u32 %v7520_v0, 7  ;;  %v4882_v9 = vld [vmem:[%s4829_s15 + $0x10] sm:$0xff] }
 0x16a   : > { %7748 = vst [vmem:[#allocation54_spill] sm:$0xff] %v4879_v8  ;;  %7749 = vst [vmem:[#allocation55_spill] sm:$0xff] %v4882_v9  ;;  %v4885_v10 = vld [vmem:[%s4829_s15 + $0x18] sm:$0xff]  ;;  %vm7553_vm0 = vcmp.eq.f32.partialorder %v4867_v4, 1.0  ;;  %v4889_v11 = vmul.f32 0.05, %v4864_v3 }
 0x16b   : > { %7747 = vst [vmem:[#allocation53_spill] sm:$0xff] %v4876_v7  ;;  %7750 = vst [vmem:[#allocation56_spill] sm:$0xff] %v4885_v10  ;;  %v4892_v12 = vld [vmem:[%s4829_s15 + $0x20] sm:$0xff]  ;;  %v4895_v13 = vld [vmem:[%s4829_s15 + $0x28] sm:$0xff]  ;;  %vm7552_vm1 = vcmp.eq.f32.partialorder %v4879_v8, 1.0  ;;  %vm7551_vm2 = vcmp.eq.f32.partialorder %v4882_v9, 1.0  ;;  %v4904_v15 = vcvt.s32.f32 %v4876_v7 }
 0x16c   : > { %7751 = vst [vmem:[#allocation57_spill] sm:$0xff] %v4892_v12  ;;  %7752 = vst [vmem:[#allocation58_spill] sm:$0xff] %v4895_v13  ;;  %v4898_v14 = vld [vmem:[%s4829_s15 + $0x30] sm:$0xff]  ;;  %vm7550_vm3 = vcmp.eq.f32.partialorder %v4885_v10, 1.0  ;;  %v4907_v16 = vld [vmem:[%s4829_s15 + $0x38] sm:$0xff]  ;;  %vm7549_vm4 = vcmp.eq.f32.partialorder %v4892_v12, 1.0 }
 0x16d   : > { %7753 = vst [vmem:[#allocation59_spill] sm:$0xff] %v4898_v14  ;;  %7754 = vst [vmem:[#allocation60_spill] sm:$0xff] %v4904_v15  ;;  %vm7548_vm5 = vcmp.eq.f32.partialorder %v4895_v13, 1.0  ;;  %vm7547_vm6 = vcmp.eq.f32.partialorder %v4898_v14, 1.0  ;;  %v3277_v18 = vsel %vm7553_vm0, 1.0, %v7521_v17  ;;  %vm7546_vm7 = vcmp.eq.f32.partialorder %v4907_v16, 1.0 }
 0x16e   : > { %7755 = vst [vmem:[#allocation61_spill] sm:$0xff] %v4907_v16  ;;  %v3278_v19 = vsel %vm7552_vm1, 1.0, %v7521_v17  ;;  %v3279_v20 = vsel %vm7551_vm2, 1.0, %v7521_v17  ;;  %v3280_v21 = vsel %vm7550_vm3, 1.0, %v7521_v17  ;;  %v3281_v22 = vsel %vm7549_vm4, 1.0, %v7521_v17  ;;  %v4942_v26 = vld [vmem:[%s4825_s27 + $0x18] sm:$0xff] }
 0x16f   : > { %v3282_v23 = vsel %vm7548_vm5, 1.0, %v7521_v17  ;;  %v4934_v24 = vsel %vm7547_vm6, 1.0, %v7521_v17  ;;  %v4939_v25 = vsel %vm7546_vm7, 1.0, %v7521_v17  ;;  %v4945_v27 = vld [vmem:[%s4825_s27 + $0x20] sm:$0xff]  ;;  %v4948_v28 = vld [vmem:[%s4825_s27 + $0x28] sm:$0xff]  ;;  %v1153_v29 = vadd.f32 %v3278_v19, %v3277_v18  ;;  %v4951_v33 = vld [vmem:[%s4825_s27 + $0x30] sm:$0xff] }
 0x170   : > { %v1265_v30 = vsub.f32 1.0, %v3277_v18  ;;  %v1266_v31 = vsub.f32 1.0, %v3278_v19  ;;  %v1267_v32 = vsub.f32 1.0, %v3279_v20  ;;  %v4954_v34 = vld [vmem:[%s4825_s27 + $0x38] sm:$0xff]  ;;  %v1268_v35 = vsub.f32 1.0, %v3280_v21  ;;  %v992_v43 = vld [vmem:[%s4848_s24] sm:$0xff] }
 0x171   : > { %v1269_v36 = vsub.f32 1.0, %v3281_v22  ;;  %v1270_v37 = vsub.f32 1.0, %v3282_v23  ;;  %v1271_v38 = vsub.f32 1.0, %v4934_v24  ;;  %v1154_v39 = vadd.f32 %v3279_v20, %v1153_v29  ;;  %v993_v44 = vld [vmem:[%s4848_s24 + $0x8] sm:$0xff]  ;;  %v994_v45 = vld [vmem:[%s4848_s24 + $0x10] sm:$0xff]  ;;  %v995_v50 = vld [vmem:[%s4848_s24 + $0x18] sm:$0xff] }
 0x172   : > { %v1272_v40 = vsub.f32 1.0, %v4939_v25  ;;  %v4959_v41 = vadd.f32 %v1265_v30, %v4858_v1  ;;  %v4962_v42 = vadd.f32 %v1266_v31, %v4861_v2  ;;  %v4968_v46 = vadd.f32 %v1267_v32, %v4864_v3  ;;  %v996_v51 = vld [vmem:[%s4848_s24 + $0x20] sm:$0xff]  ;;  %v997_v55 = vld [vmem:[%s4848_s24 + $0x28] sm:$0xff]  ;;  %v998_v56 = vld [vmem:[%s4848_s24 + $0x30] sm:$0xff]  ;;  %s5512_s0 = sld [smem:[#allocation2 + %s7878_s26]]  ;;  %s5571_s27 = sshll.u32 %s7878_s26, 7 }
 0x173   : > { %v4971_v47 = vadd.f32 %v1268_v35, %v4942_v26  ;;  %v4974_v48 = vadd.f32 %v1269_v36, %v4945_v27  ;;  %v4977_v49 = vadd.f32 %v1270_v37, %v4948_v28  ;;  %v1155_v52 = vadd.f32 %v3280_v21, %v1154_v39  ;;  %v999_v57 = vld [vmem:[%s4848_s24 + $0x38] sm:$0xff]  ;;  %s1635_s16 = sadd.s32 1, %s5571_s27  ;;  %s7583_s15 = sadd.s32 2, %s5571_s27 }
 0x174   : > { %v4982_v53 = vadd.f32 %v1271_v38, %v4951_v33  ;;  %v4985_v54 = vadd.f32 %v1272_v40, %v4954_v34  ;;  %3592 = vrcp.f32 %v4959_v41  ;;  %v4992_v58 = vmul.f32 128.0, %v992_v43  ;;  %s1639_s10 = sadd.s32 3, %s5571_s27  ;;  %s7584_s29 = sadd.s32 4, %s5571_s27 }
 0x175   : > { %7756 = vst [vmem:[#allocation62_spill] sm:$0xff] %v4971_v47  ;;  %7757 = vst [vmem:[#allocation63_spill] sm:$0xff] %v4974_v48  ;;  %3594 = vrcp.f32 %v4962_v42  ;;  %v4994_v59 = vmul.f32 128.0, %v993_v44  ;;  %v4996_v60 = vmul.f32 128.0, %v994_v45  ;;  %v1156_v61 = vadd.f32 %v3281_v22, %v1155_v52  ;;  %s7593_s24 = sadd.s32 5, %s5571_s27  ;;  %s5634_s14 = sld [smem:[#allocation8 + %s5571_s27]] }
 0x176   : > { %7758 = vst [vmem:[#allocation64_spill] sm:$0xff] %v4977_v49  ;;  %7759 = vst [vmem:[#allocation65_spill] sm:$0xff] %v4982_v53  ;;  %3596 = vrcp.f32 %v4968_v46  ;;  %v4999_v62 = vmul.f32 128.0, %v995_v50  ;;  %v5001_v63 = vmul.f32 128.0, %v996_v51  ;;  %v5004_v18 = vmul.f32 128.0, %v997_v55  ;;  %s5668_s30 = sld [smem:[#allocation8 + %s1639_s10]] }
 0x177   : > { %7760 = vst [vmem:[#allocation66_spill] sm:$0xff] %v4985_v54  ;;  %7761 = vst [vmem:[#allocation67_spill] sm:$0xff] %v4994_v59  ;;  %3598 = vrcp.f32 %v4971_v47  ;;  %v5006_v19 = vmul.f32 128.0, %v998_v56  ;;  %v5008_v20 = vmul.f32 128.0, %v999_v57  ;;  %v1157_v21 = vadd.f32 %v3282_v23, %v1156_v61  ;;  %p8243_p5 = scmp.ne.s32.totalorder %s7717_s11, 0 }
 0x178   : > { %7762 = vst [vmem:[#allocation68_spill] sm:$0xff] %v4996_v60  ;;  %7763 = vst [vmem:[#allocation69_spill] sm:$0xff] %v4999_v62  ;;  %3600 = vrcp.f32 %v4974_v48  ;;  %vm1009_vm8 = vcmp.gt.f32.partialorder %v4994_v59, 0.0  ;;  %vm1010_vm9 = vcmp.gt.f32.partialorder %v4996_v60, 0.0  ;;  %vm1011_vm10 = vcmp.gt.f32.partialorder %v4999_v62, 0.0 }
 0x179   : > { %7764 = vst [vmem:[#allocation70_spill] sm:$0xff] %v5001_v63  ;;  %7765 = vst [vmem:[#allocation71_spill] sm:$0xff] %v5004_v18  ;;  %3602 = vrcp.f32 %v4977_v49  ;;  %vm1012_vm11 = vcmp.gt.f32.partialorder %v5001_v63, 0.0  ;;  %vm1013_vm12 = vcmp.gt.f32.partialorder %v5004_v18, 0.0  ;;  %v1158_v22 = vadd.f32 %v4934_v24, %v1157_v21  ;;  %s991_s19 = smul.f32 0.54, %s5512_s0 }
 0x17a   : > { %7766 = vst [vmem:[#allocation72_spill] sm:$0xff] %v5006_v19  ;;  %7767 = vst [vmem:[#allocation73_spill] sm:$0xff] %v5008_v20  ;;  %3604 = vrcp.f32 %v4982_v53  ;;  %vm1014_vm13 = vcmp.gt.f32.partialorder %v5006_v19, 0.0  ;;  %vm1015_vm14 = vcmp.gt.f32.partialorder %v5008_v20, 0.0  ;;  %v3270_v23 = vsel %vm1009_vm8, 1.0, %v7521_v17  ;;  %s5647_s0 = sld [smem:[#allocation8 + %s1635_s16]] }
 0x17b   : > { %1089 = vst [vmem:[%s5011_s28] sm:$0xff] %v4992_v58  ;;  %1090 = vst [vmem:[%s5011_s28 + $0x8] sm:$0xff] %v4994_v59  ;;  %3606 = vrcp.f32 %v4985_v54  ;;  %v3271_v29 = vsel %vm1010_vm9, 1.0, %v7521_v17  ;;  %v3272_v30 = vsel %vm1011_vm10, 1.0, %v7521_v17  ;;  %v1159_v24 = vadd.f32 %v4939_v25, %v1158_v22 }
 0x17c   : > { %1091 = vst [vmem:[%s5011_s28 + $0x10] sm:$0xff] %v4996_v60  ;;  %1092 = vst [vmem:[%s5011_s28 + $0x18] sm:$0xff] %v4999_v62  ;;  %v3273_v31 = vsel %vm1012_vm11, 1.0, %v7521_v17  ;;  %v3274_v32 = vsel %vm1013_vm12, 1.0, %v7521_v17  ;;  %v3275_v35 = vsel %vm1014_vm13, 1.0, %v7521_v17  ;;  %v3276_v36 = vsel %vm1015_vm14, 1.0, %v7521_v17 }
 0x17d   : > { %1093 = vst [vmem:[%s5011_s28 + $0x20] sm:$0xff] %v5001_v63  ;;  %1094 = vst [vmem:[%s5011_s28 + $0x28] sm:$0xff] %v5004_v18  ;;  %v1033_v37 = vsub.f32 1.0, %v3270_v23  ;;  %v1034_v38 = vsub.f32 1.0, %v3271_v29  ;;  %v1035_v39 = vsub.f32 1.0, %v3272_v30  ;;  %1160 = vadd.xlane.f32.xlu0 %v1159_v24  ;;  %v1036_v43 = vsub.f32 1.0, %v3273_v31 }
 0x17e   : > { %1095 = vst [vmem:[%s5011_s28 + $0x30] sm:$0xff] %v5006_v19  ;;  %1096 = vst [vmem:[%s5011_s28 + $0x38] sm:$0xff] %v5008_v20  ;;  %v3593_v40 = vpop.eup %3592  ;;  %v1037_v44 = vsub.f32 1.0, %v3274_v32  ;;  %v1038_v45 = vsub.f32 1.0, %v3275_v35  ;;  %v1039_v50 = vsub.f32 1.0, %v3276_v36  ;;  %v5090_v15 = vsub.f32 %v4948_v28, %v5004_v18 }
 0x17f   : > { %v3595_v51 = vpop.eup %3594  ;;  %v1289_v25 = vmul.f32 %v3593_v40, %v4959_v41  ;;  %v1041_v52 = vadd.f32 %v1033_v37, %v4994_v59  ;;  %v1042_v55 = vadd.f32 %v1034_v38, %v4996_v60  ;;  %v1043_v56 = vadd.f32 %v1035_v39, %v4999_v62 }
 0x180   : > { %v3597_v57 = vpop.eup %3596  ;;  %v1290_v61 = vmul.f32 %v3595_v51, %v4962_v42  ;;  %v1044_v21 = vadd.f32 %v1036_v43, %v5001_v63  ;;  %v1045_v22 = vadd.f32 %v1037_v44, %v5004_v18  ;;  %v1046_v23 = vadd.f32 %v1038_v45, %v5006_v19 }
 0x181   : > { %v3599_v29 = vpop.eup %3598  ;;  %v1291_v30 = vmul.f32 %v3597_v57, %v4968_v46  ;;  %v1297_v24 = vsub.f32 2.0, %v1289_v25  ;;  %v1047_v31 = vadd.f32 %v1039_v50, %v5008_v20  ;;  %3608 = vrcp.f32 %v1041_v52 }
 0x182   : > { %v3601_v32 = vpop.eup %3600  ;;  %v1292_v35 = vmul.f32 %v3599_v29, %v4971_v47  ;;  %v1298_v36 = vsub.f32 2.0, %v1290_v61  ;;  %3610 = vrcp.f32 %v1042_v55  ;;  %v5066_v37 = vsub.f32 %v4858_v1, %v4992_v58 }
 0x183   : > { %v3603_v38 = vpop.eup %3602  ;;  %v1293_v39 = vmul.f32 %v3601_v32, %v4974_v48  ;;  %v1299_v43 = vsub.f32 2.0, %v1291_v30  ;;  %3612 = vrcp.f32 %v1043_v56  ;;  %v5071_v44 = vsub.f32 %v4861_v2, %v4994_v59 }
 0x184   : > { %v3605_v45 = vpop.eup %3604  ;;  %v1294_v50 = vmul.f32 %v3603_v38, %v4977_v49  ;;  %v1300_v25 = vsub.f32 2.0, %v1292_v35  ;;  %3614 = vrcp.f32 %v1044_v21  ;;  %v5076_v52 = vsub.f32 %v4864_v3, %v4996_v60 }
 0x185   : > { %v3607_v55 = vpop.eup %3606  ;;  %v1295_v61 = vmul.f32 %v3605_v45, %v4982_v53  ;;  %v1301_v0 = vsub.f32 2.0, %v1293_v39  ;;  %3616 = vrcp.f32 %v1045_v22  ;;  %v5081_v56 = vsub.f32 %v4942_v26, %v4999_v62 }
 0x186   : > { %v1296_v30 = vmul.f32 %v3607_v55, %v4985_v54  ;;  %v1302_v17 = vsub.f32 2.0, %v1294_v50  ;;  %3618 = vrcp.f32 %v1046_v23  ;;  %v5086_v21 = vsub.f32 %v4945_v27, %v5001_v63 }
 0x187   : > { %v1303_v35 = vsub.f32 2.0, %v1295_v61  ;;  %3620 = vrcp.f32 %v1047_v31  ;;  %v5094_v22 = vsub.f32 %v4951_v33, %v5006_v19  ;;  %v5098_v7 = vsub.f32 %v4954_v34, %v5008_v20 }
 0x188   : > { %v1304_v39 = vsub.f32 2.0, %v1296_v30  ;;  %v1177_v23 = vand.u32 2147483647, %v5066_v37  ;;  %v1178_v50 = vand.u32 2147483647, %v5071_v44  ;;  %v5105_v63 = vmul.f32 %v3593_v40, %v1297_v24 }
 0x189   : > { %v1179_v61 = vand.u32 2147483647, %v5076_v52  ;;  %v1180_v31 = vand.u32 2147483647, %v5081_v56  ;;  %v1181_v18 = vand.u32 2147483647, %v5086_v21  ;;  %v5110_v20 = vmul.f32 %v3595_v51, %v1298_v36 }
 0x18a   : > { %v1182_v19 = vand.u32 2147483647, %v5090_v15  ;;  %v1183_v30 = vand.u32 2147483647, %v5094_v22  ;;  %v1184_v62 = vand.u32 2147483647, %v5098_v7  ;;  %v5114_v59 = vmul.f32 %v3597_v57, %v1299_v43 }
 0x18b   : > { %v5112_v60 = vpop.eup %3608  ;;  %v5116_v3 = vmul.f32 %v3599_v29, %v1300_v25  ;;  %v5118_v2 = vmul.f32 %v3601_v32, %v1301_v0  ;;  %v5120_v1 = vmul.f32 %v3603_v38, %v1302_v17  ;;  %v5124_v24 = vmul.f32 %v3605_v45, %v1303_v35 }
 0x18c   : > { %v5122_v40 = vpop.eup %3610  ;;  %v5126_v54 = vmul.f32 %v3607_v55, %v1304_v39  ;;  %v1313_v53 = vmul.f32 %v5105_v63, %v1177_v23  ;;  %v1314_v51 = vmul.f32 %v5110_v20, %v1178_v50  ;;  %v1315_v57 = vmul.f32 %v5114_v59, %v1179_v61 }
 0x18d   : > { %v5130_v36 = vpop.eup %3612  ;;  %v1316_v29 = vmul.f32 %v5116_v3, %v1180_v31  ;;  %v1317_v0 = vmul.f32 %v5118_v2, %v1181_v18  ;;  %v1318_v17 = vmul.f32 %v5120_v1, %v1182_v19  ;;  %v1319_v38 = vmul.f32 %v5124_v24, %v1183_v30 }
 0x18e   : > { %7768 = vst [vmem:[#allocation74_spill] sm:$0xff] %v5130_v36  ;;  %v5136_v32 = vpop.eup %3614  ;;  %v1320_v43 = vmul.f32 %v5126_v54, %v1184_v62  ;;  %v1321_v45 = vsel %vm7553_vm0, %v1313_v53, 0.0  ;;  %v1322_v25 = vsel %vm7552_vm1, %v1314_v51, 0.0  ;;  %v1323_v35 = vsel %vm7551_vm2, %v1315_v57, 0.0 }
 0x18f   : > { %7769 = vst [vmem:[#allocation75_spill] sm:$0xff] %v5136_v32  ;;  %v5144_v55 = vpop.eup %3616  ;;  %v1324_v39 = vsel %vm7550_vm3, %v1316_v29, 0.0  ;;  %v1325_v49 = vsel %vm7549_vm4, %v1317_v0, 0.0  ;;  %v1326_v32 = vsel %vm7548_vm5, %v1318_v17, 0.0  ;;  %v1327_v53 = vsel %vm7547_vm6, %v1319_v38, 0.0 }
 0x190   : > { %7770 = vst [vmem:[#allocation76_spill] sm:$0xff] %v5144_v55  ;;  %v5154_v48 = vpop.eup %3618  ;;  %v1328_v51 = vsel %vm7546_vm7, %v1320_v43, 0.0  ;;  %v1329_v55 = vadd.f32 %v1322_v25, %v1321_v45  ;;  %vm1008_vm15 = vcmp.gt.f32.partialorder %v4992_v58, 0.0  ;;  %v7773_v29 = vmov 0.0  }
 0x191   : > { %7771 = vst [vmem:[#allocation77_spill] sm:$0xff] %v5154_v48  ;;  %v5161_v57 = vpop.eup %3620  ;;  %v3269_v36 = vsel %vm1008_vm15, 1.0, %v7773_v29  ;;  %v1185_v0 = vsel %vm7553_vm0, %v1177_v23, 0.0  ;;  %v1186_v17 = vsel %vm7552_vm1, %v1178_v50, 0.0  ;;  %v1187_v48 = vsel %vm7551_vm2, %v1179_v61, 0.0 }
 0x192   : > { %7772 = vst [vmem:[#allocation78_spill] sm:$0xff] %v5161_v57  ;;  %v1330_v38 = vadd.f32 %v1329_v55, %v1323_v35  ;;  %v1032_v47 = vsub.f32 1.0, %v3269_v36  ;;  %v1188_v43 = vsel %vm7550_vm3, %v1180_v31, 0.0  ;;  %v1189_v45 = vsel %vm7549_vm4, %v1181_v18, 0.0 }
 0x193   : > { %v1190_v25 = vsel %vm7548_vm5, %v1182_v19, 0.0  ;;  %v1191_v23 = vsel %vm7547_vm6, %v1183_v30, 0.0  ;;  %v1192_v50 = vsel %vm7546_vm7, %v1184_v62, 0.0  ;;  %vm1193_vm8 = vcmp.gt.f32.partialorder %v1185_v0, 3.0 }
 0x194   : > { %v1331_v57 = vadd.f32 %v1330_v38, %v1324_v39  ;;  %v1040_v61 = vadd.f32 %v1032_v47, %v4992_v58  ;;  %vm1194_vm9 = vcmp.gt.f32.partialorder %v1186_v17, 3.0  ;;  %vm1195_vm10 = vcmp.gt.f32.partialorder %v1187_v48, 3.0 }
 0x195   : > { %vm1196_vm11 = vcmp.gt.f32.partialorder %v1188_v43, 3.0  ;;  %vm1197_vm12 = vcmp.gt.f32.partialorder %v1189_v45, 3.0  ;;  %v1204_v19 = vmul.f32 0.05, %v4942_v26  ;;  %v1205_v31 = vmul.f32 0.05, %v4945_v27 }
 0x196   : > { %v1332_v18 = vadd.f32 %v1331_v57, %v1325_v49  ;;  %3622 = vrcp.f32 %v1040_v61  ;;  %v1206_v30 = vmul.f32 0.05, %v4948_v28  ;;  %v1207_v62 = vmul.f32 0.05, %v4951_v33 }
 0x197   : > { %vm1209_vm7 = vcmp.gt.f32.partialorder %v1185_v0, %v4870_v5  ;;  %v1208_v36 = vmul.f32 0.05, %v4954_v34  ;;  %vm1210_vm6 = vcmp.gt.f32.partialorder %v1186_v17, %v4873_v6  ;;  %vm1211_vm5 = vcmp.gt.f32.partialorder %v1187_v48, %v4889_v11 }
 0x198   : > { %v1333_v47 = vadd.f32 %v1332_v18, %v1326_v32  ;;  %vm5190_vm4 = vmand %vm1193_vm8, %vm1209_vm7  ;;  %vm1212_vm3 = vcmp.gt.f32.partialorder %v1188_v43, %v1204_v19  ;;  %vm1213_vm2 = vcmp.gt.f32.partialorder %v1189_v45, %v1205_v31  ;;  %vm1214_vm1 = vcmp.gt.f32.partialorder %v1190_v25, %v1206_v30 }
 0x199   : > { %vm1215_vm15 = vcmp.gt.f32.partialorder %v1191_v23, %v1207_v62  ;;  %vm5195_vm0 = vmand %vm1194_vm9, %vm1210_vm6  ;;  %vm1216_vm14 = vcmp.gt.f32.partialorder %v1192_v50, %v1208_v36  ;;  %v1345_v11 = vmul.f32 %v5066_v37, %v5066_v37  ;;  %v1346_v32 = vmul.f32 %v5071_v44, %v5071_v44 }
 0x19a   : > { %v1334_v5 = vadd.f32 %v1333_v47, %v1327_v53  ;;  %vm5200_vm13 = vmand %vm1195_vm10, %vm1211_vm5  ;;  %v1347_v39 = vmul.f32 %v5076_v52, %v5076_v52  ;;  %v1348_v48 = vmul.f32 %v5081_v56, %v5081_v56  ;;  %v1349_v53 = vmul.f32 %v5086_v21, %v5086_v21 }
 0x19b   : > { %vm5209_vm7 = vmand %vm1196_vm11, %vm1212_vm3  ;;  %v1350_v37 = vmul.f32 %v5090_v15, %v5090_v15  ;;  %v1351_v0 = vmul.f32 %v5094_v22, %v5094_v22  ;;  %v1352_v52 = vmul.f32 %v5098_v7, %v5098_v7  ;;  %v1353_v56 = vmul.f32 %v1345_v11, %v5105_v63 }
 0x19c   : > { %v1335_v57 = vadd.f32 %v1334_v5, %v1328_v51  ;;  %vm5223_vm5 = vmand %vm1197_vm12, %vm1213_vm2  ;;  %vm7784_vm3 = vcmp.gt.f32.partialorder %v1190_v25, 3.0  ;;  %v1354_v15 = vmul.f32 %v1346_v32, %v5110_v20  ;;  %v1355_v51 = vmul.f32 %v1347_v39, %v5114_v59 }
 0x19d   : > { %vm5234_vm6 = vmand %vm7784_vm3, %vm1214_vm1  ;;  %v1356_v17 = vmul.f32 %v1348_v48, %v5116_v3  ;;  %v1357_v38 = vmul.f32 %v1349_v53, %v5118_v2  ;;  %vm7787_vm2 = vcmp.gt.f32.partialorder %v1191_v23, 3.0  ;;  %v1358_v22 = vmul.f32 %v1350_v37, %v5120_v1 }
 0x19e   : > { %1336 = vadd.xlane.f32.xlu1 %v1335_v57  ;;  %vm5244_vm8 = vmand %vm7787_vm2, %vm1215_vm15  ;;  %v1359_v43 = vmul.f32 %v1351_v0, %v5124_v24  ;;  %v1360_v45 = vmul.f32 %v1352_v52, %v5126_v54  ;;  %vm7790_vm1 = vcmp.eq.f32.partialorder %v4867_v4, 1.0  ;;  %vm7791_vm9 = vcmp.gt.f32.partialorder %v1192_v50, 3.0 }
 0x19f   : > { %v1361_v25 = vsel %vm7790_vm1, %v1353_v56, 0.0  ;;  %vm5255_vm10 = vmand %vm7791_vm9, %vm1216_vm14  ;;  %vm7794_vm11 = vcmp.eq.f32.partialorder %v4879_v8, 1.0  ;;  %vm7795_vm12 = vcmp.eq.f32.partialorder %v4882_v9, 1.0  ;;  %vm7796_vm15 = vcmp.eq.f32.partialorder %v4885_v10, 1.0 }
 0x1a0   : > { %v1362_v23 = vsel %vm7794_vm11, %v1354_v15, 0.0  ;;  %v1363_v18 = vsel %vm7795_vm12, %v1355_v51, 0.0  ;;  %v1364_v19 = vsel %vm7796_vm15, %v1356_v17, 0.0  ;;  %vm7797_vm3 = vcmp.eq.f32.partialorder %v4892_v12, 1.0  ;;  %v5267_v30 = vpop.eup %3622  ;;  %vm7798_vm2 = vmmov %vm7790_vm1 }
 0x1a1   : > { %v1365_v31 = vsel %vm7797_vm3, %v1357_v38, 0.0  ;;  %vm5273_vm14 = vmand %vm5190_vm4, %vm7798_vm2  ;;  %v7799_v50 = vmov 0  ;;  %vm7802_vm1 = vcmp.eq.f32.partialorder %v4895_v13, 1.0  ;;  %vm7803_vm9 = vcmp.eq.f32.partialorder %v4898_v14, 1.0 }
 0x1a2   : > { %v7800_v50 = vsel %vm5273_vm14, 4294967295, %v7799_v50  ;;  %v1366_v62 = vsel %vm7802_vm1, %v1358_v22, 0.0  ;;  %v1367_v47 = vsel %vm7803_vm9, %v1359_v43, 0.0  ;;  %vm7804_vm11 = vcmp.eq.f32.partialorder %v4907_v16, 1.0  ;;  %vm7809_vm4 = vmmov %vm7798_vm2 }
 0x1a3   : > { %7801 = vst [vmem:[#allocation79_spill] sm:$0xff] %v7800_v50  ;;  %v1368_v36 = vsel %vm7804_vm11, %v1360_v45, 0.0  ;;  %v1369_v5 = vadd.f32 %v1362_v23, %v1361_v25  ;;  %vm7805_vm12 = vcmp.eq.f32.partialorder %v4879_v8, 1.0  ;;  %v7806_v49 = vmov 0 }
 0x1a4   : > { %vm5287_vm15 = vmand %vm5195_vm0, %vm7805_vm12  ;;  %v3285_v57 = vsel %vm5273_vm14, 1.0, %v7773_v29  ;;  %v1385_v56 = vsel %vm7809_vm4, %v1345_v11, 0.0  ;;  %vm7811_vm2 = vcmp.eq.f32.partialorder %v4882_v9, 1.0  ;;  %v7813_v55 = vmov 0 }
 0x1a5   : > { %v7807_v49 = vsel %vm5287_vm15, 4294967295, %v7806_v49  ;;  %vm7810_vm3 = vmmov %vm7805_vm12  ;;  %v1387_v51 = vsel %vm7811_vm2, %v1347_v39, 0.0  ;;  %v3286_v17 = vsel %vm5287_vm15, 1.0, %v7773_v29  ;;  %v1370_v38 = vadd.f32 %v1369_v5, %v1363_v18 }
 0x1a6   : > { %7808 = vst [vmem:[#allocation80_spill] sm:$0xff] %v7807_v49  ;;  %v1386_v15 = vsel %vm7810_vm3, %v1346_v32, 0.0  ;;  %vm7812_vm1 = vmmov %vm7811_vm2  ;;  %vm7816_vm9 = vcmp.eq.f32.partialorder %v4885_v10, 1.0  ;;  %vm7817_vm11 = vcmp.eq.f32.partialorder %v4892_v12, 1.0  ;;  %v7819_v6 = vmov 0 }
 0x1a7   : > { %vm5304_vm0 = vmand %vm5200_vm13, %vm7812_vm1  ;;  %v1388_v11 = vsel %vm7816_vm9, %v1348_v48, 0.0  ;;  %v1389_v32 = vsel %vm7817_vm11, %v1349_v53, 0.0  ;;  %v1249_v22 = vadd.f32 %v3286_v17, %v3285_v57  ;;  %vm7822_vm13 = vcmp.eq.f32.partialorder %v4895_v13, 1.0  ;;  %v7842_v17 = vld [vmem:[#allocation74_spill] sm:$0xff] }
 0x1a8   : > { %v7814_v55 = vsel %vm5304_vm0, 4294967295, %v7813_v55  ;;  %vm7818_vm12 = vmmov %vm7816_vm9  ;;  %v3287_v39 = vsel %vm5304_vm0, 1.0, %v7773_v29  ;;  %v1390_v43 = vsel %vm7822_vm13, %v1350_v37, 0.0  ;;  %vm7823_vm3 = vcmp.eq.f32.partialorder %v4898_v14, 1.0 }
 0x1a9   : > { %7815 = vst [vmem:[#allocation81_spill] sm:$0xff] %v7814_v55  ;;  %vm5319_vm4 = vmand %vm5209_vm7, %vm7818_vm12  ;;  %v1391_v48 = vsel %vm7823_vm3, %v1351_v0, 0.0  ;;  %v7825_v35 = vmov 0  ;;  %v1371_v45 = vadd.f32 %v1370_v38, %v1364_v19  ;;  %vm7828_vm7 = vcmp.eq.f32.partialorder %v4907_v16, 1.0  ;;  %v7844_v38 = vld [vmem:[#allocation75_spill] sm:$0xff] }
 0x1aa   : > { %v7820_v6 = vsel %vm5319_vm4, 4294967295, %v7819_v6  ;;  %vm7824_vm2 = vmmov %vm7817_vm11  ;;  %v3288_v53 = vsel %vm5319_vm4, 1.0, %v7773_v29  ;;  %v1392_v25 = vsel %vm7828_vm7, %v1352_v52, 0.0  ;;  %v1393_v37 = vadd.f32 %v1386_v15, %v1385_v56  ;;  %v7841_v15 = vld [vmem:[#allocation62_spill] sm:$0xff] }
 0x1ab   : > { %7821 = vst [vmem:[#allocation82_spill] sm:$0xff] %v7820_v6  ;;  %vm5334_vm1 = vmand %vm5223_vm5, %vm7824_vm2  ;;  %v7830_v0 = vmov 0  ;;  %v1250_v23 = vadd.f32 %v3287_v39, %v1249_v22  ;;  %v1409_v18 = vmul.f32 %v5267_v30, %v4959_v41  ;;  %v1410_v52 = vmul.f32 %v5112_v60, %v4962_v42  ;;  %v7847_v6 = vld [vmem:[#allocation65_spill] sm:$0xff] }
 0x1ac   : > { %v7826_v35 = vsel %vm5334_vm1, 4294967295, %v7825_v35  ;;  %vm7829_vm9 = vmmov %vm7822_vm13  ;;  %v3289_v44 = vsel %vm5334_vm1, 1.0, %v7773_v29  ;;  %v7834_v21 = vmov 0  ;;  %v1372_v5 = vadd.f32 %v1371_v45, %v1365_v31  ;;  %v7845_v45 = vld [vmem:[#allocation64_spill] sm:$0xff] }
 0x1ad   : > { %7827 = vst [vmem:[#allocation83_spill] sm:$0xff] %v7826_v35  ;;  %vm5347_vm11 = vmand %vm5234_vm6, %vm7829_vm9  ;;  %v1394_v57 = vadd.f32 %v1393_v37, %v1387_v51  ;;  %v1411_v41 = vmul.f32 %v5122_v40, %v4968_v46  ;;  %v7838_v42 = vmov 0  ;;  %v1251_v56 = vadd.f32 %v3288_v53, %v1250_v23  ;;  %v7843_v51 = vld [vmem:[#allocation63_spill] sm:$0xff]  ;;  %v7846_v37 = vld [vmem:[#allocation76_spill] sm:$0xff] }
 0x1ae   : > { %v7831_v0 = vsel %vm5347_vm11, 4294967295, %v7830_v0  ;;  %vm7833_vm5 = vmmov %vm7823_vm3  ;;  %v3290_v19 = vsel %vm5347_vm11, 1.0, %v7773_v29  ;;  %v1412_v31 = vmul.f32 %v7842_v17, %v7841_v15  ;;  %v1413_v39 = vmul.f32 %v7844_v38, %v7843_v51  ;;  %v7849_v53 = vld [vmem:[#allocation66_spill] sm:$0xff]  ;;  %v7851_v51 = vld [vmem:[#allocation49_spill] sm:$0xff] }
 0x1af   : > { %7832 = vst [vmem:[#allocation84_spill] sm:$0xff] %v7831_v0  ;;  %vm5362_vm12 = vmand %vm5244_vm8, %vm7833_vm5  ;;  %v1373_v61 = vadd.f32 %v1372_v5, %v1366_v62  ;;  %v1395_v22 = vadd.f32 %v1394_v57, %v1388_v11  ;;  %v1414_v0 = vmul.f32 %v7846_v37, %v7845_v45  ;;  %v1252_v35 = vadd.f32 %v3289_v44, %v1251_v56  ;;  %v7850_v23 = vld [vmem:[#allocation78_spill] sm:$0xff]  ;;  %v7853_v5 = vld [vmem:[#allocation51_spill] sm:$0xff] }
 0x1b0   : > { %v7835_v21 = vsel %vm5362_vm12, 4294967295, %v7834_v21  ;;  %vm7837_vm6 = vmmov %vm7828_vm7  ;;  %v3291_v7 = vsel %vm5362_vm12, 1.0, %v7773_v29  ;;  %v1416_v49 = vmul.f32 %v7850_v23, %v7849_v53  ;;  %3624 = vlog2.f32 %v1409_v18  ;;  %v7852_v62 = vld [vmem:[#allocation50_spill] sm:$0xff]  ;;  %v7859_v56 = vld [vmem:[#allocation72_spill] sm:$0xff] }
 0x1b1   : > { %7836 = vst [vmem:[#allocation85_spill] sm:$0xff] %v7835_v21  ;;  %vm5375_vm13 = vmand %vm5255_vm10, %vm7837_vm6  ;;  %v7848_v21 = vld [vmem:[#allocation77_spill] sm:$0xff]  ;;  %v1374_v15 = vadd.f32 %v1373_v61, %v1367_v47  ;;  %v1396_v50 = vadd.f32 %v1395_v22, %v1389_v32  ;;  %3626 = vlog2.f32 %v1410_v52  ;;  %v1253_v16 = vadd.f32 %v3290_v19, %v1252_v35 }
 0x1b2   : > { %v7839_v42 = vsel %vm5375_vm13, 4294967295, %v7838_v42  ;;  %v3292_v46 = vsel %vm5375_vm13, 1.0, %v7773_v29  ;;  %v1415_v55 = vmul.f32 %v7848_v21, %v7847_v6  ;;  %3628 = vlog2.f32 %v1411_v41 }
 0x1b3   : > { %7840 = vst [vmem:[#allocation86_spill] sm:$0xff] %v7839_v42  ;;  %v1465_v42 = vmul.f32 %v5267_v30, %v7851_v51  ;;  %v1466_v11 = vmul.f32 %v5112_v60, %v7852_v62  ;;  %v1467_v44 = vmul.f32 %v5122_v40, %v7853_v5  ;;  %v1375_v57 = vadd.f32 %v1374_v15, %v1368_v36 }
 0x1b4   : > { %v1397_v6 = vadd.f32 %v1396_v50, %v1390_v43  ;;  %3630 = vlog2.f32 %v1412_v31  ;;  %v1468_v18 = vmul.f32 %v7842_v17, %v4942_v26  ;;  %v1254_v47 = vadd.f32 %v3291_v7, %v1253_v16  ;;  %v7854_v26 = vld [vmem:[#allocation67_spill] sm:$0xff] }
 0x1b5   : > { %3632 = vlog2.f32 %v1413_v39  ;;  %v1469_v32 = vmul.f32 %v7844_v38, %v4945_v27  ;;  %v1470_v35 = vmul.f32 %v7846_v37, %v4948_v28  ;;  %1376 = vadd.xlane.f32.xlu1 %v1375_v57  ;;  %v1471_v19 = vmul.f32 %v7848_v21, %v4951_v33  ;;  %v7855_v28 = vld [vmem:[#allocation68_spill] sm:$0xff]  ;;  %v7857_v33 = vld [vmem:[#allocation70_spill] sm:$0xff]  ;;  %v7858_v7 = vld [vmem:[#allocation71_spill] sm:$0xff] }
 0x1b6   : > { %v1398_v52 = vadd.f32 %v1397_v6, %v1391_v48  ;;  %3634 = vlog2.f32 %v1414_v0  ;;  %v1472_v50 = vmul.f32 %v7850_v23, %v4954_v34  ;;  %v1255_v36 = vadd.f32 %v3292_v46, %v1254_v47  ;;  %v7856_v0 = vld [vmem:[#allocation69_spill] sm:$0xff] }
 0x1b7   : > { %3636 = vlog2.f32 %v1415_v55  ;;  %v1473_v16 = vmul.f32 %v5105_v63, %v4992_v58  ;;  %v1474_v27 = vmul.f32 %v5110_v20, %v7854_v26  ;;  %v1475_v48 = vmul.f32 %v5114_v59, %v7855_v28  ;;  %v7860_v63 = vld [vmem:[#allocation73_spill] sm:$0xff] }
 0x1b8   : > { %v1399_v43 = vadd.f32 %v1398_v52, %v1392_v25  ;;  %3638 = vlog2.f32 %v1416_v49  ;;  %v1476_v41 = vmul.f32 %v5116_v3, %v7856_v0  ;;  %1256 = vadd.xlane.f32.xlu0 %v1255_v36  ;;  %v1477_v34 = vmul.f32 %v5118_v2, %v7857_v33 }
 0x1b9   : > { %v1478_v55 = vmul.f32 %v5120_v1, %v7858_v7  ;;  %v1479_v58 = vmul.f32 %v5124_v24, %v7859_v56  ;;  %v1480_v20 = vmul.f32 %v5126_v54, %v7860_v63  ;;  %v5427_v49 = vmax.f32 %v1465_v42, %v1473_v16 }
 0x1ba   : > { %v5429_v25 = vmax.f32 %v1466_v11, %v1474_v27  ;;  %v5431_v59 = vmax.f32 %v1467_v44, %v1475_v48  ;;  %v5433_v3 = vmax.f32 %v1468_v18, %v1476_v41  ;;  %v3625_v31 = vpop.eup %3624  ;;  %v5435_v39 = vmax.f32 %v1469_v32, %v1477_v34 }
 0x1bb   : > { %v5437_v2 = vmax.f32 %v1470_v35, %v1478_v55  ;;  %v5439_v1 = vmax.f32 %v1471_v19, %v1479_v58  ;;  %v5441_v46 = vmax.f32 %v1472_v50, %v1480_v20  ;;  %v3627_v24 = vpop.eup %3626  ;;  %v1418_v61 = vmul.f32 0.6931472, %v3625_v31  ;;  %v7876_v55 = vld [vmem:[#allocation61_spill] sm:$0xff] }
 0x1bc   : > { %vm1489_vm8 = vcmp.lt.f32.partialorder %v5427_v49, 1.25  ;;  %vm1490_vm10 = vcmp.lt.f32.partialorder %v5429_v25, 1.25  ;;  %v3629_v54 = vpop.eup %3628  ;;  %1400 = vadd.xlane.f32.xlu0 %v1399_v43  ;;  %v1420_v42 = vmul.f32 0.6931472, %v3627_v24  ;;  %vm7861_vm5 = vcmp.eq.f32.partialorder %v4867_v4, 1.0 }
 0x1bd   : > { %vm1497_vm6 = vmand %vm7861_vm5, %vm1489_vm8  ;;  %v1422_v45 = vmul.f32 0.6931472, %v3629_v54  ;;  %v1433_v53 = vmul.f32 %v1418_v61, %v1418_v61  ;;  %vm1495_vm13 = vcmp.lt.f32.partialorder %v5439_v1, 1.25  ;;  %vm1496_vm12 = vcmp.lt.f32.partialorder %v5441_v46, 1.25 }
 0x1be   : > { %v3631_v22 = vpop.eup %3630  ;;  %vm7862_vm3 = vcmp.eq.f32.partialorder %v4879_v8, 1.0  ;;  %v1434_v62 = vmul.f32 %v1420_v42, %v1420_v42  ;;  %vm7863_vm7 = vcmp.lt.f32.partialorder %v5431_v59, 1.25  ;;  %vm7864_vm9 = vcmp.eq.f32.partialorder %v4882_v9, 1.0  ;;  %vm7865_vm8 = vmmov %vm7861_vm5 }
 0x1bf   : > { %vm1498_vm11 = vmand %vm7862_vm3, %vm1490_vm10  ;;  %v3633_v15 = vpop.eup %3632  ;;  %v1424_v51 = vmul.f32 0.6931472, %v3631_v22  ;;  %v3293_v11 = vsel %vm1497_vm6, 1.0, %v7773_v29  ;;  %v1435_v6 = vmul.f32 %v1422_v45, %v1422_v45  ;;  %v1441_v18 = vsel %vm7865_vm8, %v1433_v53, 0.0 }
 0x1c0   : > { %vm1499_vm2 = vmand %vm7864_vm9, %vm7863_vm7  ;;  %v3294_v5 = vsel %vm1498_vm11, 1.0, %v7773_v29  ;;  %v3635_v44 = vpop.eup %3634  ;;  %v1426_v57 = vmul.f32 0.6931472, %v3633_v15  ;;  %vm7866_vm10 = vcmp.lt.f32.partialorder %v5433_v3, 1.25  ;;  %vm7867_vm3 = vcmp.eq.f32.partialorder %v4885_v10, 1.0 }
 0x1c1   : > { %vm1500_vm5 = vmand %vm7867_vm3, %vm7866_vm10  ;;  %v3295_v47 = vsel %vm1499_vm2, 1.0, %v7773_v29  ;;  %v3637_v32 = vpop.eup %3636  ;;  %v1428_v35 = vmul.f32 0.6931472, %v3635_v44  ;;  %v1436_v52 = vmul.f32 %v1424_v51, %v1424_v51  ;;  %vm7868_vm7 = vcmp.eq.f32.partialorder %v4879_v8, 1.0 }
 0x1c2   : > { %v1442_v19 = vsel %vm7868_vm7, %v1434_v62, 0.0  ;;  %vm7869_vm11 = vcmp.lt.f32.partialorder %v5435_v39, 1.25  ;;  %vm7870_vm9 = vcmp.eq.f32.partialorder %v4892_v12, 1.0  ;;  %v3296_v50 = vsel %vm1500_vm5, 1.0, %v7773_v29  ;;  %v3639_v36 = vpop.eup %3638 }
 0x1c3   : > { %vm1501_vm6 = vmand %vm7870_vm9, %vm7869_vm11  ;;  %v1430_v16 = vmul.f32 0.6931472, %v3637_v32  ;;  %v1437_v26 = vmul.f32 %v1426_v57, %v1426_v57  ;;  %vm7871_vm8 = vcmp.eq.f32.partialorder %v4882_v9, 1.0  ;;  %v1449_v43 = vadd.f32 %v1442_v19, %v1441_v18 }
 0x1c4   : > { %v1443_v27 = vsel %vm7871_vm8, %v1435_v6, 0.0  ;;  %vm7872_vm2 = vcmp.lt.f32.partialorder %v5437_v2, 1.25  ;;  %vm7873_vm10 = vcmp.eq.f32.partialorder %v4895_v13, 1.0  ;;  %v1432_v28 = vmul.f32 0.6931472, %v3639_v36 }
 0x1c5   : > { %vm1502_vm3 = vmand %vm7873_vm10, %vm7872_vm2  ;;  %v1438_v48 = vmul.f32 %v1428_v35, %v1428_v35  ;;  %vm7874_vm7 = vcmp.eq.f32.partialorder %v4885_v10, 1.0  ;;  %vm7875_vm5 = vcmp.eq.f32.partialorder %v4898_v14, 1.0  ;;  %v3297_v41 = vsel %vm1501_vm6, 1.0, %v7773_v29 }
 0x1c6   : > { %v1444_v0 = vsel %vm7874_vm7, %v1436_v52, 0.0  ;;  %vm1503_vm11 = vmand %vm7875_vm5, %vm1495_vm13  ;;  %v1439_v33 = vmul.f32 %v1430_v16, %v1430_v16  ;;  %v1445_v34 = vsel %vm7870_vm9, %v1437_v26, 0.0  ;;  %v1450_v7 = vadd.f32 %v1449_v43, %v1443_v27  ;;  %v7892_v16 = vld [vmem:[#allocation53_spill] sm:$0xff] }
 0x1c7   : > { %vm7877_vm8 = vcmp.eq.f32.partialorder %v7876_v55, 1.0  ;;  %v3298_v56 = vsel %vm1502_vm3, 1.0, %v7773_v29  ;;  %v1440_v58 = vmul.f32 %v1432_v28, %v1432_v28  ;;  %v1446_v63 = vsel %vm7873_vm10, %v1438_v48, 0.0  ;;  %vm7879_vm13 = vmmov %vm7875_vm5 }
 0x1c8   : > { %vm1504_vm2 = vmand %vm7877_vm8, %vm1496_vm12  ;;  %v3299_v20 = vsel %vm1503_vm11, 1.0, %v7773_v29  ;;  %v1447_v24 = vsel %vm7879_vm13, %v1439_v33, 0.0  ;;  %v1451_v61 = vadd.f32 %v1450_v7, %v1444_v0  ;;  %v1521_v54 = vadd.f32 %v3294_v5, %v3293_v11 }
 0x1c9   : > { %v5499_v31 = vsel %vm1504_vm2, 1.0, %v7773_v29  ;;  %vm1537_vm6 = vcmp.lt.f32.partialorder %v5427_v49, 1.5625  ;;  %vm7880_vm12 = vmmov %vm7877_vm8  ;;  %vm1538_vm3 = vcmp.lt.f32.partialorder %v5429_v25, 1.5625  ;;  %vm1539_vm7 = vcmp.lt.f32.partialorder %v5431_v59, 1.5625 }
 0x1ca   : > { %v1448_v42 = vsel %vm7880_vm12, %v1440_v58, 0.0  ;;  %vm7881_vm11 = vcmp.eq.f32.partialorder %v4867_v4, 1.0  ;;  %v1452_v22 = vadd.f32 %v1451_v61, %v1445_v34  ;;  %v1522_v45 = vadd.f32 %v3295_v47, %v1521_v54 }
 0x1cb   : > { %vm1545_vm9 = vmand %vm7881_vm11, %vm1537_vm6  ;;  %vm1541_vm8 = vcmp.lt.f32.partialorder %v5435_v39, 1.5625  ;;  %vm7882_vm10 = vcmp.eq.f32.partialorder %v4879_v8, 1.0  ;;  %vm1543_vm12 = vcmp.lt.f32.partialorder %v5439_v1, 1.5625  ;;  %vm1544_vm1 = vcmp.lt.f32.partialorder %v5441_v46, 1.5625 }
 0x1cc   : > { %vm1546_vm13 = vmand %vm7882_vm10, %vm1538_vm3  ;;  %vm7883_vm5 = vcmp.eq.f32.partialorder %v4882_v9, 1.0  ;;  %v3301_v53 = vsel %vm1545_vm9, 1.0, %v7773_v29  ;;  %v1453_v51 = vadd.f32 %v1452_v22, %v1446_v63  ;;  %v1523_v62 = vadd.f32 %v3296_v50, %v1522_v45 }
 0x1cd   : > { %vm1547_vm4 = vmand %vm7883_vm5, %vm1539_vm7  ;;  %v3302_v15 = vsel %vm1546_vm13, 1.0, %v7773_v29  ;;  %vm7884_vm6 = vcmp.lt.f32.partialorder %v5433_v3, 1.5625  ;;  %vm7885_vm11 = vcmp.eq.f32.partialorder %v4885_v10, 1.0  ;;  %vm7886_vm3 = vcmp.eq.f32.partialorder %v4892_v12, 1.0 }
 0x1ce   : > { %vm1548_vm2 = vmand %vm7885_vm11, %vm7884_vm6  ;;  %v3303_v11 = vsel %vm1547_vm4, 1.0, %v7773_v29  ;;  %v1569_v5 = vadd.f32 %v3302_v15, %v3301_v53  ;;  %vm1585_vm7 = vcmp.lt.f32.partialorder %v5427_v49, 1.953125  ;;  %vm1586_vm5 = vcmp.lt.f32.partialorder %v5429_v25, 1.953125 }
 0x1cf   : > { %vm1549_vm10 = vmand %vm7886_vm3, %vm1541_vm8  ;;  %v3304_v44 = vsel %vm1548_vm2, 1.0, %v7773_v29  ;;  %v1454_v57 = vadd.f32 %v1453_v51, %v1447_v24  ;;  %v1524_v6 = vadd.f32 %v3297_v41, %v1523_v62  ;;  %vm7887_vm13 = vcmp.lt.f32.partialorder %v5437_v2, 1.5625 }
 0x1d0   : > { %vm7888_vm6 = vcmp.eq.f32.partialorder %v4895_v13, 1.0  ;;  %v3305_v18 = vsel %vm1549_vm10, 1.0, %v7773_v29  ;;  %v1570_v47 = vadd.f32 %v3303_v11, %v1569_v5  ;;  %vm7889_vm4 = vcmp.eq.f32.partialorder %v4898_v14, 1.0 }
 0x1d1   : > { %vm1550_vm11 = vmand %vm7888_vm6, %vm7887_vm13  ;;  %vm1588_vm2 = vcmp.lt.f32.partialorder %v5433_v3, 1.953125  ;;  %vm1589_vm3 = vcmp.lt.f32.partialorder %v5435_v39, 1.953125  ;;  %vm1590_vm9 = vcmp.lt.f32.partialorder %v5437_v2, 1.953125  ;;  %v1455_v35 = vadd.f32 %v1454_v57, %v1448_v42 }
 0x1d2   : > { %vm1551_vm8 = vmand %vm7889_vm4, %vm1543_vm12  ;;  %v3306_v32 = vsel %vm1550_vm11, 1.0, %v7773_v29  ;;  %v1525_v52 = vadd.f32 %v3298_v56, %v1524_v6  ;;  %vm7890_vm10 = vcmp.eq.f32.partialorder %v7876_v55, 1.0  ;;  %v1571_v50 = vadd.f32 %v3304_v44, %v1570_v47 }
 0x1d3   : > { %vm1552_vm13 = vmand %vm7890_vm10, %vm1544_vm1  ;;  %v3307_v19 = vsel %vm1551_vm8, 1.0, %v7773_v29  ;;  %vm1591_vm12 = vcmp.lt.f32.partialorder %v5439_v1, 1.953125  ;;  %vm1592_vm6 = vcmp.lt.f32.partialorder %v5441_v46, 1.953125  ;;  %vm7891_vm11 = vcmp.eq.f32.partialorder %v4867_v4, 1.0  ;;  %1456 = vadd.xlane.f32.xlu1 %v1455_v35 }
 0x1d4   : > { %v3308_v36 = vsel %vm1552_vm13, 1.0, %v7773_v29  ;;  %vm1593_vm4 = vmand %vm7891_vm11, %vm1585_vm7  ;;  %v965_v26 = vadd.s32 8, %v7892_v16  ;;  %v1526_v27 = vadd.f32 %v3299_v20, %v1525_v52  ;;  %v1572_v43 = vadd.f32 %v3305_v18, %v1571_v50 }
 0x1d5   : > { %vm7893_vm1 = vcmp.eq.f32.partialorder %v4879_v8, 1.0  ;;  %v3309_v28 = vsel %vm1593_vm4, 1.0, %v7773_v29  ;;  %v5568_v48 = vadd.s32 16, %v7892_v16  ;;  %vm7894_vm7 = vcmp.lt.f32.partialorder %v5431_v59, 1.953125 }
 0x1d6   : > { %vm1594_vm8 = vmand %vm7893_vm1, %vm1586_vm5  ;;  %vm7895_vm10 = vcmp.eq.f32.partialorder %v4882_v9, 1.0  ;;  %v5579_v25 = vadd.s32 24, %v7892_v16  ;;  %v5582_v0 = vadd.s32 32, %v7892_v16  ;;  %v5585_v41 = vadd.s32 40, %v7892_v16  ;;  %v5864_v9 = vld [vmem:[%s4851_s1 + $0x80] sm:$0xff] }
 0x1d7   : > { %vm1595_vm13 = vmand %vm7895_vm10, %vm7894_vm7  ;;  %v3310_v49 = vsel %vm1594_vm8, 1.0, %v7773_v29  ;;  %v1527_v33 = vadd.f32 %v5499_v31, %v1526_v27  ;;  %v1573_v34 = vadd.f32 %v3306_v32, %v1572_v43  ;;  %vm7896_vm5 = vcmp.eq.f32.partialorder %v4885_v10, 1.0  ;;  %7921 = vst [vmem:[#allocation72_spill] sm:$0xff] %v5864_v9 }
 0x1d8   : > { %vm1596_vm11 = vmand %vm7896_vm5, %vm1588_vm2  ;;  %v3311_v59 = vsel %vm1595_vm13, 1.0, %v7773_v29  ;;  %v1617_v7 = vadd.f32 %v3310_v49, %v3309_v28  ;;  %vm7897_vm4 = vcmp.eq.f32.partialorder %v4892_v12, 1.0  ;;  %v970_v58 = vadd.s32 48, %v7892_v16 }
 0x1d9   : > { %vm1597_vm1 = vmand %vm7897_vm4, %vm1589_vm3  ;;  %v3312_v56 = vsel %vm1596_vm11, 1.0, %v7773_v29  ;;  %v971_v63 = vadd.s32 56, %v7892_v16  ;;  %v5600_v3 = vstv %s991_s19  ;;  %1528 = vadd.xlane.f32.xlu0 %v1527_v33  ;;  %v1574_v20 = vadd.f32 %v3307_v19, %v1573_v34  ;;  %s5651_s19 = sld [smem:[#allocation8 + %s7583_s15]]  ;;  %v1663_v16 = vld [vmem:[%s4851_s1 + $0x18] sm:$0xff] }
 0x1da   : > { %7898 = vst [vmem:[#allocation62_spill] sm:$0xff] %v5600_v3  ;;  %vm7899_vm2 = vcmp.eq.f32.partialorder %v4895_v13, 1.0  ;;  %v3313_v39 = vsel %vm1597_vm1, 1.0, %v7773_v29  ;;  %v1618_v31 = vadd.f32 %v3311_v59, %v1617_v7  ;;  %v5611_v24 = vmul.f32 %v5267_v30, %v5600_v3  ;;  %s5672_s15 = sld [smem:[#allocation8 + %s7584_s29]] }
 0x1db   : > { %vm1598_vm8 = vmand %vm7899_vm2, %vm1590_vm9  ;;  %vm7900_vm3 = vcmp.eq.f32.partialorder %v4898_v14, 1.0  ;;  %v5622_v61 = vmul.f32 %v5112_v60, %v5600_v3  ;;  %v5626_v54 = vmul.f32 %v5122_v40, %v5600_v3  ;;  %v5630_v30 = vmul.f32 %v7842_v17, %v5600_v3  ;;  %s5688_s29 = sld [smem:[#allocation8 + %s7593_s24]] }
 0x1dc   : > { %vm1599_vm7 = vmand %vm7900_vm3, %vm1591_vm12  ;;  %v3314_v2 = vsel %vm1598_vm8, 1.0, %v7773_v29  ;;  %v1575_v1 = vadd.f32 %v3308_v36, %v1574_v20  ;;  %vm7901_vm9 = vcmp.eq.f32.partialorder %v7876_v55, 1.0  ;;  %v1619_v42 = vadd.f32 %v3312_v56, %v1618_v31 }
 0x1dd   : > { %vm1600_vm12 = vmand %vm7901_vm9, %vm1592_vm6  ;;  %v3315_v60 = vsel %vm1599_vm7, 1.0, %v7773_v29  ;;  %v5643_v40 = vmul.f32 %v7844_v38, %v5600_v3  ;;  %v5656_v46 = vmul.f32 %v7846_v37, %v5600_v3  ;;  %v5660_v22 = vmul.f32 %v7848_v21, %v5600_v3 }
 0x1de   : > { %v3316_v17 = vsel %vm1600_vm12, 1.0, %v7773_v29  ;;  %v5664_v38 = vmul.f32 %v7850_v23, %v5600_v3  ;;  %1576 = vadd.xlane.f32.xlu1 %v1575_v1  ;;  %v1620_v45 = vadd.f32 %v3313_v39, %v1619_v42  ;;  %v1073_v37 = vmax.f32 %v5611_v24, 0.001 }
 0x1df   : > { %v1074_v53 = vmax.f32 %v5622_v61, 0.001  ;;  %v1075_v21 = vmax.f32 %v5626_v54, 0.001  ;;  %v1076_v15 = vmax.f32 %v5630_v30, 0.001  ;;  %v5680_v62 = vcvt.s32.f32 %v965_v26 }
 0x1e0   : > { %v1077_v23 = vmax.f32 %v5643_v40, 0.001  ;;  %v1078_v51 = vmax.f32 %v5656_v46, 0.001  ;;  %v1621_v11 = vadd.f32 %v3314_v2, %v1620_v45  ;;  %v1079_v5 = vmax.f32 %v5660_v22, 0.001 }
 0x1e1   : > { %7902 = vst [vmem:[#allocation74_spill] sm:$0xff] %v5680_v62  ;;  %v1080_v44 = vmax.f32 %v5664_v38, 0.001  ;;  %v5684_v57 = vmin.f32 %v1073_v37, 80.0  ;;  %v5690_v6 = vmin.f32 %v1074_v53, 80.0  ;;  %v5692_v18 = vmin.f32 %v1075_v21, 80.0 }
 0x1e2   : > { %v5694_v47 = vmin.f32 %v1076_v15, 80.0  ;;  %v5696_v32 = vmin.f32 %v1077_v23, 80.0  ;;  %v1622_v35 = vadd.f32 %v3315_v60, %v1621_v11  ;;  %v5698_v52 = vmin.f32 %v1078_v51, 80.0 }
 0x1e3   : > { %7903 = vst [vmem:[#allocation63_spill] sm:$0xff] %v5684_v57  ;;  %7904 = vst [vmem:[#allocation75_spill] sm:$0xff] %v5690_v6  ;;  %v5700_v19 = vmin.f32 %v1079_v5, 80.0  ;;  %v5702_v50 = vmin.f32 %v1080_v44, 80.0  ;;  %v7911_v36 = vlaneseq  ;;  %v5708_v27 = vcvt.s32.f32 %v5568_v48  ;;  %v1660_v44 = vld [vmem:[%s4851_s1] sm:$0xff] }
 0x1e4   : > { %7905 = vst [vmem:[#allocation64_spill] sm:$0xff] %v5692_v18  ;;  %7906 = vst [vmem:[#allocation76_spill] sm:$0xff] %v5694_v47  ;;  %v5711_v43 = vcvt.s32.f32 %v5579_v25  ;;  %v5714_v28 = vcvt.s32.f32 %v5582_v0  ;;  %v1623_v49 = vadd.f32 %v3316_v17, %v1622_v35  ;;  %v5717_v33 = vcvt.s32.f32 %v5585_v41  ;;  %v7919_v0 = vld [vmem:[#allocation60_spill] sm:$0xff] }
 0x1e5   : > { %7907 = vst [vmem:[#allocation65_spill] sm:$0xff] %v5696_v32  ;;  %7908 = vst [vmem:[#allocation77_spill] sm:$0xff] %v5698_v52  ;;  %v5705_v26 = vand.u32 127, %v7911_v36  ;;  %v5719_v34 = vcvt.s32.f32 %v970_v58  ;;  %v5721_v59 = vcvt.s32.f32 %v971_v63  ;;  %v1697_v48 = vstv %s5634_s14  ;;  %v1661_v35 = vld [vmem:[%s4851_s1 + $0x8] sm:$0xff] }
 0x1e6   : > { %7909 = vst [vmem:[#allocation66_spill] sm:$0xff] %v5700_v19  ;;  %7910 = vst [vmem:[#allocation78_spill] sm:$0xff] %v5702_v50  ;;  %v1699_v25 = vstv %s5647_s0  ;;  %v1716_v56 = vstv %s5651_s19  ;;  %1624 = vadd.xlane.f32.xlu0 %v1623_v49  ;;  %v1741_v42 = vstv %s5668_s30  ;;  %v1743_v17 = vstv %s5672_s15  ;;  %s1645_s30 = sadd.s32 6, %s5571_s27  ;;  %s1647_s15 = sadd.s32 7, %s5571_s27 }
 0x1e7   : > { %7912 = vst [vmem:[#allocation49_spill] sm:$0xff] %v5705_v26  ;;  %7913 = vst [vmem:[#allocation50_spill] sm:$0xff] %v5708_v27  ;;  %v5724_v7 = vcvt.s32.f32 %v5705_v26  ;;  %v1700_v20 = vmul.f32 %v1699_v25, %v7919_v0  ;;  %v1701_v39 = vmul.f32 %v1699_v25, %v5680_v62  ;;  %v1702_v41 = vmul.f32 %v1699_v25, %v5708_v27  ;;  %v1662_v26 = vld [vmem:[%s4851_s1 + $0x10] sm:$0xff]  ;;  %s5784_s14 = sld [smem:[#allocation8 + %s1645_s30]] }
 0x1e8   : > { %7914 = vst [vmem:[#allocation51_spill] sm:$0xff] %v5711_v43  ;;  %7915 = vst [vmem:[#allocation67_spill] sm:$0xff] %v5714_v28  ;;  %v1703_v58 = vmul.f32 %v1699_v25, %v5711_v43  ;;  %v1704_v31 = vmul.f32 %v1699_v25, %v5714_v28  ;;  %v1705_v2 = vmul.f32 %v1699_v25, %v5717_v33  ;;  %v5741_v45 = vstv %s5688_s29  ;;  %s1649_s29 = sadd.s32 8, %s5571_s27  ;;  %s5792_s0 = sld [smem:[#allocation8 + %s1647_s15]] }
 0x1e9   : > { %7916 = vst [vmem:[#allocation68_spill] sm:$0xff] %v5717_v33  ;;  %7917 = vst [vmem:[#allocation69_spill] sm:$0xff] %v5719_v34  ;;  %v1698_v63 = vmul.f32 %v1697_v48, %v5724_v7  ;;  %v1706_v1 = vmul.f32 %v1699_v25, %v5719_v34  ;;  %v1707_v60 = vmul.f32 %v1699_v25, %v5721_v59  ;;  %s5796_s19 = sld [smem:[#allocation8 + %s1649_s29]] }
 0x1ea   : > { %7918 = vst [vmem:[#allocation70_spill] sm:$0xff] %v5721_v59  ;;  %s5848_s24 = sld [smem:[#allocation7 + %s1645_s30]] }
 0x1eb   : > { %v1708_v37 = vadd.f32 %v1700_v20, %v1698_v63  ;;  %v1709_v53 = vadd.f32 %v1701_v39, %v1698_v63  ;;  %v1710_v21 = vadd.f32 %v1702_v41, %v1698_v63  ;;  %v1711_v15 = vadd.f32 %v1703_v58, %v1698_v63  ;;  %v1664_v20 = vld [vmem:[%s4851_s1 + $0x20] sm:$0xff]  ;;  %s5962_s30 = sld [smem:[#allocation7 + %s1635_s16]]  ;;  %s7934_s16 = sadd.s32 4, %s5571_s27 }
 0x1ec   : > { %v1712_v23 = vadd.f32 %v1704_v31, %v1698_v63  ;;  %v1713_v51 = vadd.f32 %v1705_v2, %v1698_v63  ;;  %v1714_v11 = vadd.f32 %v1706_v1, %v1698_v63  ;;  %v1715_v5 = vadd.f32 %v1707_v60, %v1698_v63  ;;  %v1665_v2 = vld [vmem:[%s4851_s1 + $0x28] sm:$0xff]  ;;  %v1666_v1 = vld [vmem:[%s4851_s1 + $0x30] sm:$0xff]  ;;  %v1667_v63 = vld [vmem:[%s4851_s1 + $0x38] sm:$0xff] }
 0x1ed   : > { %v1717_v36 = vadd.f32 %v1716_v56, %v1708_v37  ;;  %v1718_v49 = vadd.f32 %v1716_v56, %v1709_v53  ;;  %v1719_v48 = vadd.f32 %v1716_v56, %v1710_v21  ;;  %v1720_v25 = vadd.f32 %v1716_v56, %v1711_v15 }
 0x1ee   : > { %v1721_v39 = vadd.f32 %v1716_v56, %v1712_v23  ;;  %v1722_v41 = vadd.f32 %v1716_v56, %v1713_v51  ;;  %v1723_v58 = vadd.f32 %v1716_v56, %v1714_v11  ;;  %v1724_v31 = vadd.f32 %v1716_v56, %v1715_v5 }
 0x1ef   : > { %v1725_v60 = vmul.f32 %v1717_v36, %v5611_v24  ;;  %v1726_v37 = vmul.f32 %v1718_v49, %v5622_v61  ;;  %v1727_v53 = vmul.f32 %v1719_v48, %v5626_v54  ;;  %v1728_v21 = vmul.f32 %v1720_v25, %v5630_v30 }
 0x1f0   : > { %v1729_v15 = vmul.f32 %v1721_v39, %v5643_v40  ;;  %v1730_v23 = vmul.f32 %v1722_v41, %v5656_v46  ;;  %v1731_v51 = vmul.f32 %v1723_v58, %v5660_v22  ;;  %v1732_v56 = vmul.f32 %v1724_v31, %v5664_v38 }
 0x1f1   : > { %v5760_v11 = vadd.f32 %v1725_v60, %v1660_v44  ;;  %v5762_v5 = vadd.f32 %v1726_v37, %v1661_v35  ;;  %v5764_v36 = vadd.f32 %v1727_v53, %v1662_v26  ;;  %v5766_v49 = vadd.f32 %v1728_v21, %v1663_v16 }
 0x1f2   : > { %v5770_v48 = vadd.f32 %v1729_v15, %v1664_v20  ;;  %v5772_v25 = vadd.f32 %v1730_v23, %v1665_v2  ;;  %v5774_v39 = vadd.f32 %v1731_v51, %v1666_v1  ;;  %v5776_v41 = vadd.f32 %v1732_v56, %v1667_v63  ;;  %v3318_v23 = vld [vmem:[%s4851_s1 + $0x40] sm:$0xff] }
 0x1f3   : > { %v1742_v44 = vmul.f32 %v1741_v42, %v5724_v7  ;;  %v1744_v35 = vmul.f32 %v1743_v17, %v7919_v0  ;;  %v1745_v26 = vmul.f32 %v1743_v17, %v5680_v62  ;;  %v1746_v16 = vmul.f32 %v1743_v17, %v5708_v27 }
 0x1f4   : > { %v1747_v20 = vmul.f32 %v1743_v17, %v5711_v43  ;;  %v1748_v58 = vmul.f32 %v1743_v17, %v5714_v28  ;;  %v1749_v31 = vmul.f32 %v1743_v17, %v5717_v33  ;;  %v1750_v2 = vmul.f32 %v1743_v17, %v5719_v34 }
 0x1f5   : > { %v1751_v42 = vmul.f32 %v1743_v17, %v5721_v59  ;;  %v1752_v1 = vadd.f32 %v1744_v35, %v1742_v44  ;;  %v1753_v63 = vadd.f32 %v1745_v26, %v1742_v44  ;;  %v1754_v60 = vadd.f32 %v1746_v16, %v1742_v44  ;;  %v3319_v17 = vld [vmem:[%s4851_s1 + $0x48] sm:$0xff]  ;;  %v3320_v35 = vld [vmem:[%s4851_s1 + $0x50] sm:$0xff]  ;;  %v3321_v26 = vld [vmem:[%s4851_s1 + $0x58] sm:$0xff] }
 0x1f6   : > { %v1755_v37 = vadd.f32 %v1747_v20, %v1742_v44  ;;  %v1756_v53 = vadd.f32 %v1748_v58, %v1742_v44  ;;  %v1757_v21 = vadd.f32 %v1749_v31, %v1742_v44  ;;  %v1758_v15 = vadd.f32 %v1750_v2, %v1742_v44  ;;  %v3322_v2 = vld [vmem:[%s4851_s1 + $0x60] sm:$0xff] }
 0x1f7   : > { %v1759_v51 = vadd.f32 %v1751_v42, %v1742_v44  ;;  %v1761_v56 = vadd.f32 %v5741_v45, %v1752_v1  ;;  %v1762_v55 = vadd.f32 %v5741_v45, %v1753_v63  ;;  %v1763_v14 = vadd.f32 %v5741_v45, %v1754_v60  ;;  %v3323_v44 = vld [vmem:[%s4851_s1 + $0x68] sm:$0xff]  ;;  %v3324_v42 = vld [vmem:[%s4851_s1 + $0x70] sm:$0xff] }
 0x1f8   : > { %v1764_v16 = vadd.f32 %v5741_v45, %v1755_v37  ;;  %v1765_v20 = vadd.f32 %v5741_v45, %v1756_v53  ;;  %v1766_v58 = vadd.f32 %v5741_v45, %v1757_v21  ;;  %v1767_v31 = vadd.f32 %v5741_v45, %v1758_v15  ;;  %v3325_v37 = vld [vmem:[%s4851_s1 + $0x78] sm:$0xff] }
 0x1f9   : > { %v1768_v1 = vadd.f32 %v5741_v45, %v1759_v51  ;;  %v1769_v63 = vmul.f32 %v1761_v56, %v5611_v24  ;;  %v1770_v60 = vmul.f32 %v1762_v55, %v5622_v61  ;;  %v1771_v13 = vmul.f32 %v1763_v14, %v5626_v54 }
 0x1fa   : > { %v1772_v53 = vmul.f32 %v1764_v16, %v5630_v30  ;;  %v1773_v21 = vmul.f32 %v1765_v20, %v5643_v40  ;;  %v1774_v15 = vmul.f32 %v1766_v58, %v5656_v46  ;;  %v1775_v12 = vmul.f32 %v1767_v31, %v5660_v22 }
 0x1fb   : > { %v1776_v45 = vmul.f32 %v1768_v1, %v5664_v38  ;;  %v5823_v51 = vadd.f32 %v3318_v23, %v1769_v63  ;;  %v5825_v55 = vadd.f32 %v3319_v17, %v1770_v60  ;;  %v5827_v56 = vadd.f32 %v3320_v35, %v1771_v13 }
 0x1fc   : > { %v5829_v14 = vadd.f32 %v3321_v26, %v1772_v53  ;;  %v5831_v10 = vadd.f32 %v3322_v2, %v1773_v21  ;;  %v5833_v16 = vadd.f32 %v3323_v44, %v1774_v15  ;;  %v5835_v20 = vadd.f32 %v3324_v42, %v1775_v12 }
 0x1fd   : > { %v5837_v58 = vadd.f32 %v3325_v37, %v1776_v45  ;;  %v1785_v31 = vstv %s5784_s14  ;;  %v1787_v1 = vstv %s5792_s0  ;;  %v1804_v23 = vstv %s5796_s19  ;;  %s5856_s14 = sld [smem:[#allocation7 + %s1647_s15]]  ;;  %s7933_s15 = sadd.s32 2, %s5571_s27 }
 0x1fe   : > { %7920 = vst [vmem:[#allocation71_spill] sm:$0xff] %v5835_v20  ;;  %v1786_v17 = vmul.f32 %v1785_v31, %v5724_v7  ;;  %v1788_v13 = vmul.f32 %v1787_v1, %v7919_v0  ;;  %v1789_v35 = vmul.f32 %v1787_v1, %v5680_v62  ;;  %v1790_v26 = vmul.f32 %v1787_v1, %v5708_v27  ;;  %s5860_s0 = sld [smem:[#allocation7 + %s1649_s29]] }
 0x1ff   : > { %v1791_v12 = vmul.f32 %v1787_v1, %v5711_v43  ;;  %v1792_v2 = vmul.f32 %v1787_v1, %v5714_v28  ;;  %v1793_v44 = vmul.f32 %v1787_v1, %v5717_v33  ;;  %v1794_v42 = vmul.f32 %v1787_v1, %v5719_v34  ;;  %v5867_v34 = vld [vmem:[%s4851_s1 + $0x88] sm:$0xff]  ;;  %s5970_s29 = sld [smem:[#allocation7 + %s7933_s15]] }
 0x200   : > { %v1795_v63 = vmul.f32 %v1787_v1, %v5721_v59  ;;  %v1796_v60 = vadd.f32 %v1788_v13, %v1786_v17  ;;  %v1797_v37 = vadd.f32 %v1789_v35, %v1786_v17  ;;  %v1798_v53 = vadd.f32 %v1790_v26, %v1786_v17  ;;  %7922 = vst [vmem:[#allocation73_spill] sm:$0xff] %v5867_v34  ;;  %v5870_v1 = vld [vmem:[%s4851_s1 + $0x90] sm:$0xff]  ;;  %v5873_v13 = vld [vmem:[%s4851_s1 + $0x98] sm:$0xff]  ;;  %s5974_s19 = sld [smem:[#allocation7 + %s1639_s10]] }
 0x201   : > { %v1799_v21 = vadd.f32 %v1791_v12, %v1786_v17  ;;  %v1800_v15 = vadd.f32 %v1792_v2, %v1786_v17  ;;  %v1801_v45 = vadd.f32 %v1793_v44, %v1786_v17  ;;  %v1802_v31 = vadd.f32 %v1794_v42, %v1786_v17  ;;  %7923 = vst [vmem:[#allocation87_spill] sm:$0xff] %v5870_v1  ;;  %v5876_v44 = vld [vmem:[%s4851_s1 + $0xa0] sm:$0xff]  ;;  %v5879_v42 = vld [vmem:[%s4851_s1 + $0xa8] sm:$0xff]  ;;  %v5882_v59 = vld [vmem:[%s4851_s1 + $0xb0] sm:$0xff]  ;;  %s6041_s10 = sld [smem:[#allocation7 + %s7934_s16]] }
 0x202   : > { %v1803_v8 = vadd.f32 %v1795_v63, %v1786_v17  ;;  %v1805_v4 = vadd.f32 %v1804_v23, %v1796_v60  ;;  %v1806_v3 = vadd.f32 %v1804_v23, %v1797_v37  ;;  %v1807_v29 = vadd.f32 %v1804_v23, %v1798_v53  ;;  %7924 = vst [vmem:[#allocation88_spill] sm:$0xff] %v5873_v13  ;;  %v5888_v53 = vld [vmem:[%s4851_s1 + $0xb8] sm:$0xff]  ;;  %s5931_s1 = scalar_lea.vmem [#allocation25], %s4814_s6  ;;  %s8242_s15 = sld [smem:[#allocation108_spill]] }
 0x203   : > { %v1808_v35 = vadd.f32 %v1804_v23, %v1799_v21  ;;  %v1809_v26 = vadd.f32 %v1804_v23, %v1800_v15  ;;  %v1810_v12 = vadd.f32 %v1804_v23, %v1801_v45  ;;  %v1811_v2 = vadd.f32 %v1804_v23, %v1802_v31  ;;  %7925 = vst [vmem:[#allocation89_spill] sm:$0xff] %v5876_v44 }
 0x204   : > { %7926 = vst [vmem:[#allocation90_spill] sm:$0xff] %v5879_v42  ;;  %7927 = vst [vmem:[#allocation91_spill] sm:$0xff] %v5882_v59  ;;  %v1812_v17 = vadd.f32 %v1804_v23, %v1803_v8  ;;  %v1813_v63 = vmul.f32 %v1805_v4, %v5611_v24  ;;  %v1814_v60 = vmul.f32 %v1806_v3, %v5622_v61 }
 0x205   : > { %v1815_v37 = vmul.f32 %v1807_v29, %v5626_v54  ;;  %7928 = vst [vmem:[#allocation92_spill] sm:$0xff] %v5888_v53  ;;  %v1816_v21 = vmul.f32 %v1808_v35, %v5630_v30  ;;  %v1817_v15 = vmul.f32 %v1809_v26, %v5643_v40  ;;  %v1818_v45 = vmul.f32 %v1810_v12, %v5656_v46 }
 0x206   : > { %v1819_v31 = vmul.f32 %v1811_v2, %v5660_v22  ;;  %v1820_v8 = vmul.f32 %v1812_v17, %v5664_v38  ;;  %v5896_v4 = vadd.f32 %v5864_v9, %v1813_v63  ;;  %v5899_v3 = vadd.f32 %v5867_v34, %v1814_v60  ;;  %1097 = vst [vmem:[%s5931_s1] sm:$0xff] %v5684_v57 }
 0x207   : > { %v5902_v29 = vadd.f32 %v5870_v1, %v1815_v37  ;;  %v5905_v24 = vadd.f32 %v5873_v13, %v1816_v21  ;;  %v5908_v61 = vadd.f32 %v5876_v44, %v1817_v15  ;;  %v5911_v54 = vadd.f32 %v5879_v42, %v1818_v45  ;;  %1098 = vst [vmem:[%s5931_s1 + $0x8] sm:$0xff] %v5690_v6 }
 0x208   : > { %v5914_v30 = vadd.f32 %v5882_v59, %v1819_v31  ;;  %v5917_v40 = vadd.f32 %v5888_v53, %v1820_v8  ;;  %v1829_v46 = vstv %s5848_s24  ;;  %v1838_v22 = vstv %s5856_s14  ;;  %1099 = vst [vmem:[%s5931_s1 + $0x10] sm:$0xff] %v5692_v18  ;;  %1100 = vst [vmem:[%s5931_s1 + $0x18] sm:$0xff] %v5694_v47  ;;  %s5950_s24 = sld [smem:[#allocation7 + %s5571_s27]]  ;;  %s7935_s14 = sadd.s32 5, %s5571_s27 }
 0x209   : > { %7929 = vst [vmem:[#allocation93_spill] sm:$0xff] %v5908_v61  ;;  %7930 = vst [vmem:[#allocation94_spill] sm:$0xff] %v5911_v54  ;;  %v1855_v38 = vstv %s5860_s0  ;;  %v1830_v23 = vmul.f32 %v1829_v46, %v5760_v11  ;;  %v1831_v35 = vmul.f32 %v1829_v46, %v5762_v5  ;;  %v1832_v26 = vmul.f32 %v1829_v46, %v5764_v36  ;;  %s6045_s0 = sld [smem:[#allocation7 + %s7935_s14]]  ;;  %s4249_s14 = smov [#allocation23]  }
 0x20a   : > { %7931 = vst [vmem:[#allocation95_spill] sm:$0xff] %v5914_v30  ;;  %7932 = vst [vmem:[#allocation96_spill] sm:$0xff] %v5917_v40  ;;  %v1833_v12 = vmul.f32 %v1829_v46, %v5766_v49  ;;  %v1834_v2 = vmul.f32 %v1829_v46, %v5770_v48  ;;  %v1835_v17 = vmul.f32 %v1829_v46, %v5772_v25 }
 0x20b   : > { %v1836_v63 = vmul.f32 %v1829_v46, %v5774_v39  ;;  %v1837_v60 = vmul.f32 %v1829_v46, %v5776_v41  ;;  %1101 = vst [vmem:[%s5931_s1 + $0x20] sm:$0xff] %v5696_v32  ;;  %1102 = vst [vmem:[%s5931_s1 + $0x28] sm:$0xff] %v5698_v52  ;;  %v1839_v37 = vmul.f32 %v1838_v22, %v5823_v51 }
 0x20c   : > { %1103 = vst [vmem:[%s5931_s1 + $0x30] sm:$0xff] %v5700_v19  ;;  %1104 = vst [vmem:[%s5931_s1 + $0x38] sm:$0xff] %v5702_v50  ;;  %v1840_v21 = vmul.f32 %v1838_v22, %v5825_v55  ;;  %v1841_v15 = vmul.f32 %v1838_v22, %v5827_v56  ;;  %v1842_v45 = vmul.f32 %v1838_v22, %v5829_v14 }
 0x20d   : > { %v1843_v31 = vmul.f32 %v1838_v22, %v5831_v10  ;;  %v1844_v8 = vmul.f32 %v1838_v22, %v5833_v16  ;;  %v1845_v46 = vmul.f32 %v1838_v22, %v5835_v20  ;;  %v1846_v53 = vmul.f32 %v1838_v22, %v5837_v58 }
 0x20e   : > { %v1847_v50 = vadd.f32 %v1839_v37, %v1830_v23  ;;  %v1848_v59 = vadd.f32 %v1840_v21, %v1831_v35  ;;  %v1849_v19 = vadd.f32 %v1841_v15, %v1832_v26  ;;  %v1850_v42 = vadd.f32 %v1842_v45, %v1833_v12 }
 0x20f   : > { %v1851_v52 = vadd.f32 %v1843_v31, %v1834_v2  ;;  %v1852_v44 = vadd.f32 %v1844_v8, %v1835_v17  ;;  %v1853_v32 = vadd.f32 %v1845_v46, %v1836_v63  ;;  %v1854_v13 = vadd.f32 %v1846_v53, %v1837_v60 }
 0x210   : > { %v1856_v47 = vmul.f32 %v1855_v38, %v5896_v4  ;;  %v1857_v1 = vmul.f32 %v1855_v38, %v5899_v3  ;;  %v1858_v18 = vmul.f32 %v1855_v38, %v5902_v29  ;;  %v1859_v34 = vmul.f32 %v1855_v38, %v5905_v24 }
 0x211   : > { %v1860_v53 = vmul.f32 %v1855_v38, %v5908_v61  ;;  %v1861_v22 = vmul.f32 %v1855_v38, %v5911_v54  ;;  %v1862_v23 = vmul.f32 %v1855_v38, %v5914_v30  ;;  %v1863_v35 = vmul.f32 %v1855_v38, %v5917_v40 }
 0x212   : > { %v1864_v26 = vadd.f32 %v1856_v47, %v1847_v50  ;;  %v1865_v12 = vadd.f32 %v1857_v1, %v1848_v59  ;;  %v1866_v2 = vadd.f32 %v1858_v18, %v1849_v19  ;;  %v1867_v17 = vadd.f32 %v1859_v34, %v1850_v42 }
 0x213   : > { %v1868_v63 = vadd.f32 %v1860_v53, %v1851_v52  ;;  %v1869_v60 = vadd.f32 %v1861_v22, %v1852_v44  ;;  %v1870_v37 = vadd.f32 %v1862_v23, %v1853_v32  ;;  %v1871_v21 = vadd.f32 %v1863_v35, %v1854_v13 }
 0x214   : > { %v1872_v15 = vadd.f32 1e-08, %v1864_v26  ;;  %v1873_v45 = vadd.f32 1e-08, %v1865_v12  ;;  %v1874_v31 = vadd.f32 1e-08, %v1866_v2  ;;  %v1912_v8 = vstv %s5950_s24 }
 0x215   : > { %v5981_v46 = vadd.f32 1e-08, %v1867_v17  ;;  %v5983_v6 = vadd.f32 1e-08, %v1868_v63  ;;  %v5985_v9 = vadd.f32 1e-08, %v1869_v60  ;;  %v1913_v47 = vmul.f32 %v1912_v8, %v5760_v11 }
 0x216   : > { %v5988_v18 = vadd.f32 1e-08, %v1870_v37  ;;  %v5990_v52 = vadd.f32 1e-08, %v1871_v21  ;;  %3640 = vrcp.f32 %v1872_v15  ;;  %v1914_v32 = vmul.f32 %v1912_v8, %v5762_v5  ;;  %s7936_s24 = sshll.u32 %s4798_s13, 7 }
 0x217   : > { %3642 = vrcp.f32 %v1873_v45  ;;  %v1915_v19 = vmul.f32 %v1912_v8, %v5764_v36  ;;  %v1916_v50 = vmul.f32 %v1912_v8, %v5766_v49  ;;  %v1917_v34 = vmul.f32 %v1912_v8, %v5770_v48 }
 0x218   : > { %3644 = vrcp.f32 %v1874_v31  ;;  %v1918_v59 = vmul.f32 %v1912_v8, %v5772_v25  ;;  %v1919_v1 = vmul.f32 %v1912_v8, %v5774_v39  ;;  %v1920_v13 = vmul.f32 %v1912_v8, %v5776_v41 }
 0x219   : > { %3646 = vrcp.f32 %v5981_v46  ;;  %v1921_v44 = vstv %s5962_s30  ;;  %v1938_v42 = vstv %s5970_s29  ;;  %v6003_v38 = vstv %s5974_s19  ;;  %s6082_s30 = scalar_lea.vmem [#allocation26], %s7936_s24  ;;  %s2690_s19 = sshll.u32 %s5011_s28, 4  ;;  %s7207_s19 = int_to_ptr.vmem [resolvable:$true] %s2690_s19 }
 0x21a   : > { %3648 = vrcp.f32 %v5983_v6  ;;  %v1922_v53 = vmul.f32 %v1921_v44, %v5823_v51  ;;  %v1923_v22 = vmul.f32 %v1921_v44, %v5825_v55  ;;  %v1924_v23 = vmul.f32 %v1921_v44, %v5827_v56 }
 0x21b   : > { %3650 = vrcp.f32 %v5985_v9  ;;  %v1925_v35 = vmul.f32 %v1921_v44, %v5829_v14  ;;  %v1926_v26 = vmul.f32 %v1921_v44, %v5831_v10  ;;  %v1927_v12 = vmul.f32 %v1921_v44, %v5833_v16 }
 0x21c   : > { %3652 = vrcp.f32 %v5988_v18  ;;  %v1928_v2 = vmul.f32 %v1921_v44, %v5835_v20  ;;  %v1929_v17 = vmul.f32 %v1921_v44, %v5837_v58  ;;  %v1930_v63 = vadd.f32 %v1922_v53, %v1913_v47 }
 0x21d   : > { %3654 = vrcp.f32 %v5990_v52  ;;  %v1931_v60 = vadd.f32 %v1923_v22, %v1914_v32  ;;  %v1932_v37 = vadd.f32 %v1924_v23, %v1915_v19  ;;  %v1933_v21 = vadd.f32 %v1925_v35, %v1916_v50 }
 0x21e   : > { %v1934_v8 = vadd.f32 %v1926_v26, %v1917_v34  ;;  %v1935_v57 = vadd.f32 %v1927_v12, %v1918_v59  ;;  %v1936_v33 = vadd.f32 %v1928_v2, %v1919_v1  ;;  %v1937_v28 = vadd.f32 %v1929_v17, %v1920_v13 }
 0x21f   : > { %v1939_v43 = vmul.f32 %v1938_v42, %v5896_v4  ;;  %v1940_v27 = vmul.f32 %v1938_v42, %v5899_v3  ;;  %v1941_v62 = vmul.f32 %v1938_v42, %v5902_v29  ;;  %v1942_v0 = vmul.f32 %v1938_v42, %v5905_v24 }
 0x220   : > { %v3641_v20 = vpop.eup %3640  ;;  %v1943_v47 = vmul.f32 %v1938_v42, %v5908_v61  ;;  %v1944_v44 = vmul.f32 %v1938_v42, %v5911_v54  ;;  %v1945_v32 = vmul.f32 %v1938_v42, %v5914_v30  ;;  %v1946_v19 = vmul.f32 %v1938_v42, %v5917_v40 }
 0x221   : > { %v3643_v50 = vpop.eup %3642  ;;  %v1888_v34 = vmul.f32 %v3641_v20, %v1872_v15  ;;  %v1947_v59 = vadd.f32 %v1939_v43, %v1930_v63  ;;  %v1948_v1 = vadd.f32 %v1940_v27, %v1931_v60  ;;  %v1949_v13 = vadd.f32 %v1941_v62, %v1932_v37 }
 0x222   : > { %v3645_v53 = vpop.eup %3644  ;;  %v1889_v22 = vmul.f32 %v3643_v50, %v1873_v45  ;;  %v1950_v23 = vadd.f32 %v1942_v0, %v1933_v21  ;;  %v1951_v35 = vadd.f32 %v1943_v47, %v1934_v8  ;;  %v1952_v26 = vadd.f32 %v1944_v44, %v1935_v57 }
 0x223   : > { %v3647_v12 = vpop.eup %3646  ;;  %v1890_v2 = vmul.f32 %v3645_v53, %v1874_v31  ;;  %v1896_v17 = vsub.f32 2.0, %v1888_v34  ;;  %v1953_v54 = vadd.f32 %v1945_v32, %v1936_v33  ;;  %v1954_v61 = vadd.f32 %v1946_v19, %v1937_v28 }
 0x224   : > { %v3649_v30 = vpop.eup %3648  ;;  %v1891_v42 = vmul.f32 %v3647_v12, %v5981_v46  ;;  %v1897_v40 = vsub.f32 2.0, %v1889_v22  ;;  %v6028_v27 = vmul.f32 %v6003_v38, %v5760_v11  ;;  %v6032_v62 = vmul.f32 %v6003_v38, %v5762_v5 }
 0x225   : > { %v3651_v57 = vpop.eup %3650  ;;  %v1892_v43 = vmul.f32 %v3649_v30, %v5983_v6  ;;  %v1898_v0 = vsub.f32 2.0, %v1890_v2  ;;  %v6035_v15 = vmul.f32 %v3641_v20, %v1896_v17  ;;  %v1974_v28 = vmul.f32 %v6003_v38, %v5764_v36 }
 0x226   : > { %v3653_v33 = vpop.eup %3652  ;;  %v1893_v11 = vmul.f32 %v3651_v57, %v5985_v9  ;;  %v1899_v5 = vsub.f32 2.0, %v1891_v42  ;;  %v6048_v45 = vmul.f32 %v3643_v50, %v1897_v40  ;;  %v1975_v6 = vmul.f32 %v6003_v38, %v5766_v49 }
 0x227   : > { %v3655_v20 = vpop.eup %3654  ;;  %v1894_v31 = vmul.f32 %v3653_v33, %v5988_v18  ;;  %v1900_v46 = vsub.f32 2.0, %v1892_v43  ;;  %v6053_v36 = vmul.f32 %v3645_v53, %v1898_v0  ;;  %v1955_v63 = vmul.f32 %v1947_v59, %v6035_v15  ;;  %v7937_v43 = vld [vmem:[#allocation71_spill] sm:$0xff] }
 0x228   : > { %v1895_v60 = vmul.f32 %v3655_v20, %v5990_v52  ;;  %v1901_v37 = vsub.f32 2.0, %v1893_v11  ;;  %v6057_v21 = vmul.f32 %v3647_v12, %v1899_v5  ;;  %v1956_v9 = vmul.f32 %v1948_v1, %v6048_v45 }
 0x229   : > { %v1902_v40 = vsub.f32 2.0, %v1894_v31  ;;  %v6060_v8 = vmul.f32 %v3649_v30, %v1900_v46  ;;  %v1957_v49 = vmul.f32 %v1949_v13, %v6053_v36  ;;  %v6064_v18 = vsub.f32 %v1955_v63, %v5724_v7  ;;  %v7938_v31 = vld [vmem:[#allocation93_spill] sm:$0xff]  ;;  %v7939_v46 = vld [vmem:[#allocation94_spill] sm:$0xff] }
 0x22a   : > { %v1903_v47 = vsub.f32 2.0, %v1895_v60  ;;  %v6066_v44 = vmul.f32 %v3651_v57, %v1901_v37  ;;  %v1958_v32 = vmul.f32 %v1950_v23, %v6057_v21  ;;  %v6070_v52 = vsub.f32 %v1956_v9, %v5724_v7  ;;  %v7941_v60 = vld [vmem:[#allocation96_spill] sm:$0xff] }
 0x22b   : > { %v6072_v19 = vmul.f32 %v3653_v33, %v1902_v40  ;;  %v1959_v50 = vmul.f32 %v1951_v35, %v6060_v8  ;;  %v6076_v30 = vsub.f32 %v1957_v49, %v5724_v7  ;;  %v1976_v34 = vmul.f32 %v6003_v38, %v5770_v48  ;;  %2030 = vst [vmem:[%s6082_s30] sm:$0xff] %v6064_v18 }
 0x22c   : > { %v1911_v59 = vmul.f32 %v3655_v20, %v1903_v47  ;;  %v1960_v1 = vmul.f32 %v1952_v26, %v6066_v44  ;;  %v6088_v13 = vsub.f32 %v1958_v32, %v5724_v7  ;;  %v1977_v53 = vmul.f32 %v6003_v38, %v5772_v25  ;;  %2031 = vst [vmem:[%s6082_s30 + $0x8] sm:$0xff] %v6070_v52 }
 0x22d   : > { %v1961_v48 = vmul.f32 %v1953_v54, %v6072_v19  ;;  %v6096_v22 = vsub.f32 %v1959_v50, %v5724_v7  ;;  %v1978_v23 = vmul.f32 %v6003_v38, %v5774_v39  ;;  %v1979_v35 = vmul.f32 %v6003_v38, %v5776_v41  ;;  %2032 = vst [vmem:[%s6082_s30 + $0x10] sm:$0xff] %v6076_v30 }
 0x22e   : > { %v1962_v26 = vmul.f32 %v1954_v61, %v1911_v59  ;;  %v6105_v25 = vsub.f32 %v1960_v1, %v5724_v7  ;;  %v1980_v12 = vstv %s6041_s10  ;;  %v1997_v2 = vstv %s6045_s0  ;;  %2033 = vst [vmem:[%s6082_s30 + $0x18] sm:$0xff] %v6088_v13  ;;  %s3971_s10 = scalar_lea.vmem %s7207_s19, 1024  ;;  %s3975_s0 = sshll.u32 %s4249_s14, 4  ;;  %s3976_s0 = int_to_ptr.vmem [resolvable:$false] %s3975_s0 }
 0x22f   : > { %v6112_v54 = vsub.f32 %v1961_v48, %v5724_v7  ;;  %v1981_v39 = vmul.f32 %v1980_v12, %v5823_v51  ;;  %v1982_v17 = vmul.f32 %v1980_v12, %v5825_v55  ;;  %v1983_v41 = vmul.f32 %v1980_v12, %v5827_v56  ;;  %2034 = vst [vmem:[%s6082_s30 + $0x20] sm:$0xff] %v6096_v22  ;;  %p3972_p1 = scmp.ne.s32.totalorder %s7207_s19, %s3971_s10  ;;  %s3977_s24 = scalar_lea.vmem %s3976_s0, 2048 }
 0x230   : > { %v6120_v61 = vsub.f32 %v1962_v26, %v5724_v7  ;;  %v1984_v38 = vmul.f32 %v1980_v12, %v5829_v14  ;;  %v1985_v42 = vmul.f32 %v1980_v12, %v5831_v10  ;;  %v1986_v57 = vmul.f32 %v1980_v12, %v5833_v16  ;;  %2035 = vst [vmem:[%s6082_s30 + $0x28] sm:$0xff] %v6105_v25  ;;  %v7942_v26 = vld [vmem:[#allocation60_spill] sm:$0xff]  ;;  %p3978_p8 = scmp.lt.s32.totalorder %s7207_s19, %s3976_s0  ;;  %p3979_p4 = scmp.lt.s32.totalorder %s3977_s24, %s3971_s10 }
 0x231   : > { %v1987_v51 = vmul.f32 %v1980_v12, %v7937_v43  ;;  %v1988_v55 = vmul.f32 %v1980_v12, %v5837_v58  ;;  %v1989_v56 = vadd.f32 %v1981_v39, %v6028_v27  ;;  %v1990_v0 = vadd.f32 %v1982_v17, %v6032_v62  ;;  %2036 = vst [vmem:[%s6082_s30 + $0x30] sm:$0xff] %v6112_v54  ;;  %v7943_v12 = vld [vmem:[#allocation74_spill] sm:$0xff]  ;;  %v7946_v39 = vld [vmem:[#allocation67_spill] sm:$0xff]  ;;  %v7947_v17 = vld [vmem:[#allocation68_spill] sm:$0xff]  ;;  %p3973_p13 = pnand %p3972_p1, %p8243_p5 }
 0x232   : > { %v1991_v7 = vadd.f32 %v1983_v41, %v1974_v28  ;;  %v1992_v33 = vadd.f32 %v1984_v38, %v1975_v6  ;;  %v1993_v11 = vadd.f32 %v1985_v42, %v1976_v34  ;;  %v1994_v14 = vadd.f32 %v1986_v57, %v1977_v53  ;;  %2037 = vst [vmem:[%s6082_s30 + $0x38] sm:$0xff] %v6120_v61  ;;  %v7940_v28 = vld [vmem:[#allocation95_spill] sm:$0xff]  ;;  %v6163_v38 = vld [vmem:[%s4804_s12 + $0x10] sm:$0xff]  ;;  %v6166_v42 = vld [vmem:[%s4804_s12 + $0x18] sm:$0xff]  ;;  %p3980_p9 = por %p3979_p4, %p3978_p8 }
 0x233   : > { %v1995_v10 = vadd.f32 %v1987_v51, %v1978_v23  ;;  %v1996_v16 = vadd.f32 %v1988_v55, %v1979_v35  ;;  %v1998_v5 = vmul.f32 %v1997_v2, %v5896_v4  ;;  %v1999_v20 = vmul.f32 %v1997_v2, %v5899_v3  ;;  %v6169_v57 = vld [vmem:[%s4804_s12 + $0x40] sm:$0xff]  ;;  %v7948_v43 = vld [vmem:[#allocation69_spill] sm:$0xff]  ;;  %v7949_v55 = vld [vmem:[#allocation70_spill] sm:$0xff]  ;;  %p3974_p0 = pneg %p3973_p13 }
 0x234   : > { %v2000_v58 = vmul.f32 %v1997_v2, %v5902_v29  ;;  %v2001_v27 = vmul.f32 %v1997_v2, %v5905_v24  ;;  %v2002_v62 = vmul.f32 %v1997_v2, %v7938_v31  ;;  %v2003_v63 = vmul.f32 %v1997_v2, %v7939_v46  ;;  %v3348_v31 = vld [vmem:[%s4804_s12 + $0x70] sm:$0xff] }
 0x235   : > { %v2004_v6 = vmul.f32 %v1997_v2, %v7940_v28  ;;  %v2005_v37 = vmul.f32 %v1997_v2, %v7941_v60  ;;  %v2006_v9 = vadd.f32 %v1998_v5, %v1989_v56  ;;  %v2007_v40 = vadd.f32 %v1999_v20, %v1990_v0  ;;  %v7945_v2 = vld [vmem:[#allocation51_spill] sm:$0xff]  ;;  %v6204_v20 = vld [vmem:[%s4804_s12 + $0x68] sm:$0xff]  ;;  %p3981_p10 = pnand %p3980_p9, %p3974_p0 }
 0x236   : > { %v2008_v49 = vadd.f32 %v2000_v58, %v1991_v7  ;;  %v2009_v47 = vadd.f32 %v2001_v27, %v1992_v33  ;;  %v2010_v4 = vadd.f32 %v2002_v62, %v1993_v11  ;;  %v2011_v3 = vadd.f32 %v2003_v63, %v1994_v14  ;;  %v6174_v0 = vld [vmem:[%s4804_s12 + $0x20] sm:$0xff]  ;;  %v6177_v7 = vld [vmem:[%s4804_s12 + $0x28] sm:$0xff]  ;;  %v6180_v33 = vld [vmem:[%s4804_s12 + $0x30] sm:$0xff] }
 0x237   : > { %v2012_v32 = vadd.f32 %v2004_v6, %v1995_v10  ;;  %v2013_v29 = vadd.f32 %v2005_v37, %v1996_v16  ;;  %v2014_v24 = vmul.f32 %v2006_v9, %v6035_v15  ;;  %v2015_v50 = vmul.f32 %v2007_v40, %v6048_v45  ;;  %v6185_v11 = vld [vmem:[%s4804_s12 + $0x38] sm:$0xff]  ;;  %v6188_v14 = vld [vmem:[%s4804_s12 + $0x48] sm:$0xff]  ;;  %v6191_v10 = vld [vmem:[%s4804_s12 + $0x50] sm:$0xff] }
 0x238   : > { %v2016_v34 = vmul.f32 %v2008_v49, %v6053_v36  ;;  %v2017_v1 = vmul.f32 %v2009_v47, %v6057_v21  ;;  %v2018_v53 = vmul.f32 %v2010_v4, %v6060_v8  ;;  %v2019_v48 = vmul.f32 %v2011_v3, %v6066_v44  ;;  %v6153_v36 = vld [vmem:[%s4804_s12] sm:$0xff]  ;;  %v6156_v21 = vld [vmem:[%s4804_s12 + $0x8] sm:$0xff]  ;;  %v7944_v8 = vld [vmem:[#allocation50_spill] sm:$0xff] }
 0x239   : > { %v2020_v23 = vmul.f32 %v2012_v32, %v6072_v19  ;;  %v2021_v35 = vmul.f32 %v2013_v29, %v1911_v59  ;;  %v2022_v15 = vsub.f32 %v2014_v24, %v7942_v26  ;;  %v2023_v45 = vsub.f32 %v2015_v50, %v7943_v12  ;;  %v6198_v16 = vld [vmem:[%s4804_s12 + $0x58] sm:$0xff]  ;;  %v6201_v5 = vld [vmem:[%s4804_s12 + $0x60] sm:$0xff] }
 0x23a   : > { %v2024_v44 = vsub.f32 %v2016_v34, %v7944_v8  ;;  %v2025_v19 = vsub.f32 %v2017_v1, %v7945_v2  ;;  %v2026_v59 = vsub.f32 %v2018_v53, %v7946_v39  ;;  %v2027_v41 = vsub.f32 %v2019_v48, %v7947_v17  ;;  %v3349_v62 = vld [vmem:[%s4804_s12 + $0x78] sm:$0xff]  ;;  %s6297_s12 = scalar_lea.vmem [#allocation29], %s4814_s6 }
 0x23b   : > { %v2028_v51 = vsub.f32 %v2020_v23, %v7948_v43  ;;  %v2029_v56 = vsub.f32 %v2021_v35, %v7949_v55  ;;  %3334 = vst [vmem:[%s6082_s30 + $0x40] sm:$0xff] %v2022_v15  ;;  %3335 = vst [vmem:[%s6082_s30 + $0x48] sm:$0xff] %v2023_v45  ;;  %v2088_v58 = vsub.f32 %v6153_v36, %v6064_v18 }
 0x23c   : > { %3336 = vst [vmem:[%s6082_s30 + $0x50] sm:$0xff] %v2024_v44  ;;  %3337 = vst [vmem:[%s6082_s30 + $0x58] sm:$0xff] %v2025_v19  ;;  %v2089_v27 = vsub.f32 %v6156_v21, %v6070_v52  ;;  %v2090_v46 = vsub.f32 %v6163_v38, %v6076_v30  ;;  %v2091_v63 = vsub.f32 %v6166_v42, %v6088_v13 }
 0x23d   : > { %3338 = vst [vmem:[%s6082_s30 + $0x60] sm:$0xff] %v2026_v59  ;;  %3339 = vst [vmem:[%s6082_s30 + $0x68] sm:$0xff] %v2027_v41  ;;  %v2092_v28 = vsub.f32 %v6174_v0, %v6096_v22  ;;  %v2093_v6 = vsub.f32 %v6177_v7, %v6105_v25  ;;  %v2094_v18 = vsub.f32 %v6180_v33, %v6112_v54 }
 0x23e   : > { %3340 = vst [vmem:[%s6082_s30 + $0x70] sm:$0xff] %v2028_v51  ;;  %3341 = vst [vmem:[%s6082_s30 + $0x78] sm:$0xff] %v2029_v56  ;;  %v2095_v52 = vsub.f32 %v6185_v11, %v6120_v61  ;;  %v2096_v60 = vsub.f32 %v6169_v57, %v2022_v15  ;;  %v2097_v37 = vsub.f32 %v6188_v14, %v2023_v45 }
 0x23f   : > { %v2098_v30 = vsub.f32 %v6191_v10, %v2024_v44  ;;  %v2099_v13 = vsub.f32 %v6198_v16, %v2025_v19  ;;  %v2100_v9 = vsub.f32 %v6201_v5, %v2026_v59  ;;  %v2101_v22 = vsub.f32 %v6204_v20, %v2027_v41 }
 0x240   : > { %v2102_v40 = vsub.f32 %v3348_v31, %v2028_v51  ;;  %v2103_v25 = vsub.f32 %v3349_v62, %v2029_v56  ;;  %v2104_v49 = vmul.f32 %v2088_v58, %v2088_v58  ;;  %v2105_v47 = vmul.f32 %v2089_v27, %v2089_v27 }
 0x241   : > { %v2106_v54 = vmul.f32 %v2090_v46, %v2090_v46  ;;  %v2107_v4 = vmul.f32 %v2091_v63, %v2091_v63  ;;  %v2108_v3 = vmul.f32 %v2092_v28, %v2092_v28  ;;  %v2109_v61 = vmul.f32 %v2093_v6, %v2093_v6 }
 0x242   : > { %v2110_v32 = vmul.f32 %v2094_v18, %v2094_v18  ;;  %v2111_v29 = vmul.f32 %v2095_v52, %v2095_v52  ;;  %v2112_v24 = vmul.f32 %v2096_v60, %v2096_v60  ;;  %v2113_v50 = vmul.f32 %v2097_v37, %v2097_v37  ;;  %v7951_v37 = vld [vmem:[#allocation72_spill] sm:$0xff] }
 0x243   : > { %v2114_v34 = vmul.f32 %v2098_v30, %v2098_v30  ;;  %v2115_v1 = vmul.f32 %v2099_v13, %v2099_v13  ;;  %v2116_v53 = vmul.f32 %v2100_v9, %v2100_v9  ;;  %v2117_v48 = vmul.f32 %v2101_v22, %v2101_v22  ;;  %v7956_v22 = vld [vmem:[#allocation75_spill] sm:$0xff]  ;;  %v6510_v13 = vld [vmem:[%s4836_s17 + $0x30] sm:$0xff] }
 0x244   : > { %v2118_v23 = vmul.f32 %v2102_v40, %v2102_v40  ;;  %v2119_v35 = vmul.f32 %v2103_v25, %v2103_v25  ;;  %v6232_v26 = vadd.f32 %v2112_v24, %v2104_v49  ;;  %v6234_v15 = vadd.f32 %v2113_v50, %v2105_v47  ;;  %v7957_v40 = vld [vmem:[#allocation73_spill] sm:$0xff]  ;;  %v6315_v49 = vld [vmem:[%s4818_s18] sm:$0xff] }
 0x245   : > { %v6236_v12 = vadd.f32 %v2114_v34, %v2106_v54  ;;  %v6238_v45 = vadd.f32 %v2115_v1, %v2107_v4  ;;  %v6240_v8 = vadd.f32 %v2116_v53, %v2108_v3  ;;  %v6242_v44 = vadd.f32 %v2117_v48, %v2109_v61  ;;  %7958 = vst [vmem:[#allocation71_spill] sm:$0xff] %v6315_v49  ;;  %v7961_v54 = vld [vmem:[#allocation64_spill] sm:$0xff]  ;;  %v7962_v4 = vld [vmem:[#allocation87_spill] sm:$0xff]  ;;  %v7965_v24 = vld [vmem:[#allocation65_spill] sm:$0xff] }
 0x246   : > { %v6244_v2 = vadd.f32 %v2118_v23, %v2110_v32  ;;  %v6246_v19 = vadd.f32 %v2119_v35, %v2111_v29  ;;  %vm2208_vm6 = vcmp.gt.f32.partialorder %v6232_v26, 9.0  ;;  %vm2209_vm10 = vcmp.gt.f32.partialorder %v6234_v15, 9.0  ;;  %v7963_v61 = vld [vmem:[#allocation76_spill] sm:$0xff]  ;;  %v7966_v50 = vld [vmem:[#allocation89_spill] sm:$0xff]  ;;  %v7968_v53 = vld [vmem:[#allocation90_spill] sm:$0xff] }
 0x247   : > { %vm2210_vm13 = vcmp.gt.f32.partialorder %v6236_v12, 9.0  ;;  %v2216_v39 = vmul.f32 %v6153_v36, %v6153_v36  ;;  %v2217_v59 = vmul.f32 %v6156_v21, %v6156_v21  ;;  %vm2211_vm5 = vcmp.gt.f32.partialorder %v6238_v45, 9.0  ;;  %v7964_v32 = vld [vmem:[#allocation88_spill] sm:$0xff]  ;;  %v7967_v1 = vld [vmem:[#allocation77_spill] sm:$0xff] }
 0x248   : > { %v2218_v17 = vmul.f32 %v6163_v38, %v6163_v38  ;;  %v2219_v41 = vmul.f32 %v6166_v42, %v6166_v42  ;;  %v2220_v43 = vmul.f32 %v6174_v0, %v6174_v0  ;;  %v2221_v51 = vmul.f32 %v6177_v7, %v6177_v7  ;;  %v6340_v23 = vld [vmem:[%s4818_s18 + $0x8] sm:$0xff]  ;;  %v6343_v35 = vld [vmem:[%s4818_s18 + $0x10] sm:$0xff] }
 0x249   : > { %v2222_v36 = vmul.f32 %v6180_v33, %v6180_v33  ;;  %v2223_v21 = vmul.f32 %v6185_v11, %v6185_v11  ;;  %v2224_v38 = vmul.f32 %v6169_v57, %v6169_v57  ;;  %v2225_v42 = vmul.f32 %v6188_v14, %v6188_v14  ;;  %7969 = vst [vmem:[#allocation93_spill] sm:$0xff] %v6340_v23 }
 0x24a   : > { %v2226_v55 = vmul.f32 %v6191_v10, %v6191_v10  ;;  %v2227_v56 = vmul.f32 %v6198_v16, %v6198_v16  ;;  %v2228_v0 = vmul.f32 %v6201_v5, %v6201_v5  ;;  %v2229_v7 = vmul.f32 %v6204_v20, %v6204_v20  ;;  %v7950_v5 = vld [vmem:[#allocation63_spill] sm:$0xff]  ;;  %7970 = vst [vmem:[#allocation94_spill] sm:$0xff] %v6343_v35 }
 0x24b   : > { %v2230_v33 = vmul.f32 %v3348_v31, %v3348_v31  ;;  %v2231_v11 = vmul.f32 %v3349_v62, %v3349_v62  ;;  %v2232_v58 = vadd.f32 %v2224_v38, %v2216_v39  ;;  %v2233_v27 = vadd.f32 %v2225_v42, %v2217_v59  ;;  %v7973_v59 = vld [vmem:[#allocation66_spill] sm:$0xff]  ;;  %v6369_v38 = vld [vmem:[%s4818_s18 + $0x20] sm:$0xff]  ;;  %v6568_v42 = vld [vmem:[%s4840_s4 + $0x8] sm:$0xff] }
 0x24c   : > { %v2234_v57 = vadd.f32 %v2226_v55, %v2218_v17  ;;  %v2235_v46 = vadd.f32 %v2227_v56, %v2219_v41  ;;  %v2236_v63 = vadd.f32 %v2228_v0, %v2220_v43  ;;  %v2237_v14 = vadd.f32 %v2229_v7, %v2221_v51  ;;  %v7974_v17 = vld [vmem:[#allocation91_spill] sm:$0xff]  ;;  %v7975_v43 = vld [vmem:[#allocation78_spill] sm:$0xff]  ;;  %v7976_v51 = vld [vmem:[#allocation92_spill] sm:$0xff]  ;;  %7978 = vst [vmem:[#allocation96_spill] sm:$0xff] %v6369_v38 }
 0x24d   : > { %v2238_v28 = vadd.f32 %v2230_v33, %v2222_v36  ;;  %v2239_v6 = vadd.f32 %v2231_v11, %v2223_v21  ;;  %v2240_v10 = vmul.f32 0.0025, %v2232_v58  ;;  %v2241_v18 = vmul.f32 0.0025, %v2233_v27  ;;  %v6366_v21 = vld [vmem:[%s4818_s18 + $0x18] sm:$0xff]  ;;  %v6391_v55 = vld [vmem:[%s4818_s18 + $0x28] sm:$0xff] }
 0x24e   : > { %v2242_v16 = vmul.f32 0.0025, %v2234_v57  ;;  %v2243_v52 = vmul.f32 0.0025, %v2235_v46  ;;  %v2244_v60 = vmul.f32 0.0025, %v2236_v63  ;;  %v6283_v30 = vadd.f32 %v7951_v37, %v7950_v5 }
 0x24f   : > { %v2245_v20 = vmul.f32 0.0025, %v2237_v14  ;;  %v2246_v31 = vmul.f32 0.0025, %v2238_v28  ;;  %vm2248_vm1 = vcmp.gt.f32.partialorder %v6232_v26, %v2240_v10  ;;  %v2247_v62 = vmul.f32 0.0025, %v2239_v6 }
 0x250   : > { %vm2249_vm2 = vcmp.gt.f32.partialorder %v6234_v15, %v2241_v18  ;;  %vm2250_vm8 = vcmp.gt.f32.partialorder %v6236_v12, %v2242_v16  ;;  %vm2251_vm3 = vcmp.gt.f32.partialorder %v6238_v45, %v2243_v52  ;;  %vm6292_vm7 = vmand %vm2208_vm6, %vm2248_vm1  ;;  %2352 = vst [vmem:[%s6297_s12] sm:$0xff] %v6283_v30  ;;  %vm2214_vm9 = vcmp.gt.f32.partialorder %v6244_v2, 9.0  ;;  %v6394_v56 = vld [vmem:[%s4818_s18 + $0x30] sm:$0xff]  ;;  %v6411_v7 = vld [vmem:[%s4818_s18 + $0x38] sm:$0xff]  ;;  %s6631_s18 = scalar_lea.vmem [#allocation28], %s4814_s6  ;;  %s7198_s6 = sshll.u32 %s7878_s26, 10 }
 0x251   : > { %vm2252_vm12 = vcmp.gt.f32.partialorder %v6240_v8, %v2244_v60  ;;  %vm2253_vm4 = vcmp.gt.f32.partialorder %v6242_v44, %v2245_v20  ;;  %vm6306_vm11 = vmand %vm2209_vm10, %vm2249_vm2  ;;  %v6312_v25 = vadd.f32 %v7957_v40, %v7956_v22  ;;  %v6325_v3 = vadd.f32 %v7962_v4, %v7961_v54  ;;  %7977 = vst [vmem:[#allocation95_spill] sm:$0xff] %v6366_v21  ;;  %v6435_v58 = vld [vmem:[%s4836_s17] sm:$0xff]  ;;  %v6450_v57 = vld [vmem:[%s4836_s17 + $0x8] sm:$0xff]  ;;  %s7204_s29 = scalar_lea.hbm %s8242_s15, %s7198_s6 }
 0x252   : > { %vm6319_vm6 = vmand %vm2210_vm13, %vm2250_vm8  ;;  %v6329_v29 = vadd.f32 %v7964_v32, %v7963_v61  ;;  %v6333_v34 = vadd.f32 %v7966_v50, %v7965_v24  ;;  %v6337_v48 = vadd.f32 %v7968_v53, %v7967_v1  ;;  %vm2254_vm10 = vcmp.gt.f32.partialorder %v6244_v2, %v2246_v31  ;;  %7982 = vst [vmem:[#allocation60_spill] sm:$0xff] %v6391_v55  ;;  %v6453_v46 = vld [vmem:[%s4836_s17 + $0x10] sm:$0xff]  ;;  %v6469_v6 = vld [vmem:[%s4836_s17 + $0x18] sm:$0xff] }
 0x253   : > { %vm6350_vm13 = vmand %vm2211_vm5, %vm2251_vm3  ;;  %v6356_v41 = vadd.f32 %v7974_v17, %v7973_v59  ;;  %v6360_v36 = vadd.f32 %v7976_v51, %v7975_v43  ;;  %3656 = vrcp.f32 %v6283_v30  ;;  %2353 = vst [vmem:[%s6297_s12 + $0x8] sm:$0xff] %v6312_v25  ;;  %vm2255_vm1 = vcmp.gt.f32.partialorder %v6246_v19, %v2247_v62  ;;  %v6472_v10 = vld [vmem:[%s4836_s17 + $0x20] sm:$0xff]  ;;  %v6490_v60 = vld [vmem:[%s4836_s17 + $0x28] sm:$0xff] }
 0x254   : > { %vm7979_vm2 = vcmp.gt.f32.partialorder %v6240_v8, 9.0  ;;  %3658 = vrcp.f32 %v6312_v25  ;;  %2354 = vst [vmem:[%s6297_s12 + $0x10] sm:$0xff] %v6325_v3  ;;  %2355 = vst [vmem:[%s6297_s12 + $0x18] sm:$0xff] %v6329_v29  ;;  %vm7990_vm0 = vcmp.gt.f32.partialorder %v6246_v19, 9.0  ;;  %v7994_v27 = vmov 0  ;;  %v6530_v54 = vld [vmem:[%s4836_s17 + $0x38] sm:$0xff] }
 0x255   : > { %vm6377_vm8 = vmand %vm7979_vm2, %vm2252_vm12  ;;  %2356 = vst [vmem:[%s6297_s12 + $0x20] sm:$0xff] %v6333_v34  ;;  %vm7984_vm12 = vcmp.gt.f32.partialorder %v6242_v44, 9.0  ;;  %3660 = vrcp.f32 %v6325_v3  ;;  %v7997_v63 = vmov 0  ;;  %v7999_v14 = vmov 0.0   ;;  %v6565_v51 = vld [vmem:[%s4840_s4] sm:$0xff]  ;;  %v6588_v0 = vld [vmem:[%s4840_s4 + $0x18] sm:$0xff] }
 0x256   : > { %2357 = vst [vmem:[%s6297_s12 + $0x28] sm:$0xff] %v6337_v48  ;;  %7983 = vst [vmem:[#allocation74_spill] sm:$0xff] %v6394_v56  ;;  %3662 = vrcp.f32 %v6329_v29  ;;  %v6475_v18 = vmul.f32 0.05, %v6435_v58  ;;  %v8001_v16 = vmov 0  ;;  %v8004_v20 = vmov 0 }
 0x257   : > { %vm6401_vm2 = vmand %vm7984_vm12, %vm2253_vm4  ;;  %2358 = vst [vmem:[%s6297_s12 + $0x30] sm:$0xff] %v6356_v41  ;;  %3664 = vrcp.f32 %v6333_v34  ;;  %vm7993_vm12 = vcmp.eq.f32.partialorder %v6315_v49, 1.0  ;;  %v6493_v5 = vmul.f32 0.05, %v6450_v57  ;;  %v6496_v37 = vmul.f32 0.05, %v6453_v46 }
 0x258   : > { %2359 = vst [vmem:[%s6297_s12 + $0x38] sm:$0xff] %v6360_v36  ;;  %7987 = vst [vmem:[#allocation50_spill] sm:$0xff] %v6411_v7  ;;  %3666 = vrcp.f32 %v6337_v48  ;;  %v6513_v9 = vmul.f32 0.05, %v6469_v6  ;;  %v6516_v22 = vmul.f32 0.05, %v6472_v10 }
 0x259   : > { %vm6418_vm4 = vmand %vm2214_vm9, %vm2254_vm10  ;;  %vm7662_vm9 = vcmp.eq.f32.partialorder %v6369_v38, 1.0  ;;  %vm7659_vm10 = vcmp.eq.f32.partialorder %v6391_v55, 1.0  ;;  %3668 = vrcp.f32 %v6356_v41  ;;  %v8007_v40 = vmov 0 }
 0x25a   : > { %vm6429_vm3 = vmand %vm7990_vm0, %vm2255_vm1  ;;  %vm7654_vm0 = vcmp.eq.f32.partialorder %v6411_v7, 1.0  ;;  %vm7996_vm1 = vcmp.eq.f32.partialorder %v6340_v23, 1.0  ;;  %3670 = vrcp.f32 %v6360_v36  ;;  %v6533_v4 = vmul.f32 0.05, %v6490_v60  ;;  %v8023_v23 = vld [vmem:[#allocation62_spill] sm:$0xff] }
 0x25b   : > { %vm6444_vm15 = vmand %vm6292_vm7, %vm7993_vm12  ;;  %vm8000_vm7 = vcmp.eq.f32.partialorder %v6343_v35, 1.0  ;;  %vm8003_vm12 = vcmp.eq.f32.partialorder %v6366_v21, 1.0  ;;  %v6536_v61 = vmul.f32 0.05, %v6510_v13  ;;  %3672 = vrsqrt.f32 %v6232_v26  ;;  %v6610_v35 = vld [vmem:[%s4840_s4 + $0x30] sm:$0xff] }
 0x25c   : > { %v7995_v27 = vsel %vm6444_vm15, 4294967295, %v7994_v27  ;;  %vm6460_vm5 = vmand %vm6306_vm11, %vm7996_vm1  ;;  %v3350_v28 = vsel %vm6444_vm15, 1.0, %v7999_v14  ;;  %v8010_v24 = vmov 0  ;;  %v6548_v1 = vmul.f32 0.05, %v6530_v54  ;;  %8021 = vst [vmem:[#allocation72_spill] sm:$0xff] %v6610_v35 }
 0x25d   : > { %v7998_v63 = vsel %vm6460_vm5, 4294967295, %v7997_v63  ;;  %vm6481_vm11 = vmand %vm6319_vm6, %vm8000_vm7  ;;  %v3351_v52 = vsel %vm6460_vm5, 1.0, %v7999_v14  ;;  %v3657_v32 = vpop.eup %3656  ;;  %3674 = vrsqrt.f32 %v6234_v15  ;;  %vm8013_vm1 = vcmp.eq.f32.partialorder %v6394_v56, 1.0 }
 0x25e   : > { %v8002_v16 = vsel %vm6481_vm11, 4294967295, %v8001_v16  ;;  %vm6502_vm6 = vmand %vm6350_vm13, %vm8003_vm12  ;;  %v3352_v31 = vsel %vm6481_vm11, 1.0, %v7999_v14  ;;  %v2288_v62 = vadd.f32 %v3351_v52, %v3350_v28  ;;  %v3659_v39 = vpop.eup %3658  ;;  %v8014_v59 = vmov 0 }
 0x25f   : > { %v8005_v20 = vsel %vm6502_vm6, 4294967295, %v8004_v20  ;;  %vm6522_vm13 = vmand %vm6377_vm8, %vm7662_vm9  ;;  %v3353_v47 = vsel %vm6502_vm6, 1.0, %v7999_v14  ;;  %v2320_v43 = vmul.f32 %v3657_v32, %v6283_v30  ;;  %3676 = vrsqrt.f32 %v6236_v12  ;;  %v3661_v33 = vpop.eup %3660 }
 0x260   : > { %8006 = vst [vmem:[#allocation51_spill] sm:$0xff] %v8005_v20  ;;  %v8008_v40 = vsel %vm6522_vm13, 4294967295, %v8007_v40  ;;  %vm6543_vm8 = vmand %vm6401_vm2, %vm7659_vm10  ;;  %v2289_v50 = vadd.f32 %v3352_v31, %v2288_v62  ;;  %v3354_v17 = vsel %vm6522_vm13, 1.0, %v7999_v14  ;;  %v8017_v28 = vmov 0  ;;  %v6585_v62 = vld [vmem:[%s4840_s4 + $0x10] sm:$0xff]  ;;  %v3663_v7 = vpop.eup %3662 }
 0x261   : > { %8009 = vst [vmem:[#allocation67_spill] sm:$0xff] %v8008_v40  ;;  %v8011_v24 = vsel %vm6543_vm8, 4294967295, %v8010_v24  ;;  %vm6556_vm7 = vmand %vm6418_vm4, %vm8013_vm1  ;;  %v3355_v30 = vsel %vm6543_vm8, 1.0, %v7999_v14  ;;  %v2321_v31 = vmul.f32 %v3659_v39, %v6312_v25  ;;  %v2322_v56 = vmul.f32 %v3661_v33, %v6325_v3  ;;  %v3665_v25 = vpop.eup %3664  ;;  %v6604_v40 = vld [vmem:[%s4840_s4 + $0x28] sm:$0xff] }
 0x262   : > { %8012 = vst [vmem:[#allocation68_spill] sm:$0xff] %v8011_v24  ;;  %v8015_v59 = vsel %vm6556_vm7, 4294967295, %v8014_v59  ;;  %vm6576_vm2 = vmand %vm6429_vm3, %vm7654_vm0  ;;  %v2290_v52 = vadd.f32 %v3353_v47, %v2289_v50  ;;  %v3356_v11 = vsel %vm6556_vm7, 1.0, %v7999_v14  ;;  %v2328_v55 = vsub.f32 2.0, %v2320_v43  ;;  %v6596_v24 = vld [vmem:[%s4840_s4 + $0x20] sm:$0xff]  ;;  %v3667_v3 = vpop.eup %3666 }
 0x263   : > { %8016 = vst [vmem:[#allocation69_spill] sm:$0xff] %v8015_v59  ;;  %v8018_v28 = vsel %vm6576_vm2, 4294967295, %v8017_v28  ;;  %3678 = vrsqrt.f32 %v6238_v45  ;;  %v3357_v47 = vsel %vm6576_vm2, 1.0, %v7999_v14  ;;  %v2323_v53 = vmul.f32 %v3663_v7, %v6329_v29  ;;  %8020 = vst [vmem:[#allocation63_spill] sm:$0xff] %v6604_v40  ;;  %v3669_v29 = vpop.eup %3668  ;;  %v6617_v14 = vld [vmem:[%s4840_s4 + $0x38] sm:$0xff] }
 0x264   : > { %8019 = vst [vmem:[#allocation70_spill] sm:$0xff] %v8018_v28  ;;  %v2291_v50 = vadd.f32 %v3354_v17, %v2290_v52  ;;  %v2329_v38 = vsub.f32 2.0, %v2321_v31  ;;  %vm7663_vm3 = vcmp.eq.f32.partialorder %v6565_v51, 1.0  ;;  %vm7664_vm4 = vcmp.eq.f32.partialorder %v6568_v42, 1.0  ;;  %8022 = vst [vmem:[#allocation75_spill] sm:$0xff] %v6617_v14 }
 0x265   : > { %v2324_v43 = vmul.f32 %v3665_v25, %v6333_v34  ;;  %v2330_v59 = vsub.f32 2.0, %v2322_v56  ;;  %v2336_v21 = vmul.f32 %v3657_v32, %v2328_v55  ;;  %vm7667_vm12 = vcmp.eq.f32.partialorder %v6585_v62, 1.0  ;;  %v3671_v34 = vpop.eup %3670 }
 0x266   : > { %3680 = vrsqrt.f32 %v6240_v8  ;;  %v2292_v17 = vadd.f32 %v3355_v30, %v2291_v50  ;;  %v2325_v52 = vmul.f32 %v3667_v3, %v6337_v48  ;;  %v2331_v31 = vsub.f32 2.0, %v2323_v53 }
 0x267   : > { %v2337_v28 = vmul.f32 %v3659_v39, %v2329_v38  ;;  %v2326_v55 = vmul.f32 %v3669_v29, %v6356_v41  ;;  %v2332_v56 = vsub.f32 2.0, %v2324_v43  ;;  %v2338_v32 = vmul.f32 %v3661_v33, %v2330_v59  ;;  %v6625_v38 = vpop.eup %3672 }
 0x268   : > { %v2344_v49 = vmul.f32 %v2336_v21, %v8023_v23  ;;  %v2293_v20 = vadd.f32 %v3356_v11, %v2292_v17  ;;  %v2327_v30 = vmul.f32 %v3671_v34, %v6360_v36  ;;  %v2333_v48 = vsub.f32 2.0, %v2325_v52  ;;  %v6634_v36 = vpop.eup %3674 }
 0x269   : > { %v2339_v53 = vmul.f32 %v3663_v7, %v2331_v31  ;;  %v2334_v39 = vsub.f32 2.0, %v2326_v55  ;;  %v2340_v50 = vmul.f32 %v3665_v25, %v2332_v56  ;;  %v2345_v41 = vmul.f32 %v2337_v28, %v8023_v23  ;;  %v6637_v11 = vpop.eup %3676 }
 0x26a   : > { %v2346_v43 = vmul.f32 %v2338_v32, %v8023_v23  ;;  %2360 = vst [vmem:[%s6631_s18] sm:$0xff] %v2344_v49  ;;  %v2294_v21 = vadd.f32 %v3357_v47, %v2293_v20  ;;  %v2335_v7 = vsub.f32 2.0, %v2327_v30  ;;  %v2341_v59 = vmul.f32 %v3667_v3, %v2333_v48 }
 0x26b   : > { %v2347_v33 = vmul.f32 %v2339_v53, %v8023_v23  ;;  %v2342_v28 = vmul.f32 %v3669_v29, %v2334_v39  ;;  %v2348_v25 = vmul.f32 %v2340_v50, %v8023_v23  ;;  %v2400_v17 = vsub.f32 %v6435_v58, %v2344_v49  ;;  %2361 = vst [vmem:[%s6631_s18 + $0x8] sm:$0xff] %v2345_v41 }
 0x26c   : > { %v2401_v52 = vsub.f32 %v6450_v57, %v2345_v41  ;;  %2362 = vst [vmem:[%s6631_s18 + $0x10] sm:$0xff] %v2346_v43  ;;  %v2343_v31 = vmul.f32 %v3671_v34, %v2335_v7  ;;  %v2349_v20 = vmul.f32 %v2341_v59, %v8023_v23  ;;  %v2402_v47 = vsub.f32 %v6453_v46, %v2346_v43  ;;  %v6679_v7 = vpop.xlane.xlu0 %1160  ;;  %v6681_v59 = vpop.xlane.xlu1 %1336 }
 0x26d   : > { %v2403_v3 = vsub.f32 %v6469_v6, %v2347_v33  ;;  %2295 = vadd.xlane.f32.xlu0 %v2294_v21  ;;  %2363 = vst [vmem:[%s6631_s18 + $0x18] sm:$0xff] %v2347_v33  ;;  %v3679_v29 = vpop.eup %3678  ;;  %v2350_v55 = vmul.f32 %v2342_v28, %v8023_v23  ;;  %v2404_v56 = vsub.f32 %v6472_v10, %v2348_v25  ;;  %v2408_v49 = vand.u32 2147483647, %v2400_v17 }
 0x26e   : > { %v2409_v58 = vand.u32 2147483647, %v2401_v52  ;;  %2364 = vst [vmem:[%s6631_s18 + $0x20] sm:$0xff] %v2348_v25  ;;  %v2351_v57 = vmul.f32 %v2343_v31, %v8023_v23  ;;  %v2405_v46 = vsub.f32 %v6490_v60, %v2349_v20  ;;  %v2410_v6 = vand.u32 2147483647, %v2402_v47  ;;  %2365 = vst [vmem:[%s6631_s18 + $0x28] sm:$0xff] %v2349_v20 }
 0x26f   : > { %v2411_v34 = vand.u32 2147483647, %v2403_v3  ;;  %v2406_v32 = vsub.f32 %v6510_v13, %v2350_v55  ;;  %v2412_v30 = vand.u32 2147483647, %v2404_v56  ;;  %v2416_v48 = vsel %vm7663_vm3, %v2408_v49, 0.0  ;;  %2366 = vst [vmem:[%s6631_s18 + $0x30] sm:$0xff] %v2350_v55 }
 0x270   : > { %v3681_v10 = vpop.eup %3680  ;;  %v2417_v23 = vsel %vm7664_vm4, %v2409_v58, 0.0  ;;  %v2407_v60 = vsub.f32 %v6530_v54, %v2351_v57  ;;  %v2413_v53 = vand.u32 2147483647, %v2405_v46  ;;  %v2418_v39 = vsel %vm7667_vm12, %v2410_v6, 0.0  ;;  %2367 = vst [vmem:[%s6631_s18 + $0x38] sm:$0xff] %v2351_v57  ;;  %v6736_v47 = vpop.xlane.xlu0 %1256  ;;  %v8057_v58 = vld [vmem:[#allocation79_spill] sm:$0xff] }
 0x271   : > { %vm8024_vm10 = vcmp.eq.f32.partialorder %v6588_v0, 1.0  ;;  %v2414_v13 = vand.u32 2147483647, %v2406_v32  ;;  %vm8025_vm4 = vcmp.eq.f32.partialorder %v6596_v24, 1.0  ;;  %v2154_v41 = vand.u32 2147483648, %v6238_v45  ;;  %v6738_v3 = vpop.xlane.xlu1 %1376  ;;  %v8068_v32 = vld [vmem:[#allocation80_spill] sm:$0xff] }
 0x272   : > { %v2419_v50 = vsel %vm8024_vm10, %v2411_v34, 0.0  ;;  %v2420_v54 = vsel %vm8025_vm4, %v2412_v30, 0.0  ;;  %v2415_v43 = vand.u32 2147483647, %v2407_v60  ;;  %vm8026_vm12 = vcmp.eq.f32.partialorder %v6604_v40, 1.0 }
 0x273   : > { %v2421_v21 = vsel %vm8026_vm12, %v2413_v53, 0.0  ;;  %vm8027_vm3 = vcmp.eq.f32.partialorder %v6610_v35, 1.0  ;;  %vm2440_vm4 = vcmp.gt.f32.partialorder %v2416_v48, %v6475_v18  ;;  %vm8028_vm1 = vcmp.eq.f32.partialorder %v6617_v14, 1.0  ;;  %v8080_v53 = vld [vmem:[#allocation82_spill] sm:$0xff] }
 0x274   : > { %v2422_v33 = vsel %vm8027_vm3, %v2414_v13, 0.0  ;;  %v2423_v28 = vsel %vm8028_vm1, %v2415_v43, 0.0  ;;  %vm2441_vm8 = vcmp.gt.f32.partialorder %v2417_v23, %v6493_v5  ;;  %vm2442_vm12 = vcmp.gt.f32.partialorder %v2418_v39, %v6496_v37  ;;  %v8088_v43 = vld [vmem:[#allocation94_spill] sm:$0xff]  ;;  %v1401_v25 = vpop.xlane.xlu0 %1400 }
 0x275   : > { %vm8029_vm7 = vcmp.gt.f32.partialorder %v2416_v48, 3.0  ;;  %vm2443_vm3 = vcmp.gt.f32.partialorder %v2419_v50, %v6513_v9  ;;  %vm2444_vm9 = vcmp.gt.f32.partialorder %v2420_v54, %v6516_v22  ;;  %vm8032_vm0 = vcmp.gt.f32.partialorder %v2417_v23, 3.0  ;;  %v6838_v18 = vpop.xlane.xlu1 %1456 }
 0x276   : > { %vm6691_vm10 = vmand %vm8029_vm7, %vm2440_vm4  ;;  %vm2445_vm1 = vcmp.gt.f32.partialorder %v2421_v21, %v6533_v4  ;;  %vm2446_vm2 = vcmp.gt.f32.partialorder %v2422_v33, %v6536_v61  ;;  %vm8035_vm5 = vcmp.gt.f32.partialorder %v2418_v39, 3.0  ;;  %v2129_v37 = vmul.f32 %v6625_v38, %v6232_v26  ;;  %v8082_v39 = vld [vmem:[#allocation51_spill] sm:$0xff] }
 0x277   : > { %vm6698_vm11 = vmand %vm8032_vm0, %vm2441_vm8  ;;  %v2136_v9 = vmul.f32 %v6634_v36, %v6234_v15  ;;  %vm8038_vm4 = vcmp.gt.f32.partialorder %v2419_v50, 3.0  ;;  %v8039_v22 = vmov 0  ;;  %v2143_v17 = vmul.f32 %v6637_v11, %v6236_v12  ;;  %v8084_v50 = vld [vmem:[#allocation71_spill] sm:$0xff] }
 0x278   : > { %vm6705_vm7 = vmand %vm8035_vm5, %vm2442_vm12  ;;  %v2150_v52 = vmul.f32 %v3679_v29, %v6238_v45  ;;  %v2157_v31 = vmul.f32 %v3681_v10, %v6240_v8  ;;  %vm2158_vm5 = vcmp.eq.f32.partialorder %v6240_v8, inf  ;;  %vm2447_vm8 = vcmp.gt.f32.partialorder %v2423_v28, %v6548_v1  ;;  %v1529_v48 = vpop.xlane.xlu0 %1528 }
 0x279   : > { %vm6714_vm0 = vmand %vm8038_vm4, %vm2443_vm3  ;;  %vm8041_vm12 = vcmp.gt.f32.partialorder %v2420_v54, 3.0  ;;  %v8042_v38 = vmov 0  ;;  %vm8044_vm3 = vcmp.eq.f32.partialorder %v6232_v26, inf  ;;  %vm8045_vm4 = vcmp.eq.f32.partialorder %v6234_v15, inf  ;;  %v8086_v54 = vld [vmem:[#allocation93_spill] sm:$0xff]  ;;  %v1577_v30 = vpop.xlane.xlu1 %1576 }
 0x27a   : > { %v8040_v22 = vsel %vm6714_vm0, 4294967295, %v8039_v22  ;;  %vm6725_vm6 = vmand %vm8041_vm12, %vm2444_vm9  ;;  %v2131_v36 = vsel %vm8044_vm3, %v6232_v26, %v2129_v37  ;;  %v2138_v11 = vsel %vm8045_vm4, %v6234_v15, %v2136_v9  ;;  %v2161_v20 = vand.u32 2147483648, %v6240_v8  ;;  %v8096_v37 = vld [vmem:[#allocation83_spill] sm:$0xff] }
 0x27b   : > { %v8043_v38 = vsel %vm6725_vm6, 4294967295, %v8042_v38  ;;  %vm8046_vm9 = vcmp.gt.f32.partialorder %v2421_v21, 3.0  ;;  %vm8049_vm3 = vcmp.eq.f32.partialorder %v6236_v12, inf  ;;  %vm8050_vm4 = vcmp.eq.f32.partialorder %v6238_v45, inf  ;;  %v8098_v9 = vld [vmem:[#allocation67_spill] sm:$0xff] }
 0x27c   : > { %vm6743_vm12 = vmand %vm8046_vm9, %vm2445_vm1  ;;  %v2145_v29 = vsel %vm8049_vm3, %v6236_v12, %v2143_v17  ;;  %v2152_v55 = vsel %vm8050_vm4, %v6238_v45, %v2150_v52  ;;  %vm2160_vm13 = vcmp.eq.f32.partialorder %v6240_v8, 0.0  ;;  %vm8051_vm6 = vcmp.gt.f32.partialorder %v2422_v33, 3.0  ;;  %v8090_v33 = vld [vmem:[#allocation95_spill] sm:$0xff]  ;;  %v8100_v17 = vld [vmem:[#allocation96_spill] sm:$0xff] }
 0x27d   : > { %vm6757_vm0 = vmand %vm8051_vm6, %vm2446_vm2  ;;  %v2159_v56 = vsel %vm2158_vm5, %v6240_v8, %v2157_v31  ;;  %3682 = vrsqrt.f32 %v6242_v44  ;;  %vm8054_vm1 = vcmp.gt.f32.partialorder %v2423_v28, 3.0  ;;  %v8058_v61 = vand.u32 2147483648, %v6232_v26 }
 0x27e   : > { %vm6764_vm9 = vmand %vm8054_vm1, %vm2447_vm8  ;;  %vm8059_vm6 = vcmp.eq.f32.partialorder %v6232_v26, 0.0  ;;  %v8060_v46 = vand.u32 2147483648, %v6234_v15  ;;  %vm8061_vm2 = vcmp.eq.f32.partialorder %v6234_v15, 0.0  ;;  %v8062_v6 = vand.u32 2147483648, %v6236_v12 }
 0x27f   : > { %v2134_v57 = vsel %vm8059_vm6, %v8058_v61, %v2131_v36  ;;  %vm8063_vm5 = vcmp.eq.f32.partialorder %v6236_v12, 0.0  ;;  %vm8064_vm8 = vcmp.eq.f32.partialorder %v6238_v45, 0.0  ;;  %vm8065_vm4 = vcmp.eq.f32.partialorder %v6565_v51, 1.0  ;;  %v8074_v45 = vld [vmem:[#allocation81_spill] sm:$0xff] }
 0x280   : > { %v2141_v8 = vsel %vm8061_vm2, %v8060_v46, %v2138_v11  ;;  %v2148_v34 = vsel %vm8063_vm5, %v8062_v6, %v2145_v29  ;;  %v2155_v10 = vsel %vm8064_vm8, %v2154_v41, %v2152_v55  ;;  %vm6790_vm1 = vmand %vm6691_vm10, %vm8065_vm4  ;;  %vm8070_vm2 = vnez %v7998_v63  ;;  %v8112_v46 = vld [vmem:[#allocation68_spill] sm:$0xff] }
 0x281   : > { %v2162_v15 = vsel %vm2160_vm13, %v2161_v20, %v2159_v56  ;;  %3684 = vrsqrt.f32 %v6244_v2  ;;  %vm8071_vm5 = vcmp.eq.f32.partialorder %v6568_v42, 1.0  ;;  %vm8085_vm10 = vcmp.eq.f32.partialorder %v8084_v50, 1.0 }
 0x282   : > { %vm6804_vm8 = vmand %vm6698_vm11, %vm8071_vm5  ;;  %3686 = vrsqrt.f32 %v6246_v19  ;;  %vm8077_vm11 = vcmp.eq.f32.partialorder %v6585_v62, 1.0  ;;  %v2184_v13 = vsel %vm8085_vm10, %v2134_v57, 0.0  ;;  %vm8087_vm4 = vcmp.eq.f32.partialorder %v8086_v54, 1.0  ;;  %v8110_v57 = vld [vmem:[#allocation84_spill] sm:$0xff] }
 0x283   : > { %vm6821_vm13 = vmand %vm6705_vm7, %vm8077_vm11  ;;  %v2185_v41 = vsel %vm8087_vm4, %v2141_v8, 0.0  ;;  %vm8089_vm6 = vcmp.eq.f32.partialorder %v8088_v43, 1.0  ;;  %vm8091_vm7 = vcmp.eq.f32.partialorder %v8090_v33, 1.0  ;;  %vm8092_vm11 = vcmp.eq.f32.partialorder %v6588_v0, 1.0 }
 0x284   : > { %v2186_v21 = vsel %vm8089_vm6, %v2148_v34, 0.0  ;;  %v2187_v28 = vsel %vm8091_vm7, %v2155_v10, 0.0  ;;  %vm8093_vm15 = vnez %v8040_v22  ;;  %vm8099_vm4 = vnez %v8098_v9 }
 0x285   : > { %vm6844_vm14 = vmand %vm8093_vm15, %vm8092_vm11  ;;  %vm8101_vm3 = vcmp.eq.f32.partialorder %v8100_v17, 1.0  ;;  %v2192_v31 = vadd.f32 %v2185_v41, %v2184_v13  ;;  %v8102_v36 = vmov 0.0   ;;  %vm8103_vm15 = vcmp.eq.f32.partialorder %v6596_v24, 1.0 }
 0x286   : > { %v2188_v52 = vsel %vm8101_vm3, %v2162_v15, 0.0  ;;  %v3358_v22 = vsel %vm6790_vm1, 1.0, %v8102_v36  ;;  %v3359_v11 = vsel %vm6804_vm8, 1.0, %v8102_v36  ;;  %vm8104_vm11 = vnez %v8043_v38 }
 0x287   : > { %vm6866_vm5 = vmand %vm8104_vm11, %vm8103_vm15  ;;  %v3360_v29 = vsel %vm6821_vm13, 1.0, %v8102_v36  ;;  %v3361_v55 = vsel %vm6844_vm14, 1.0, %v8102_v36  ;;  %v2480_v56 = vadd.f32 %v3359_v11, %v3358_v22  ;;  %v1162_v61 = vrot.slane %v6679_v7, 4 }
 0x288   : > { %vm8107_vm3 = vcmp.eq.f32.partialorder %v6604_v40, 1.0  ;;  %v8108_v38 = vmov 0  ;;  %v2193_v8 = vadd.f32 %v2192_v31, %v2186_v21  ;;  %v3362_v6 = vsel %vm6866_vm5, 1.0, %v8102_v36  ;;  %v8174_v31 = vld [vmem:[#allocation50_spill] sm:$0xff] }
 0x289   : > { %vm6882_vm15 = vmand %vm6743_vm12, %vm8107_vm3  ;;  %v1338_v34 = vrot.slane %v6681_v59, 4  ;;  %v1258_v10 = vrot.slane %v6736_v47, 4  ;;  %vm8114_vm10 = vcmp.eq.f32.partialorder %v6610_v35, 1.0  ;;  %v8115_v1 = vmov 0 }
 0x28a   : > { %v8109_v38 = vsel %vm6882_vm15, 4294967295, %v8108_v38  ;;  %vm6899_vm12 = vmand %vm6757_vm0, %vm8114_vm10  ;;  %v3363_v15 = vsel %vm6882_vm15, 1.0, %v8102_v36  ;;  %v2481_v13 = vadd.f32 %v3360_v29, %v2480_v56  ;;  %v1163_v41 = vadd.f32 %v1162_v61, %v6679_v7  ;;  %v3683_v7 = vpop.eup %3682  ;;  %v8120_v56 = vld [vmem:[#allocation85_spill] sm:$0xff] }
 0x28b   : > { %v8116_v1 = vsel %vm6899_vm12, 4294967295, %v8115_v1  ;;  %v1378_v21 = vrot.slane %v6738_v3, 4  ;;  %vm8117_vm3 = vcmp.eq.f32.partialorder %v6617_v14, 1.0  ;;  %v2194_v4 = vadd.f32 %v2193_v8, %v2187_v28  ;;  %v8122_v61 = vld [vmem:[#allocation69_spill] sm:$0xff]  ;;  %v8124_v14 = vld [vmem:[#allocation86_spill] sm:$0xff]  ;;  %v3685_v40 = vpop.eup %3684 }
 0x28c   : > { %vm6912_vm6 = vmand %vm6764_vm9, %vm8117_vm3  ;;  %v3364_v22 = vsel %vm6899_vm12, 1.0, %v8102_v36  ;;  %v1339_v11 = vadd.f32 %v1338_v34, %v6681_v59  ;;  %v1259_v29 = vadd.f32 %v1258_v10, %v6736_v47  ;;  %v2482_v23 = vadd.f32 %v3361_v55, %v2481_v13  ;;  %v8126_v59 = vld [vmem:[#allocation70_spill] sm:$0xff] }
 0x28d   : > { %v3365_v49 = vsel %vm6912_vm6, 1.0, %v8102_v36  ;;  %v1164_v28 = vrot.slane %v1163_v41, 2  ;;  %v1379_v8 = vadd.f32 %v1378_v21, %v6738_v3  ;;  %vm8127_vm3 = vnez %v8126_v59 }
 0x28e   : > { %v2164_v47 = vmul.f32 %v3683_v7, %v6242_v44  ;;  %v2195_v34 = vadd.f32 %v2194_v4, %v2188_v52  ;;  %v1340_v10 = vrot.slane %v1339_v11, 2  ;;  %v1260_v35 = vrot.slane %v1259_v29, 2  ;;  %v3687_v52 = vpop.eup %3686 }
 0x28f   : > { %vm8128_vm11 = vnez %v7995_v27  ;;  %vm8129_vm0 = vnez %v8057_v58  ;;  %v2483_v55 = vadd.f32 %v3362_v6, %v2482_v23  ;;  %v1380_v13 = vrot.slane %v1379_v8, 2 }
 0x290   : > { %vm8130_vm10 = vmor %vm8128_vm11, %vm8129_vm0  ;;  %v1402_v21 = vrot.slane %v1401_v25, 4  ;;  %v1458_v7 = vrot.slane %v6838_v18, 4  ;;  %vm8133_vm12 = vnez %v8068_v32  ;;  %v2171_v26 = vmul.f32 %v3685_v40, %v6244_v2 }
 0x291   : > { %vm6941_vm7 = vmor %vm8130_vm10, %vm6790_vm1  ;;  %vm8137_vm1 = vcmp.eq.f32.partialorder %v6242_v44, inf  ;;  %v1530_v23 = vrot.slane %v1529_v48, 4  ;;  %v1578_v6 = vrot.slane %v1577_v30, 4  ;;  %vm8138_vm11 = vnez %v8002_v16 }
 0x292   : > { %vm8134_vm15 = vmor %vm8070_vm2, %vm8133_vm12  ;;  %v2166_v58 = vsel %vm8137_vm1, %v6242_v44, %v2164_v47  ;;  %vm8139_vm0 = vnez %v8074_v45  ;;  %v8143_v32 = vand.u32 2147483648, %v6242_v44  ;;  %v2178_v40 = vmul.f32 %v3687_v52, %v6246_v19  ;;  %v8151_v45 = vld [vmem:[#allocation60_spill] sm:$0xff] }
 0x293   : > { %vm6953_vm9 = vmor %vm8134_vm15, %vm6804_vm8  ;;  %vm8144_vm8 = vcmp.eq.f32.partialorder %v6242_v44, 0.0  ;;  %v2484_v4 = vadd.f32 %v3363_v15, %v2483_v55  ;;  %v1403_v47 = vadd.f32 %v1402_v21, %v1401_v25  ;;  %vm8145_vm15 = vnez %v8082_v39  ;;  %v1625_v55 = vpop.xlane.xlu0 %1624  ;;  %v8166_v21 = vld [vmem:[#allocation74_spill] sm:$0xff] }
 0x294   : > { %vm8140_vm10 = vmor %vm8138_vm11, %vm8139_vm0  ;;  %v2169_v12 = vsel %vm8144_vm8, %v8143_v32, %v2166_v58  ;;  %vm8146_vm12 = vnez %v8080_v53  ;;  %vm8150_vm11 = vcmp.eq.f32.partialorder %v6244_v2, inf  ;;  %vm8152_vm0 = vcmp.eq.f32.partialorder %v8151_v45, 1.0 }
 0x295   : > { %vm6968_vm2 = vmor %vm8140_vm10, %vm6821_vm13  ;;  %v2173_v44 = vsel %vm8150_vm11, %v6244_v2, %v2171_v26  ;;  %v2189_v60 = vsel %vm8152_vm0, %v2169_v12, 0.0  ;;  %v1459_v25 = vadd.f32 %v1458_v7, %v6838_v18  ;;  %v1531_v15 = vadd.f32 %v1530_v23, %v1529_v48 }
 0x296   : > { %vm8147_vm1 = vmor %vm8145_vm15, %vm8146_vm12  ;;  %vm8153_vm10 = vnez %v8096_v37  ;;  %v8157_v39 = vand.u32 2147483648, %v6244_v2  ;;  %vm8158_vm15 = vcmp.eq.f32.partialorder %v6244_v2, 0.0  ;;  %vm8159_vm12 = vcmp.eq.f32.partialorder %v6246_v19, inf }
 0x297   : > { %vm6984_vm13 = vmor %vm8147_vm1, %vm6844_vm14  ;;  %v2180_v48 = vsel %vm8159_vm12, %v6246_v19, %v2178_v40  ;;  %v2196_v18 = vadd.f32 %v2195_v34, %v2189_v60  ;;  %v2485_v20 = vadd.f32 %v3364_v22, %v2484_v4  ;;  %v8162_v37 = vmov 0 }
 0x298   : > { %vm8154_vm14 = vmor %vm8099_vm4, %vm8153_vm10  ;;  %v2176_v5 = vsel %vm8158_vm15, %v8157_v39, %v2173_v44  ;;  %v8164_v2 = vand.u32 2147483648, %v6246_v19  ;;  %vm8165_vm11 = vcmp.eq.f32.partialorder %v6246_v19, 0.0  ;;  %vm8167_vm0 = vcmp.eq.f32.partialorder %v8166_v21, 1.0 }
 0x299   : > { %vm7001_vm8 = vmor %vm8154_vm14, %vm6866_vm5  ;;  %vm8160_vm5 = vnez %v8124_v14  ;;  %v2190_v22 = vsel %vm8167_vm0, %v2176_v5, 0.0  ;;  %v1404_v34 = vrot.slane %v1403_v47, 2  ;;  %v1460_v7 = vrot.slane %v1459_v25, 2 }
 0x29a   : > { %vm8161_vm4 = vmor %vm8127_vm3, %vm8160_vm5  ;;  %v2183_v9 = vsel %vm8165_vm11, %v8164_v2, %v2180_v48  ;;  %vm8168_vm10 = vnez %v8109_v38  ;;  %vm8169_vm14 = vnez %v8112_v46  ;;  %vm8170_vm3 = vnez %v8110_v57  ;;  %v8207_v48 = vld [vmem:[#allocation54_spill] sm:$0xff]  ;;  %v8238_v38 = vld [vmem:[#allocation72_spill] sm:$0xff] }
 0x29b   : > { %vm7019_vm1 = vmor %vm8161_vm4, %vm6912_vm6  ;;  %vm8175_vm12 = vcmp.eq.f32.partialorder %v8174_v31, 1.0  ;;  %v2197_v59 = vadd.f32 %v2196_v18, %v2190_v22  ;;  %v2486_v52 = vadd.f32 %v3365_v49, %v2485_v20  ;;  %v1532_v58 = vrot.slane %v1531_v15, 2  ;;  %v8219_v22 = vld [vmem:[#allocation56_spill] sm:$0xff] }
 0x29c   : > { %v8163_v37 = vsel %vm7019_vm1, 4294967295, %v8162_v37  ;;  %vm8171_vm6 = vmor %vm8169_vm14, %vm8170_vm3  ;;  %v2191_v19 = vsel %vm8175_vm12, %v2183_v9, 0.0  ;;  %vm8176_vm5 = vnez %v8116_v1  ;;  %vm8177_vm4 = vnez %v8122_v61 }
 0x29d   : > { %vm7036_vm15 = vmor %vm8171_vm6, %vm8168_vm10  ;;  %vm8178_vm11 = vnez %v8120_v56  ;;  %v1579_v57 = vadd.f32 %v1578_v6, %v1577_v30  ;;  %v1626_v46 = vrot.slane %v1625_v55, 4  ;;  %v1165_v26 = vadd.f32 %v1164_v28, %v1163_v41 }
 0x29e   : > { %vm8179_vm0 = vmor %vm8177_vm4, %vm8178_vm11  ;;  %v1261_v23 = vadd.f32 %v1260_v35, %v1259_v29  ;;  %vm8182_vm10 = vcmp.eq.f32.partialorder %v8084_v50, 1.0  ;;  %v2198_v1 = vadd.f32 %v2197_v59, %v2191_v19  ;;  %v1341_v61 = vadd.f32 %v1340_v10, %v1339_v11 }
 0x29f   : > { %vm7049_vm1 = vmor %vm8179_vm0, %vm8176_vm5  ;;  %v1381_v56 = vadd.f32 %v1380_v13, %v1379_v8  ;;  %v1405_v32 = vadd.f32 %v1404_v34, %v1403_v47  ;;  %vm8185_vm3 = vcmp.eq.f32.partialorder %v8086_v54, 1.0  ;;  %v1580_v35 = vrot.slane %v1579_v57, 2  ;;  %v8223_v34 = vld [vmem:[#allocation58_spill] sm:$0xff] }
 0x2a0   : > { %vm7057_vm14 = vmand %vm6941_vm7, %vm8182_vm10  ;;  %v1627_v50 = vadd.f32 %v1626_v46, %v1625_v55  ;;  %v1166_v41 = vrot.slane %v1165_v26, 1  ;;  %v1262_v29 = vrot.slane %v1261_v23, 1  ;;  %vm8188_vm7 = vcmp.eq.f32.partialorder %v8088_v43, 1.0  ;;  %2199 = vadd.xlane.f32.xlu1 %v2198_v1  ;;  %v8215_v55 = vld [vmem:[#allocation55_spill] sm:$0xff] }
 0x2a1   : > { %vm7065_vm6 = vmand %vm6953_vm9, %vm8185_vm3  ;;  %v1342_v54 = vrot.slane %v1341_v61, 1  ;;  %v1382_v28 = vrot.slane %v1381_v56, 1  ;;  %v1406_v8 = vrot.slane %v1405_v32, 1  ;;  %v1461_v10 = vadd.f32 %v1460_v7, %v1459_v25  ;;  %v8203_v25 = vld [vmem:[#allocation52_spill] sm:$0xff]  ;;  %v8225_v7 = vld [vmem:[#allocation59_spill] sm:$0xff] }
 0x2a2   : > { %vm7073_vm12 = vmand %vm6968_vm2, %vm8188_vm7  ;;  %vm8191_vm9 = vcmp.eq.f32.partialorder %v8090_v33, 1.0  ;;  %v1628_v43 = vrot.slane %v1627_v50, 2  ;;  %v1167_v13 = vadd.f32 %v1166_v41, %v1165_v26  ;;  %v1263_v27 = vadd.f32 %v1262_v29, %v1261_v23  ;;  %v8240_v46 = vld [vmem:[#allocation75_spill] sm:$0xff] }
 0x2a3   : > { %vm7081_vm5 = vmand %vm6984_vm13, %vm8191_vm9  ;;  %v1533_v6 = vadd.f32 %v1532_v58, %v1531_v15  ;;  %vm8194_vm2 = vcmp.eq.f32.partialorder %v8100_v17, 1.0  ;;  %v1343_v12 = vadd.f32 %v1342_v54, %v1341_v61  ;;  %v1383_v33 = vadd.f32 %v1382_v28, %v1381_v56  ;;  %v8236_v58 = vld [vmem:[#allocation61_spill] sm:$0xff] }
 0x2a4   : > { %vm7089_vm4 = vmand %vm7001_vm8, %vm8194_vm2  ;;  %v1462_v40 = vrot.slane %v1461_v10, 1  ;;  %vm8197_vm13 = vcmp.eq.f32.partialorder %v8151_v45, 1.0  ;;  %3408 = vpush %v1167_v13  ;;  %v1407_v47 = vadd.f32 %v1406_v8, %v1405_v32  ;;  %v1581_v16 = vadd.f32 %v1580_v35, %v1579_v57  ;;  %2487 = vadd.xlane.f32.xlu1 %v2486_v52  ;;  %v8234_v52 = vld [vmem:[#allocation63_spill] sm:$0xff] }
 0x2a5   : > { %vm7097_vm11 = vmand %vm7036_vm15, %vm8197_vm13  ;;  %v1534_v17 = vrot.slane %v1533_v6, 1  ;;  %v1629_v44 = vadd.f32 %v1628_v43, %v1627_v50  ;;  %vm8200_vm8 = vcmp.eq.f32.partialorder %v8166_v21, 1.0  ;;  %3410 = vpush %v1263_v27  ;;  %vm8204_vm15 = vcmp.eq.f32.partialorder %v8203_v25, 1.0 }
 0x2a6   : > { %vm7105_vm0 = vmand %vm7049_vm1, %vm8200_vm8  ;;  %v1463_v45 = vadd.f32 %v1462_v40, %v1461_v10  ;;  %3412 = vpush %v1343_v12  ;;  %v1582_v39 = vrot.slane %v1581_v16, 1  ;;  %vm8208_vm1 = vcmp.eq.f32.partialorder %v8207_v48, 1.0  ;;  %vm8211_vm7 = vcmp.eq.f32.partialorder %v8174_v31, 1.0 }
 0x2a7   : > { %vm7113_vm10 = vmand %vm7057_vm14, %vm8204_vm15  ;;  %v1535_v53 = vadd.f32 %v1534_v17, %v1533_v6  ;;  %v1630_v5 = vrot.slane %v1629_v44, 1  ;;  %3414 = vpush %v1383_v33  ;;  %vm8212_vm14 = vnez %v8163_v37  ;;  %vm8216_vm2 = vcmp.eq.f32.partialorder %v8215_v55, 1.0  ;;  %v8221_v37 = vld [vmem:[#allocation57_spill] sm:$0xff] }
 0x2a8   : > { %vm7121_vm3 = vmand %vm7065_vm6, %vm8208_vm1  ;;  %3416 = vpush %v1407_v47  ;;  %v1583_v9 = vadd.f32 %v1582_v39, %v1581_v16  ;;  %vm8220_vm6 = vcmp.eq.f32.partialorder %v8219_v22, 1.0  ;;  %vm8222_vm15 = vcmp.eq.f32.partialorder %v8221_v37, 1.0 }
 0x2a9   : > { %vm7129_vm9 = vmand %vm8212_vm14, %vm8211_vm7  ;;  %v1631_v21 = vadd.f32 %v1630_v5, %v1629_v44  ;;  %3418 = vpush %v1463_v45  ;;  %vm8226_vm14 = vcmp.eq.f32.partialorder %v8225_v7, 1.0 }
 0x2aa   : > { %vm7137_vm13 = vmand %vm7073_vm12, %vm8216_vm2  ;;  %3420 = vpush %v1535_v53  ;;  %vm8224_vm12 = vcmp.eq.f32.partialorder %v8223_v34, 1.0 }
 0x2ab   : > { %vm2523_vm8 = vmand %vm7081_vm5, %vm8220_vm6  ;;  %3422 = vpush %v1583_v9  ;;  %vm8229_vm5 = vcmp.eq.f32.partialorder %v6565_v51, 1.0  ;;  %vm8230_vm6 = vcmp.eq.f32.partialorder %v6568_v42, 1.0 }
 0x2ac   : > { %vm2524_vm1 = vmand %vm7089_vm4, %vm8222_vm15  ;;  %3424 = vpush %v1631_v21  ;;  %vm8231_vm15 = vcmp.eq.f32.partialorder %v6585_v62, 1.0 }
 0x2ad   : > { %vm2525_vm7 = vmand %vm7097_vm11, %vm8224_vm12  ;;  %vm8232_vm12 = vcmp.eq.f32.partialorder %v6588_v0, 1.0 }
 0x2ae   : > { %vm7157_vm2 = vmand %vm7105_vm0, %vm8226_vm14 }
 0x2af   : > { %vm2528_vm4 = vmand %vm7113_vm10, %vm8229_vm5  ;;  %vm8233_vm10 = vcmp.eq.f32.partialorder %v6596_v24, 1.0 }
 0x2b0   : > { %vm2529_vm11 = vmand %vm7121_vm3, %vm8230_vm6  ;;  %v3366_v31 = vsel %vm2528_vm4, 1.0, %v8102_v36  ;;  %vm8235_vm3 = vcmp.eq.f32.partialorder %v8234_v52, 1.0 }
 0x2b1   : > { %vm2530_vm0 = vmand %vm7137_vm13, %vm8231_vm15  ;;  %v3367_v19 = vsel %vm2529_vm11, 1.0, %v8102_v36  ;;  %vm8237_vm13 = vcmp.eq.f32.partialorder %v8236_v58, 1.0 }
 0x2b2   : > { %vm2531_vm14 = vmand %vm2523_vm8, %vm8232_vm12  ;;  %v3368_v51 = vsel %vm2530_vm0, 1.0, %v8102_v36  ;;  %v2552_v59 = vadd.f32 %v3367_v19, %v3366_v31  ;;  %vm8239_vm8 = vcmp.eq.f32.partialorder %v8238_v38, 1.0 }
 0x2b3   : > { %vm2532_vm5 = vmand %vm2524_vm1, %vm8233_vm10  ;;  %v3369_v42 = vsel %vm2531_vm14, 1.0, %v8102_v36 }
 0x2b4   : > { %vm2533_vm4 = vmand %vm2525_vm7, %vm8235_vm3  ;;  %v2553_v62 = vadd.f32 %v3368_v51, %v2552_v59  ;;  %v3370_v0 = vsel %vm2532_vm5, 1.0, %v8102_v36  ;;  %vm8241_vm7 = vcmp.eq.f32.partialorder %v8240_v46, 1.0 }
 0x2b5   : > { %vm2527_vm6 = vmand %vm7129_vm9, %vm8237_vm13  ;;  %v3371_v57 = vsel %vm2533_vm4, 1.0, %v8102_v36 }
 0x2b6   : > { %vm2534_vm1 = vmand %vm7157_vm2, %vm8239_vm8  ;;  %v2554_v24 = vadd.f32 %v3369_v42, %v2553_v62 }
 0x2b7   : > { %vm2535_vm11 = vmand %vm2527_vm6, %vm8241_vm7  ;;  %v3372_v23 = vsel %vm2534_vm1, 1.0, %v8102_v36 }
 0x2b8   : > { %v2555_v26 = vadd.f32 %v3370_v0, %v2554_v24  ;;  %v3373_v1 = vsel %vm2535_vm11, 1.0, %v8102_v36 }
 0x2ba   : > { %v2556_v49 = vadd.f32 %v3371_v57, %v2555_v26 }
 0x2bc   : > { %v2557_v61 = vadd.f32 %v3372_v23, %v2556_v49 }
 0x2be   : > { %v2558_v56 = vadd.f32 %v3373_v1, %v2557_v61 }
 0x2c0   : > { %2559 = vadd.xlane.f32.xlu0 %v2558_v56 }
 0x2c1   : > { %3984 = shalt.err (!%p3981_p10)
}
 0x2c2   : > { %s3985_s28 = scalar_lea.hbm %s7204_s29, 1024  ;;  %s3989_s14 = scalar_lea.hbm %s8242_s15, 2048 }
 0x2c3   : > { %p3986_p12 = scmp.ne.s32.totalorder %s7204_s29, %s3985_s28  ;;  %p3990_p2 = scmp.lt.u32.totalorder %s7204_s29, %s8242_s15 }
 0x2c4   : > { %p3991_p7 = scmp.lt.u32.totalorder %s3989_s14, %s3985_s28  ;;  %p3993_p1 = scmp.lt.u32.totalorder %s3985_s28, %s7204_s29 }
 0x2c5   : > { %p3987_p3 = pnand %p3986_p12, %p8243_p5 }
 0x2c6   : > { %p3992_p6 = por %p3991_p7, %p3990_p2 }
 0x2c7   : > { %p3988_p11 = pneg %p3987_p3 }
 0x2c8   : > { %p3994_p13 = por %p3993_p1, %p3992_p6 }
 0x2ca   : > { %p3995_p0 = pnand %p3994_p13, %p3988_p11 }
 0x2cc   : > { %3998 = shalt.err (!%p3995_p0)
}
 0x2cd   : > { %s4250_s10 = smov 128   ;;  %s4251_s24 = smov 8  }
 0x2ce   : > { %s8244_s16 = scalar_lea.sflag [#allocation24], %s4811_s23  ;;  %s3402_s28 = sshll.u32 %s7878_s26, 11 }
 0x2cf   : > { %3463 = dma.vmem_to_hbm [thread:$0]  (%p8243_p5), %s7207_s19, 1024, %s7204_s29, %s8244_s16, %s4250_s10, %s4250_s10, %s4251_s24  }
 0x2d0   : > { %s2726_s17 = sshll.u32 %s6082_s30, 4  ;;  %s8245_s0 = sld [smem:[#allocation110_spill]]  ;;  %s7243_s17 = int_to_ptr.vmem [resolvable:$true] %s2726_s17 }
 0x2d1   : > { %s7687_s3 = scalar_lea.sflag [#allocation27], %s4811_s23  ;;  %s3999_s5 = scalar_lea.vmem %s7243_s17, 2048 }
 0x2d2   : > { %p4000_p8 = scmp.ne.s32.totalorder %s7243_s17, %s3999_s5  ;;  %s4252_s7 = smov [#allocation26]  }
 0x2d3   : > { %s4003_s29 = sshll.u32 %s4252_s7, 4  ;;  %s4004_s29 = int_to_ptr.vmem [resolvable:$false] %s4003_s29 }
 0x2d4   : > { %p4001_p4 = pnand %p4000_p8, %p8243_p5  ;;  %s4005_s26 = scalar_lea.vmem %s4004_s29, 4096 }
 0x2d5   : > { %p4006_p10 = scmp.lt.s32.totalorder %s7243_s17, %s4004_s29  ;;  %p4007_p12 = scmp.lt.s32.totalorder %s4005_s26, %s3999_s5 }
 0x2d6   : > { %s7241_s2 = scalar_lea.hbm %s8245_s0, %s3402_s28  ;;  %p4002_p9 = pneg %p4001_p4 }
 0x2d7   : > { %p4008_p3 = por %p4007_p12, %p4006_p10 }
 0x2d9   : > { %p4009_p11 = pnand %p4008_p3, %p4002_p9 }
 0x2db   : > { %4012 = shalt.err (!%p4009_p11)
}
 0x2dc   : > { %s4013_s30 = scalar_lea.hbm %s7241_s2, 2048  ;;  %s4017_s7 = scalar_lea.hbm %s8245_s0, 4096 }
 0x2dd   : > { %p4014_p2 = scmp.ne.s32.totalorder %s7241_s2, %s4013_s30  ;;  %p4018_p1 = scmp.lt.u32.totalorder %s7241_s2, %s8245_s0 }
 0x2de   : > { %p4019_p13 = scmp.lt.u32.totalorder %s4017_s7, %s4013_s30  ;;  %p4021_p8 = scmp.lt.u32.totalorder %s4013_s30, %s7241_s2 }
 0x2df   : > { %p4015_p7 = pnand %p4014_p2, %p8243_p5 }
 0x2e0   : > { %p4020_p0 = por %p4019_p13, %p4018_p1 }
 0x2e1   : > { %p4016_p6 = pneg %p4015_p7 }
 0x2e2   : > { %p4022_p4 = por %p4021_p8, %p4020_p0 }
 0x2e4   : > { %p4023_p9 = pnand %p4022_p4, %p4016_p6 }
 0x2e6   : > { %4026 = shalt.err (!%p4023_p9)
}
 0x2e7   : > { %3465 = dma.vmem_to_hbm [thread:$0]  (%p8243_p5), %s7243_s17, 2048, %s7241_s2, %s7687_s3, %s4250_s10, %s4250_s10, %s4251_s24  }
 0x2e8   : > { %s8246_s29 = sld [smem:[#allocation109_spill]]  ;;  %s2708_s30 = sshll.u32 %s5931_s1, 4  ;;  %s7279_s30 = int_to_ptr.vmem [resolvable:$true] %s2708_s30 }
 0x2e9   : > { %s8247_s7 = sld [smem:[#allocation111_spill]]  ;;  %s4027_s4 = scalar_lea.vmem %s7279_s30, 1024 }
 0x2ea   : > { %p4028_p10 = scmp.ne.s32.totalorder %s7279_s30, %s4027_s4  ;;  %s4253_s2 = smov [#allocation25]  }
 0x2eb   : > { %s4031_s17 = sshll.u32 %s4253_s2, 4  ;;  %s4032_s17 = int_to_ptr.vmem [resolvable:$false] %s4031_s17 }
 0x2ec   : > { %p4029_p12 = pnand %p4028_p10, %p8243_p5  ;;  %s4033_s5 = scalar_lea.vmem %s4032_s17, 2048 }
 0x2ed   : > { %p4034_p11 = scmp.lt.s32.totalorder %s7279_s30, %s4032_s17  ;;  %p4035_p2 = scmp.lt.s32.totalorder %s4033_s5, %s4027_s4 }
 0x2ee   : > { %s7276_s26 = scalar_lea.hbm %s8246_s29, %s7198_s6  ;;  %p4030_p3 = pneg %p4029_p12 }
 0x2ef   : > { %s7285_s28 = scalar_lea.hbm %s8247_s7, %s7198_s6  ;;  %p4036_p7 = por %p4035_p2, %p4034_p11 }
 0x2f1   : > { %p4037_p6 = pnand %p4036_p7, %p4030_p3 }
 0x2f3   : > { %4040 = shalt.err (!%p4037_p6)
}
 0x2f4   : > { %s4041_s1 = scalar_lea.hbm %s7276_s26, 1024  ;;  %s4045_s16 = scalar_lea.hbm %s8246_s29, 2048 }
 0x2f5   : > { %p4042_p1 = scmp.ne.s32.totalorder %s7276_s26, %s4041_s1  ;;  %p4046_p8 = scmp.lt.u32.totalorder %s7276_s26, %s8246_s29 }
 0x2f6   : > { %p4047_p4 = scmp.lt.u32.totalorder %s4045_s16, %s4041_s1  ;;  %p4049_p10 = scmp.lt.u32.totalorder %s4041_s1, %s7276_s26 }
 0x2f7   : > { %p4043_p13 = pnand %p4042_p1, %p8243_p5 }
 0x2f8   : > { %p4048_p9 = por %p4047_p4, %p4046_p8 }
 0x2f9   : > { %p4044_p0 = pneg %p4043_p13 }
 0x2fa   : > { %p4050_p12 = por %p4049_p10, %p4048_p9 }
 0x2fc   : > { %p4051_p3 = pnand %p4050_p12, %p4044_p0 }
 0x2fe   : > { %4054 = shalt.err (!%p4051_p3)
}
 0x2ff   : > { %s8248_s4 = scalar_lea.sflag [#allocation24], %s4811_s23  ;;  %s2744_s5 = sshll.u32 %s6631_s18, 4  ;;  %s7314_s5 = int_to_ptr.vmem [resolvable:$true] %s2744_s5 }
 0x300   : > { %3464 = dma.vmem_to_hbm [thread:$0]  (%p8243_p5), %s7279_s30, 1024, %s7276_s26, %s8248_s4, %s4250_s10, %s4250_s10, %s4251_s24  }
 0x301   : > { %s8249_s19 = sld [smem:[#allocation112_spill]]  ;;  %s4055_s2 = scalar_lea.vmem %s7314_s5, 1024 }
 0x302   : > { %p4056_p11 = scmp.ne.s32.totalorder %s7314_s5, %s4055_s2  ;;  %s4254_s17 = smov [#allocation28]  }
 0x303   : > { %s4059_s3 = sshll.u32 %s4254_s17, 4  ;;  %s4060_s3 = int_to_ptr.vmem [resolvable:$false] %s4059_s3 }
 0x304   : > { %p4057_p2 = pnand %p4056_p11, %p8243_p5  ;;  %s4061_s26 = scalar_lea.vmem %s4060_s3, 2048 }
 0x305   : > { %p4062_p6 = scmp.lt.s32.totalorder %s7314_s5, %s4060_s3  ;;  %p4063_p1 = scmp.lt.s32.totalorder %s4061_s26, %s4055_s2 }
 0x306   : > { %p4058_p7 = pneg %p4057_p2 }
 0x307   : > { %s7320_s16 = scalar_lea.hbm %s8249_s19, %s7198_s6  ;;  %p4064_p13 = por %p4063_p1, %p4062_p6 }
 0x309   : > { %p4065_p0 = pnand %p4064_p13, %p4058_p7 }
 0x30b   : > { %4068 = shalt.err (!%p4065_p0)
}
 0x30c   : > { %s4069_s18 = scalar_lea.hbm %s7285_s28, 1024  ;;  %s4073_s4 = scalar_lea.hbm %s8247_s7, 2048 }
 0x30d   : > { %p4070_p8 = scmp.ne.s32.totalorder %s7285_s28, %s4069_s18  ;;  %p4074_p10 = scmp.lt.u32.totalorder %s7285_s28, %s8247_s7 }
 0x30e   : > { %p4075_p12 = scmp.lt.u32.totalorder %s4073_s4, %s4069_s18  ;;  %p4077_p11 = scmp.lt.u32.totalorder %s4069_s18, %s7285_s28 }
 0x30f   : > { %p4071_p4 = pnand %p4070_p8, %p8243_p5 }
 0x310   : > { %p4076_p3 = por %p4075_p12, %p4074_p10 }
 0x311   : > { %p4072_p9 = pneg %p4071_p4 }
 0x312   : > { %p4078_p2 = por %p4077_p11, %p4076_p3 }
 0x314   : > { %p4079_p7 = pnand %p4078_p2, %p4072_p9 }
 0x316   : > { %4082 = shalt.err (!%p4079_p7)
}
 0x317   : > { %s8250_s14 = scalar_lea.sflag [#allocation27], %s4811_s23  ;;  %s2762_s2 = sshll.u32 %s6297_s12, 4  ;;  %s7349_s2 = int_to_ptr.vmem [resolvable:$true] %s2762_s2 }
 0x318   : > { %3466 = dma.vmem_to_hbm [thread:$0]  (%p8243_p5), %s7314_s5, 1024, %s7285_s28, %s8250_s14, %s4250_s10, %s4250_s10, %s4251_s24  }
 0x319   : > { %s2661_s17 = scalar_lea.sflag [#allocation30], %s4798_s13  ;;  %s4083_s26 = scalar_lea.vmem %s7349_s2, 1024 }
 0x31a   : > { %p4084_p6 = scmp.ne.s32.totalorder %s7349_s2, %s4083_s26  ;;  %s4255_s18 = smov [#allocation29]  }
 0x31b   : > { %s4087_s23 = sshll.u32 %s4255_s18, 4  ;;  %s4088_s23 = int_to_ptr.vmem [resolvable:$false] %s4087_s23 }
 0x31c   : > { %p4085_p1 = pnand %p4084_p6, %p8243_p5  ;;  %s4089_s6 = scalar_lea.vmem %s4088_s23, 2048 }
 0x31d   : > { %p4090_p0 = scmp.lt.s32.totalorder %s7349_s2, %s4088_s23  ;;  %p4091_p8 = scmp.lt.s32.totalorder %s4089_s6, %s4083_s26 }
 0x31e   : > { %p4086_p13 = pneg %p4085_p1 }
 0x31f   : > { %p4092_p4 = por %p4091_p8, %p4090_p0 }
 0x321   : > { %p4093_p9 = pnand %p4092_p4, %p4086_p13 }
 0x323   : > { %4096 = shalt.err (!%p4093_p9)
}
 0x324   : > { %s4097_s12 = scalar_lea.hbm %s7320_s16, 1024  ;;  %s4101_s30 = scalar_lea.hbm %s8249_s19, 2048 }
 0x325   : > { %p4098_p10 = scmp.ne.s32.totalorder %s7320_s16, %s4097_s12  ;;  %p4102_p11 = scmp.lt.u32.totalorder %s7320_s16, %s8249_s19 }
 0x326   : > { %p4103_p2 = scmp.lt.u32.totalorder %s4101_s30, %s4097_s12  ;;  %p4105_p6 = scmp.lt.u32.totalorder %s4097_s12, %s7320_s16 }
 0x327   : > { %p4099_p12 = pnand %p4098_p10, %p8243_p5 }
 0x328   : > { %p4104_p7 = por %p4103_p2, %p4102_p11 }
 0x329   : > { %p4100_p3 = pneg %p4099_p12 }
 0x32a   : > { %p4106_p1 = por %p4105_p6, %p4104_p7 }
 0x32c   : > { %p4107_p13 = pnand %p4106_p1, %p4100_p3 }
 0x32e   : > { %4110 = shalt.err (!%p4107_p13)
}
 0x32f   : > { %3467 = dma.vmem_to_hbm [thread:$0]  (%p8243_p5), %s7349_s2, 1024, %s7320_s16, %s2661_s17, %s4250_s10, %s4250_s10, %s4251_s24   ;;  %v2296_v36 = vpop.xlane.xlu0 %2295  ;;  %v2200_v50 = vpop.xlane.xlu1 %2199  ;;  %v8251_v25 = vld [vmem:[#allocation53_spill] sm:$0xff] }
 0x330   : > { %v2297_v32 = vrot.slane %v2296_v36, 4  ;;  %v2201_v41 = vrot.slane %v2200_v50, 4  ;;  %s3409_s10 = spop %3408  ;;  %vm2568_vm9 = vcmp.eq.s32.totalorder %v8251_v25, 0  ;;  %v8252_v15 = vld [vmem:[#allocation49_spill] sm:$0xff]  ;;  %s3263_s28 = sshll.u32 %s4798_s13, 3 }
 0x331   : > { %s7378_s24 = spop %3410  ;;  %vm2569_vm2 = vcmp.eq.s32.totalorder %v8252_v15, 0  ;;  %vm2574_vm15 = vcmp.eq.s32.totalorder %v8252_v15, 1  ;;  %v2571_v53 = vstv %s3409_s10  ;;  %vm2579_vm14 = vcmp.eq.s32.totalorder %v8252_v15, 2  ;;  %s914_s30 = scalar_lea.vmem [#allocation22], %s3263_s28 }
 0x332   : > { %v2298_v30 = vadd.f32 %v2297_v32, %v2296_v36  ;;  %v2202_v29 = vadd.f32 %v2201_v41, %v2200_v50  ;;  %s3413_s16 = spop %3412  ;;  %vm2570_vm0 = vmand %vm2568_vm9, %vm2569_vm2  ;;  %vm2584_vm5 = vcmp.eq.s32.totalorder %v8252_v15, 3  ;;  %vm2589_vm4 = vcmp.eq.s32.totalorder %v8252_v15, 4  ;;  %s2675_s4 = sshll.u32 %s914_s30, 4  ;;  %s7428_s4 = int_to_ptr.vmem [resolvable:$true] %s2675_s4 }
 0x333   : > { %v2488_v11 = vpop.xlane.xlu1 %2487  ;;  %vm2575_vm12 = vmand %vm2568_vm9, %vm2574_vm15  ;;  %v2576_v39 = vstv %s3413_s16  ;;  %s3415_s3 = spop %3414  ;;  %v2572_v5 = vsel %vm2570_vm0, %v2571_v53, 0.0  ;;  %vm2594_vm6 = vcmp.eq.s32.totalorder %v8252_v15, 5  ;;  %vm2599_vm1 = vcmp.eq.s32.totalorder %v8252_v15, 6 }
 0x334   : > { %v2299_v35 = vrot.slane %v2298_v30, 2  ;;  %v2203_v28 = vrot.slane %v2202_v29, 2  ;;  %v2489_v8 = vrot.slane %v2488_v11, 4  ;;  %v2577_v48 = vsel %vm2575_vm12, %v2576_v39, 0.0  ;;  %vm2580_vm10 = vmand %vm2568_vm9, %vm2579_vm14  ;;  %s3417_s14 = spop %3416 }
 0x335   : > { %v2581_v18 = vstv %s3415_s3  ;;  %v2578_v20 = vadd.f32 %v2577_v48, %v2572_v5  ;;  %vm2585_vm3 = vmand %vm2568_vm9, %vm2584_vm5  ;;  %v2586_v2 = vstv %s3417_s14  ;;  %s3419_s2 = spop %3418  ;;  %vm2604_vm11 = vcmp.eq.s32.totalorder %v8252_v15, 7  ;;  %s2636_s14 = scalar_lea.sflag [#allocation4], %s4798_s13 }
 0x336   : > { %v2300_v54 = vadd.f32 %v2299_v35, %v2298_v30  ;;  %v2490_v10 = vadd.f32 %v2489_v8, %v2488_v11  ;;  %v2204_v3 = vadd.f32 %v2203_v28, %v2202_v29  ;;  %v2582_v55 = vsel %vm2580_vm10, %v2581_v18, 0.0  ;;  %vm2590_vm13 = vmand %vm2568_vm9, %vm2589_vm4  ;;  %s3421_s17 = spop %3420 }
 0x337   : > { %v2583_v9 = vadd.f32 %v2582_v55, %v2578_v20  ;;  %v2587_v21 = vsel %vm2585_vm3, %v2586_v2, 0.0  ;;  %v2591_v22 = vstv %s3419_s2  ;;  %vm2595_vm8 = vmand %vm2568_vm9, %vm2594_vm6  ;;  %v2596_v7 = vstv %s3421_s17  ;;  %s3423_s26 = spop %3422  ;;  %s4111_s2 = scalar_lea.vmem %s7428_s4, 128 }
 0x338   : > { %v2301_v43 = vrot.slane %v2300_v54, 1  ;;  %v2491_v13 = vrot.slane %v2490_v10, 2  ;;  %v2205_v27 = vrot.slane %v2204_v3, 1  ;;  %v2592_v34 = vsel %vm2590_vm13, %v2591_v22, 0.0  ;;  %vm2600_vm7 = vmand %vm2568_vm9, %vm2599_vm1  ;;  %s3425_s18 = spop %3424  ;;  %p4112_p0 = scmp.ne.s32.totalorder %s7428_s4, %s4111_s2 }
 0x339   : > { %v2588_v37 = vadd.f32 %v2587_v21, %v2583_v9  ;;  %v2597_v31 = vsel %vm2595_vm8, %v2596_v7, 0.0  ;;  %v2601_v19 = vstv %s3423_s26  ;;  %vm2605_vm2 = vmand %vm2568_vm9, %vm2604_vm11  ;;  %v2606_v42 = vstv %s3425_s18  ;;  %s4256_s17 = smov [#allocation22]  }
 0x33a   : > { %v2492_v6 = vadd.f32 %v2491_v13, %v2490_v10  ;;  %v2206_v63 = vadd.f32 %v2205_v27, %v2204_v3  ;;  %v2302_v12 = vadd.f32 %v2301_v43, %v2300_v54  ;;  %v2602_v59 = vsel %vm2600_vm7, %v2601_v19, 0.0  ;;  %p4113_p8 = pnand %p4112_p0, %p8243_p5  ;;  %s4115_s26 = sshll.u32 %s4256_s17, 4  ;;  %s4116_s26 = int_to_ptr.vmem [resolvable:$false] %s4115_s26 }
 0x33b   : > { %v2593_v14 = vadd.f32 %v2592_v34, %v2588_v37  ;;  %vm2609_vm15 = vcmp.eq.s32.totalorder %v8252_v15, 8  ;;  %v2607_v62 = vsel %vm2605_vm2, %v2606_v42, 0.0  ;;  %vm2614_vm0 = vcmp.eq.s32.totalorder %v8252_v15, 9  ;;  %s4117_s18 = scalar_lea.vmem %s4116_s26, 256  ;;  %p4118_p9 = scmp.lt.s32.totalorder %s7428_s4, %s4116_s26 }
 0x33c   : > { %3426 = vpush %v2206_v63  ;;  %v2493_v33 = vrot.slane %v2492_v6, 1  ;;  %vm2610_vm12 = vmand %vm2568_vm9, %vm2609_vm15  ;;  %v2611_v58 = vstv %s7378_s24  ;;  %vm2619_vm10 = vcmp.eq.s32.totalorder %v8252_v15, 10  ;;  %vm2624_vm5 = vcmp.eq.s32.totalorder %v8252_v15, 11  ;;  %s8253_s24 = sld [smem:[#allocation107_spill]]  ;;  %p4114_p4 = pneg %p4113_p8 }
 0x33d   : > { %3428 = vpush %v2302_v12  ;;  %v2598_v51 = vadd.f32 %v2597_v31, %v2593_v14  ;;  %vm2615_vm14 = vmand %vm2568_vm9, %vm2614_vm0  ;;  %v2612_v24 = vsel %vm2610_vm12, %v2611_v58, 0.0  ;;  %vm2629_vm13 = vcmp.eq.s32.totalorder %v8252_v15, 12  ;;  %p4119_p10 = scmp.lt.s32.totalorder %s4117_s18, %s4111_s2 }
 0x33e   : > { %v2494_v40 = vadd.f32 %v2493_v33, %v2492_v6  ;;  %vm2620_vm3 = vmand %vm2568_vm9, %vm2619_vm10 }
 0x33f   : > { %v2603_v52 = vadd.f32 %v2602_v59, %v2598_v51  ;;  %vm2625_vm4 = vmand %vm2568_vm9, %vm2624_vm5  ;;  %p4120_p12 = por %p4119_p10, %p4118_p9 }
 0x340   : > { %3430 = vpush %v2494_v40  ;;  %vm2630_vm6 = vmand %vm2568_vm9, %vm2629_vm13 }
 0x341   : > { %v2608_v0 = vadd.f32 %v2607_v62, %v2603_v52  ;;  %p4121_p3 = pnand %p4120_p12, %p4114_p4 }
 0x342   : > { %s8254_s16 = smov %s8253_s24  ;;  %s7426_s3 = scalar_lea.hbm %s8253_s24, %s5571_s27 }
 0x343   : > { %v2613_v46 = vadd.f32 %v2612_v24, %v2608_v0 }
 0x34d   : > { %v2560_v4 = vpop.xlane.xlu0 %2559 }
 0x34e   : > { %v2561_v47 = vrot.slane %v2560_v4, 4 }
 0x350   : > { %v2562_v17 = vadd.f32 %v2561_v47, %v2560_v4 }
 0x352   : > { %v2563_v16 = vrot.slane %v2562_v17, 2 }
 0x354   : > { %v2564_v44 = vadd.f32 %v2563_v16, %v2562_v17 }
 0x356   : > { %v2565_v60 = vrot.slane %v2564_v44, 1 }
 0x358   : > { %v2566_v45 = vadd.f32 %v2565_v60, %v2564_v44 }
 0x35a   : > { %3432 = vpush %v2566_v45 }
 0x36d   : > { %s3427_s23 = spop %3426 }
 0x36e   : > { %v2616_v38 = vstv %s3427_s23  ;;  %s3429_s6 = spop %3428 }
 0x36f   : > { %v2617_v57 = vsel %vm2615_vm14, %v2616_v38, 0.0  ;;  %v2621_v23 = vstv %s3429_s6 }
 0x370   : > { %v2618_v26 = vadd.f32 %v2617_v57, %v2613_v46  ;;  %v2622_v1 = vsel %vm2620_vm3, %v2621_v23, 0.0 }
 0x371   : > { %s3431_s12 = spop %3430 }
 0x372   : > { %v2626_v49 = vstv %s3431_s12  ;;  %v2623_v61 = vadd.f32 %v2622_v1, %v2618_v26 }
 0x373   : > { %v2627_v56 = vsel %vm2625_vm4, %v2626_v49, 0.0 }
 0x374   : > { %v2628_v36 = vadd.f32 %v2627_v56, %v2623_v61 }
 0x38b   : > { %s3433_s5 = spop %3432 }
 0x38c   : > { %v2631_v32 = vstv %s3433_s5 }
 0x38d   : > { %v2632_v30 = vsel %vm2630_vm6, %v2631_v32, 0.0 }
 0x38e   : > { %v2633_v35 = vadd.f32 %v2632_v30, %v2628_v36 }
 0x390   : > { %2634 = vst [vmem:[%s914_s30] sm:$0xff] %v2633_v35 }
 0x391   : > { %4124 = shalt.err (!%p4121_p3)
}
 0x392   : > { %s4125_s13 = scalar_lea.hbm %s7426_s3, 128  ;;  %s4129_s6 = scalar_lea.hbm %s8254_s16, 256 }
 0x393   : > { %p4126_p11 = scmp.ne.s32.totalorder %s7426_s3, %s4125_s13  ;;  %p4130_p6 = scmp.lt.u32.totalorder %s7426_s3, %s8254_s16 }
 0x394   : > { %p4131_p1 = scmp.lt.u32.totalorder %s4129_s6, %s4125_s13  ;;  %p4133_p0 = scmp.lt.u32.totalorder %s4125_s13, %s7426_s3 }
 0x395   : > { %p4127_p2 = pnand %p4126_p11, %p8243_p5 }
 0x396   : > { %p4132_p13 = por %p4131_p1, %p4130_p6 }
 0x397   : > { %p4128_p7 = pneg %p4127_p2 }
 0x398   : > { %p4134_p8 = por %p4133_p0, %p4132_p13 }
 0x39a   : > { %p4135_p4 = pnand %p4134_p8, %p4128_p7 }
 0x39c   : > { %4138 = shalt.err (!%p4135_p4)
}
 0x39d   : > { %3462 = dma.vmem_to_hbm [thread:$0]  (%p8243_p5), %s7428_s4, 128, %s7426_s3, %s2636_s14  }
 0x39e PF: > { %s8255_s5 = sld [smem:[#allocation48_spill]]  ;;  %s8256_s30 = sld [smem:[#allocation45_spill]] }
 0x39f   : > { %s2777_s1 = sand.u32 1, %s4213_s21  }
 0x3a0   : > { %s2778_s10 = scalar_lea.sflag [#allocation4], %s2777_s1 }
 0x3a4   : > { %p8257_p9 = scmp.ne.s32.totalorder %s8255_s5, 0  ;;  %p8258_p10 = scmp.ge.s32.totalorder %s8256_s30, 2 }
 0x3a6   : > { %p3510_p12 = pnand %p8258_p10, %p8257_p9 }
 0x3a8   : > { %4196 = dma.done.wait (!%p3510_p12), %s2778_s10, 128  }
 0x3a9   : > { %4198 = vsyncadd (!%p3510_p12), %s2778_s10, 4294967168  ;;  %s8259_s24 = sadd.s32 4294967294, %s8256_s30  }
 0x3aa   : > { %s2786_s2 = sand.u32 1, %s8259_s24  }
 0x3ab   : > { %s2787_s17 = scalar_lea.sflag [#allocation24], %s2786_s2 }
 0x3ac   : > { %4200 = dma.done.wait (!%p3510_p12), %s2787_s17, 2048  }
 0x3ad   : > { %4202 = vsyncadd (!%p3510_p12), %s2787_s17, 4294965248  ;;  %s2805_s11 = scalar_lea.sflag [#allocation27], %s2786_s2 }
 0x3ae   : > { %4204 = dma.done.wait (!%p3510_p12), %s2805_s11, 3072  }
 0x3af   : > { %4206 = vsyncadd (!%p3510_p12), %s2805_s11, 4294964224  ;;  %s2823_s4 = scalar_lea.sflag [#allocation30], %s2777_s1 }
 0x3b0   : > { %4208 = dma.done.wait (!%p3510_p12), %s2823_s4, 1024  }
 0x3b1   : > { %4210 = vsyncadd (!%p3510_p12), %s2823_s4, 4294966272  ;;  %s57_s26 = sadd.s32 1, %s8256_s30   ;;  %s8260_s3 = sld [smem:[#allocation43_spill]] }
 0x3b2   : > { %p54_p5 = scmp.ge.s32.totalorder %s57_s26, 4   ;;  %s8261_s23 = sld [smem:[#allocation47_spill]] }
 0x3b3   : > { %s8262_s14 = sld [smem:[#allocation46_spill]]  ;;  %s8263_s21 = smov %s4217_s22 }
 0x3b4   : > { %s8265_s24 = smov %s4229_s25  ;;  %56 = sbr.rel (!%p54_p5) target bundleno = 40 (0x28), region = 293 }
 0x3b7   : > { %s8264_s22 = smov %s8260_s3 }
 0x3b9   : > { %s8266_s25 = smov %s8262_s14 }
 0x3bb   :  { %2828 = vsyncpa [#allocation3], 1 }
 0x3bc   :  { %2830 = vsyncpa [#allocation3 + $0x1], 1 }
 0x3bd   :  { %2831 = vsyncpa [#allocation12], 1 }
 0x3be   :  { %2833 = vsyncpa [#allocation12 + $0x1], 1 }
 0x3bf   :  { %2834 = vsyncpa [#allocation15], 1 }
 0x3c0   :  { %2836 = vsyncpa [#allocation15 + $0x1], 1 }
 0x3c1   :  { %2837 = vsyncpa [#allocation18], 1 }
 0x3c2   :  { %2839 = vsyncpa [#allocation18 + $0x1], 1 }
 0x3c3   :  { %2840 = vsyncpa [#allocation21], 1 }
 0x3c4   :  { %2842 = vsyncpa [#allocation21 + $0x1], 1 }
 0x3c5   :  { %2843 = vsyncpa [#allocation4], 1 }
 0x3c6   :  { %2845 = vsyncpa [#allocation4 + $0x1], 1 }
 0x3c7   :  { %2846 = vsyncpa [#allocation24], 1 }
 0x3c8   :  { %2848 = vsyncpa [#allocation24 + $0x1], 1 }
 0x3c9   :  { %2849 = vsyncpa [#allocation27], 1 }
 0x3ca   :  { %2851 = vsyncpa [#allocation27 + $0x1], 1 }
 0x3cb   :  { %2852 = vsyncpa [#allocation30], 1 }
 0x3cc   :  { %2854 = vsyncpa [#allocation30 + $0x1], 1 }
 0x3cd   :  { %2855 = vsyncpa [#allocation5], 1 }
 0x3ce   :  { %2857 = vsyncpa [#allocation5 + $0x1], 1 }
 0x3cf   :  { %2858 = vsyncpa [#allocation6], 1 }
 0x3d0   :  { %2860 = vsyncpa [#allocation6 + $0x1], 1 }
 0x3d1   :  { %2861 = vsyncpa [#allocation9], 1 }

</bundles_post_ra>
